<compile_context>
chip_gen: v5e
topology: v5e:2x2
jax: 0.10.0
libtpu: 0.0.40
codegen_flags: <defaults>
</compile_context>

<pallas_src>
import functools

import jax
import jax.numpy as jnp
from jax import lax
from jax.experimental import pallas as pl
from jax.experimental.pallas import tpu as pltpu

LN_EPS = 1e-5
_MIB = 1024 * 1024


def _topk_gates(logits, k):
    """Softmax over the top-k logits per row, zeros elsewhere (lowest-index tie-break)."""
    E = logits.shape[-1]
    col = lax.broadcasted_iota(jnp.int32, logits.shape, logits.ndim - 1)
    neg = jnp.float32(-1e30)
    work = logits
    mask = jnp.zeros(logits.shape, dtype=jnp.bool_)
    for _ in range(k):
        m = jnp.max(work, axis=-1, keepdims=True)
        is_max = work == m
        first = jnp.min(jnp.where(is_max, col, E), axis=-1, keepdims=True)
        pick = col == first
        mask = jnp.logical_or(mask, pick)
        work = jnp.where(pick, neg, work)
    masked = jnp.where(mask, logits, neg)
    mx = jnp.max(masked, axis=-1, keepdims=True)
    ex = jnp.exp(masked - mx)
    return ex / jnp.sum(ex, axis=-1, keepdims=True)


# ----------------------------------------------------------------------------------------
# Fused kernel: split proj -> per-head (gate, experts, momentum, LayerNorm) -> merge proj.
# ----------------------------------------------------------------------------------------
def _fused_kernel(x_ref, mom_ref, ws_ref, bs_ref, wg_ref, bg_ref,
                  w1_ref, b1_ref, w2_ref, b2_ref, lng_ref, lnb_ref,
                  wm_ref, bm_ref,
                  out_ref, mom_out_ref,
                  h_scr, o_scr, a_scr,
                  *, num_heads, num_experts, top_k, mu, gamma):
    f32 = jnp.float32
    bf16 = jnp.bfloat16
    tb, D = x_ref.shape
    hd = D // num_heads
    E = num_experts
    hh = w2_ref.shape[1]

    # 1) Split projection: one big bf16 MXU matmul, f32 accumulator staged to VMEM scratch
    #    so the residual / LayerNorm path never sees bf16-rounded sub-tokens.
    h_scr[...] = (jnp.dot(x_ref[...], ws_ref[...], preferred_element_type=f32)
                  + bs_ref[...])

    wg = wg_ref[...]
    bg = bg_ref[...]
    w1 = w1_ref[...]
    b1 = b1_ref[...]
    lng = lng_ref[...]
    lnb = lnb_ref[...]
    col_e = lax.broadcasted_iota(jnp.int32, (tb, E), 1)

    # 2) MoE + momentum + LayerNorm per head.  Heads share the gate / expert weights
    #    (resident in VMEM); per-head work uses static ref slices only (no reshapes).
    for hidx in range(num_heads):
        lo = hidx * hd
        sub = h_scr[:, lo:lo + hd]                     # (tb, hd) f32 sub-tokens
        sub_bf = sub.astype(bf16)

        # TopKGate: softmax over top-k logits, zeros elsewhere.
        logits = jnp.dot(sub_bf, wg, preferred_element_type=f32) + bg
        gates = _topk_gates(logits, top_k)             # (tb, E) f32

        # All experts' FC1 fused into one matmul (K=hd, N=E*hh); ReLU; staged to scratch.
        a_scr[...] = jnp.maximum(
            jnp.dot(sub_bf, w1, preferred_element_type=f32) + b1, 0.0)

        # Per-expert FC2 + gate mixing on the VPU (no padded-K gate matmuls).
        eo = jnp.zeros((tb, hd), f32)
        for e in range(E):
            g_e = jnp.sum(jnp.where(col_e == e, gates, 0.0), axis=-1, keepdims=True)
            a_e = a_scr[:, e * hh:(e + 1) * hh].astype(bf16)
            e_out = (jnp.dot(a_e, w2_ref[e], preferred_element_type=f32)
                     + b2_ref[e])
            eo = eo + g_e * e_out

        # Momentum update, residual subtraction, LayerNorm (biased var, eps=1e-5), all f32.
        mom_new = mu * mom_ref[:, lo:lo + hd] + gamma * eo
        o = sub - mom_new
        mean = jnp.mean(o, axis=-1, keepdims=True)
        var = jnp.mean((o - mean) ** 2, axis=-1, keepdims=True)
        o = (o - mean) * lax.rsqrt(var + LN_EPS) * lng + lnb

        o_scr[:, lo:lo + hd] = o
        mom_out_ref[:, lo:lo + hd] = mom_new

    # 3) Merge projection: one big bf16 MXU matmul, single lane-dense (tb, D) store.
    out = (jnp.dot(o_scr[...].astype(bf16), wm_ref[...], preferred_element_type=f32)
           + bm_ref[...])
    out_ref[...] = out.astype(out_ref.dtype)


# ----------------------------------------------------------------------------------------
# Wrapper helpers: VMEM budgeting and block picking.
# ----------------------------------------------------------------------------------------
def _vmem_capacity_bytes():
    # get_tpu_info reports per-TensorCore VMEM; fall back to the v7x 64 MiB per-core figure.
    try:
        cap = int(pltpu.get_tpu_info().vmem_capacity_bytes)
        if cap > 0:
            return min(cap, 128 * _MIB)
    except Exception:
        pass
    return 64 * _MIB


def _pick_token_block(n_tokens, bytes_per_row, weight_bytes, vmem_cap, target):
    budget = max(vmem_cap - 2 * weight_bytes - 8 * _MIB, _MIB)   # weights are double-buffered
    cap_rows = max(8, int(budget // max(bytes_per_row, 1)))
    tb = min(n_tokens, int(target), cap_rows)
    if tb >= n_tokens:
        return n_tokens                       # one full block (full-extent block is legal)
    tb = max(8, (tb // 8) * 8)
    # Prefer >= 4 grid steps for v7x megacore + pipeline overlap when the problem is big.
    if n_tokens >= 64 and -(-n_tokens // tb) < 4:
        tb = max(8, ((-(-n_tokens // 4)) // 8) * 8)
    return tb


def _compiler_params(tb, bytes_per_row, weight_bytes, vmem_cap):
    # Raise the scoped-VMEM limit explicitly (v5e default is only 16 MiB).
    need = 2 * weight_bytes + tb * bytes_per_row + 16 * _MIB
    limit = int(min(max(need, 32 * _MIB), vmem_cap - 2 * _MIB))
    return pltpu.CompilerParams(dimension_semantics=("parallel",),
                                vmem_limit_bytes=limit)


def _full_spec(a):
    zeros = (0,) * a.ndim
    return pl.BlockSpec(a.shape, lambda i, _z=zeros: _z)


# ----------------------------------------------------------------------------------------
# One-time weight preparation (hoisted out of the forward; cache the result across calls).
# ----------------------------------------------------------------------------------------
def prepare_params(params):
    ws, bs, wg, bg, w1, b1, w2, b2, lng, lnb, wm, bm = params
    E, hh, hd = w1.shape
    f32, bf16 = jnp.float32, jnp.bfloat16
    ws_t = jnp.asarray(ws).T.astype(bf16)                                   # (D, D)
    wm_t = jnp.asarray(wm).T.astype(bf16)                                   # (D, D)
    wg_t = jnp.asarray(wg).T.astype(bf16)                                   # (hd, E)
    w1_cat = jnp.transpose(jnp.asarray(w1), (2, 0, 1)).reshape(hd, E * hh).astype(bf16)
    b1_cat = jnp.asarray(b1).reshape(1, E * hh).astype(f32)
    w2_e = jnp.transpose(jnp.asarray(w2), (0, 2, 1)).astype(bf16)           # (E, hh, hd)
    b2_r = jnp.asarray(b2).reshape(E, 1, hd).astype(f32)
    bs_r = jnp.asarray(bs).reshape(1, -1).astype(f32)
    bm_r = jnp.asarray(bm).reshape(1, -1).astype(f32)
    bg_r = jnp.asarray(bg).reshape(1, E).astype(f32)
    lng_r = jnp.asarray(lng).reshape(1, hd).astype(f32)
    lnb_r = jnp.asarray(lnb).reshape(1, hd).astype(f32)
    return (ws_t, bs_r, wg_t, bg_r, w1_cat, b1_cat, w2_e, b2_r, lng_r, lnb_r, wm_t, bm_r)


# ----------------------------------------------------------------------------------------
# Full forward pass (single fused pallas_call).
# ----------------------------------------------------------------------------------------
@functools.partial(
    jax.jit,
    static_argnames=("num_heads", "num_experts", "top_k", "mu", "gamma", "token_block"))
def multi_head_momentum_forward(x, momentum, prepped, *, num_heads, num_experts,
                                top_k=2, mu=0.7, gamma=1.0, token_block=256):
    B, S, D = x.shape
    N = B * S
    hd = D // num_heads
    E = num_experts
    f32, bf16 = jnp.float32, jnp.bfloat16

    (ws_t, bs_r, wg_t, bg_r, w1_cat, b1_cat, w2_e, b2_r,
     lng_r, lnb_r, wm_t, bm_r) = prepped
    hh = w2_e.shape[1]

    x2 = x.reshape(N, D).astype(bf16)
    if momentum is None:
        mom2 = jnp.zeros((N, D), f32)        # torch: zeros_like(sub_tokens)
    else:
        mom2 = momentum.reshape(N, D).astype(f32)

    # ---- VMEM budget: double-buffered I/O blocks + resident weights + explicit scratch ----
    vmem_cap = _vmem_capacity_bytes()
    weight_bytes = sum(int(a.size) * a.dtype.itemsize for a in prepped)
    io_bytes = 2 * (2 * D + 4 * D) + 2 * (4 * D + 4 * D)   # x, mom in + out, mom_out (x2 bufs)
    scr_bytes = 4 * D + 4 * D + 4 * E * hh                  # h_scr, o_scr, a_scr per token row
    live_bytes = 16 * D                                     # slack for in-flight f32 values
    bytes_per_row = io_bytes + scr_bytes + live_bytes
    tb = _pick_token_block(N, bytes_per_row, weight_bytes, vmem_cap, token_block)
    grid = (pl.cdiv(N, tb),)                                # masked tail block if N % tb != 0

    kernel = functools.partial(_fused_kernel, num_heads=num_heads, num_experts=E,
                               top_k=top_k, mu=float(mu), gamma=float(gamma))
    row_spec = pl.BlockSpec((tb, D), lambda i: (i, 0))

    out, mom_out = pl.pallas_call(
        kernel,
        out_shape=[jax.ShapeDtypeStruct((N, D), f32),       # merged output (f32, like torch)
                   jax.ShapeDtypeStruct((N, D), f32)],      # momentum state (kept f32)
        grid_spec=pltpu.PrefetchScalarGridSpec(
            num_scalar_prefetch=0,
            grid=grid,
            in_specs=[row_spec,                # x
                      row_spec,                # momentum (aliased to output 1)
                      _full_spec(ws_t), _full_spec(bs_r),
                      _full_spec(wg_t), _full_spec(bg_r),
                      _full_spec(w1_cat), _full_spec(b1_cat),
                      _full_spec(w2_e), _full_spec(b2_r),
                      _full_spec(lng_r), _full_spec(lnb_r),
                      _full_spec(wm_t), _full_spec(bm_r)],
            out_specs=[row_spec, row_spec],
            scratch_shapes=[pltpu.VMEM((tb, D), f32),        # h_scr (f32 sub-tokens)
                            pltpu.VMEM((tb, D), f32),        # o_scr (LayerNorm output)
                            pltpu.VMEM((tb, E * hh), f32)]), # a_scr (fused FC1 activations)
        input_output_aliases={1: 1},           # momentum updated in place
        compiler_params=_compiler_params(tb, bytes_per_row, weight_bytes, vmem_cap),
    )(x2, mom2, ws_t, bs_r, wg_t, bg_r, w1_cat, b1_cat, w2_e, b2_r,
      lng_r, lnb_r, wm_t, bm_r)

    return out.reshape(B, S, D), mom_out.reshape(N * num_heads, hd)


# ----------------------------------------------------------------------------------------
# Pure-JAX reference mirroring the kernel's mixed precision (bf16 MXU operands, f32
# accumulation, f32 residual/momentum/LayerNorm math) for a tight correctness check.
# ----------------------------------------------------------------------------------------
def _reference(x, momentum, params, *, num_heads, num_experts, top_k, mu, gamma):
    f32, bf16 = jnp.float32, jnp.bfloat16
    B, S, D = x.shape
    hd = D // num_heads
    ws, bs, wg, bg, w1, b1, w2, b2, lng, lnb, wm, bm = params

    def mm(a, b):
        return jnp.dot(a.astype(bf16), b.astype(bf16), preferred_element_type=f32)

    h = mm(x.reshape(-1, D), ws.T) + bs.reshape(-1)
    sub = h.reshape(-1, hd)
    mom = jnp.zeros_like(sub) if momentum is None else momentum.reshape(sub.shape)
    logits = mm(sub, wg.T) + bg.reshape(-1)
    gates = _topk_gates(logits, top_k)
    eo = jnp.zeros_like(sub)
    for e in range(num_experts):
        a = jnp.maximum(mm(sub, w1[e].T) + b1[e], 0.0)
        out_e = mm(a, w2[e].T) + b2[e]
        eo = eo + gates[:, e:e + 1] * out_e
    mom_new = mu * mom + gamma * eo
    o = sub - mom_new
    mean = o.mean(-1, keepdims=True)
    var = ((o - mean) ** 2).mean(-1, keepdims=True)
    o = (o - mean) / jnp.sqrt(var + LN_EPS) * lng.reshape(-1) + lnb.reshape(-1)
    out = mm(o.reshape(-1, D), wm.T) + bm.reshape(-1)
    return out.reshape(B, S, D), mom_new


if __name__ == "__main__":
    key = jax.random.PRNGKey(0)

    # Small shapes consistent with the module's forward.
    B, S = 2, 8
    input_dim, hidden_dim = 32, 64
    num_heads, num_experts, top_k = 4, 4, 2
    mu, gamma = 0.7, 1.0
    hd = input_dim // num_heads          # head_dim = 8
    hh = hidden_dim // num_heads         # per-head expert hidden = 16

    keys = jax.random.split(key, 12)
    sc = 0.1
    ws = jax.random.normal(keys[0], (input_dim, input_dim), jnp.float32) * sc   # split proj W
    bs = jax.random.normal(keys[1], (input_dim,), jnp.float32) * sc             # split proj b
    wg = jax.random.normal(keys[2], (num_experts, hd), jnp.float32) * sc        # gate W
    bg = jax.random.normal(keys[3], (num_experts,), jnp.float32) * sc           # gate b
    w1 = jax.random.normal(keys[4], (num_experts, hh, hd), jnp.float32) * sc    # expert fc1 W
    b1 = jax.random.normal(keys[5], (num_experts, hh), jnp.float32) * sc        # expert fc1 b
    w2 = jax.random.normal(keys[6], (num_experts, hd, hh), jnp.float32) * sc    # expert fc2 W
    b2 = jax.random.normal(keys[7], (num_experts, hd), jnp.float32) * sc        # expert fc2 b
    lng = jnp.ones((hd,), jnp.float32)                                          # LayerNorm weight
    lnb = jnp.zeros((hd,), jnp.float32)                                         # LayerNorm bias
    wm = jax.random.normal(keys[8], (input_dim, input_dim), jnp.float32) * sc   # merge proj W
    bm = jax.random.normal(keys[9], (input_dim,), jnp.float32) * sc             # merge proj b
    params = (ws, bs, wg, bg, w1, b1, w2, b2, lng, lnb, wm, bm)

    x = jax.random.normal(keys[10], (B, S, input_dim), jnp.float32)
    # momentum=None in PyTorch -> zeros_like(sub_tokens) of shape (B*S*num_heads, head_dim)
    momentum0 = jnp.zeros((B * S * num_heads, hd), jnp.float32)

    prepped = prepare_params(params)   # one-time weight prep, hoisted out of the forward

    out, mom = multi_head_momentum_forward(
        x, momentum0, prepped,
        num_heads=num_heads, num_experts=num_experts,
        top_k=top_k, mu=mu, gamma=gamma)
    jax.block_until_ready((out, mom))

    assert out.shape == (B, S, input_dim)
    assert mom.shape == (B * S * num_heads, hd)

    # Correctness vs a reference that mirrors the kernel's operand precision.
    ref_out, ref_mom = _reference(x, momentum0, params, num_heads=num_heads,
                                  num_experts=num_experts, top_k=top_k, mu=mu, gamma=gamma)
    err_o = float(jnp.max(jnp.abs(out - ref_out)))
    err_m = float(jnp.max(jnp.abs(mom - ref_mom)))
    assert err_o < 2e-2 and err_m < 2e-2, (err_o, err_m)

    print("KERNEL_OK")
</pallas_src>

<mosaic_0001>
module attributes {stable_mosaic.version = 11 : i64} {
  func.func @_fused_kernel(%arg0: i32, %arg1: memref<16x32xbf16, #tpu.memory_space<vmem>>, %arg2: memref<16x32xf32, #tpu.memory_space<vmem>>, %arg3: memref<32x32xbf16, #tpu.memory_space<vmem>>, %arg4: memref<1x32xf32, #tpu.memory_space<vmem>>, %arg5: memref<8x4xbf16, #tpu.memory_space<vmem>>, %arg6: memref<1x4xf32, #tpu.memory_space<vmem>>, %arg7: memref<8x64xbf16, #tpu.memory_space<vmem>>, %arg8: memref<1x64xf32, #tpu.memory_space<vmem>>, %arg9: memref<4x16x8xbf16, #tpu.memory_space<vmem>>, %arg10: memref<4x1x8xf32, #tpu.memory_space<vmem>>, %arg11: memref<1x8xf32, #tpu.memory_space<vmem>>, %arg12: memref<1x8xf32, #tpu.memory_space<vmem>>, %arg13: memref<32x32xbf16, #tpu.memory_space<vmem>>, %arg14: memref<1x32xf32, #tpu.memory_space<vmem>>, %arg15: memref<16x32xf32, #tpu.memory_space<vmem>>, %arg16: memref<16x32xf32, #tpu.memory_space<vmem>>, %arg17: memref<16x32xf32, #tpu.memory_space<vmem>>, %arg18: memref<16x32xf32, #tpu.memory_space<vmem>>, %arg19: memref<16x64xf32, #tpu.memory_space<vmem>>) attributes {dimension_semantics = [#tpu.dimension_semantics<parallel>], iteration_bounds = array<i64: 1>, scalar_prefetch = 0 : i64, scratch_operands = 3 : i64, tpu.core_type = #tpu.core_type<tc>, window_params = [{transform_indices = @transform_0, window_bounds = array<i64: 16, 32>}, {transform_indices = @transform_1, window_bounds = array<i64: 16, 32>}, {pipeline_mode = #tpu.pipeline_mode<synchronous>, transform_indices = @transform_2, window_bounds = array<i64: 32, 32>}, {pipeline_mode = #tpu.pipeline_mode<synchronous>, transform_indices = @transform_3, window_bounds = array<i64: 1, 32>}, {pipeline_mode = #tpu.pipeline_mode<synchronous>, transform_indices = @transform_4, window_bounds = array<i64: 8, 4>}, {pipeline_mode = #tpu.pipeline_mode<synchronous>, transform_indices = @transform_5, window_bounds = array<i64: 1, 4>}, {pipeline_mode = #tpu.pipeline_mode<synchronous>, transform_indices = @transform_6, window_bounds = array<i64: 8, 64>}, {pipeline_mode = #tpu.pipeline_mode<synchronous>, transform_indices = @transform_7, window_bounds = array<i64: 1, 64>}, {pipeline_mode = #tpu.pipeline_mode<synchronous>, transform_indices = @transform_8, window_bounds = array<i64: 4, 16, 8>}, {pipeline_mode = #tpu.pipeline_mode<synchronous>, transform_indices = @transform_9, window_bounds = array<i64: 4, 1, 8>}, {pipeline_mode = #tpu.pipeline_mode<synchronous>, transform_indices = @transform_10, window_bounds = array<i64: 1, 8>}, {pipeline_mode = #tpu.pipeline_mode<synchronous>, transform_indices = @transform_11, window_bounds = array<i64: 1, 8>}, {pipeline_mode = #tpu.pipeline_mode<synchronous>, transform_indices = @transform_12, window_bounds = array<i64: 32, 32>}, {pipeline_mode = #tpu.pipeline_mode<synchronous>, transform_indices = @transform_13, window_bounds = array<i64: 1, 32>}, {transform_indices = @transform_14, window_bounds = array<i64: 16, 32>}, {transform_indices = @transform_15, window_bounds = array<i64: 16, 32>}]} {
    %c0 = arith.constant 0 : index
    %c0_0 = arith.constant 0 : index
    %0 = vector.load %arg1[%c0, %c0_0] : memref<16x32xbf16, #tpu.memory_space<vmem>>, vector<16x32xbf16>
    %c0_1 = arith.constant 0 : index
    %c0_2 = arith.constant 0 : index
    %1 = vector.load %arg3[%c0_1, %c0_2] : memref<32x32xbf16, #tpu.memory_space<vmem>>, vector<32x32xbf16>
    %cst = arith.constant dense<0.000000e+00> : vector<16x32xf32>
    %2 = tpu.matmul %0, %1, %cst {dimension_numbers = #tpu.dot_dimension_numbers<[1], [0], [0], [1], [0, 0, 1, 1], [], []>} : vector<16x32xbf16>, vector<32x32xbf16>, vector<16x32xf32> -> vector<16x32xf32>
    %c0_3 = arith.constant 0 : index
    %c0_4 = arith.constant 0 : index
    %3 = vector.load %arg4[%c0_3, %c0_4] : memref<1x32xf32, #tpu.memory_space<vmem>>, vector<1x32xf32>
    %4 = vector.broadcast %3 : vector<1x32xf32> to vector<16x32xf32>
    %5 = arith.addf %2, %4 : vector<16x32xf32>
    %c0_5 = arith.constant 0 : index
    %c0_6 = arith.constant 0 : index
    %6 = vector.load %arg17[%c0_5, %c0_6] : memref<16x32xf32, #tpu.memory_space<vmem>>, vector<16x32xf32>
    tpu.vector_store %arg17[%c0_5, %c0_6], %5 {strides = array<i32>} : memref<16x32xf32, #tpu.memory_space<vmem>>, vector<16x32xf32>,
    %c0_7 = arith.constant 0 : index
    %c0_8 = arith.constant 0 : index
    %7 = vector.load %arg5[%c0_7, %c0_8] : memref<8x4xbf16, #tpu.memory_space<vmem>>, vector<8x4xbf16>
    %c0_9 = arith.constant 0 : index
    %c0_10 = arith.constant 0 : index
    %8 = vector.load %arg6[%c0_9, %c0_10] : memref<1x4xf32, #tpu.memory_space<vmem>>, vector<1x4xf32>
    %c0_11 = arith.constant 0 : index
    %c0_12 = arith.constant 0 : index
    %9 = vector.load %arg7[%c0_11, %c0_12] : memref<8x64xbf16, #tpu.memory_space<vmem>>, vector<8x64xbf16>
    %c0_13 = arith.constant 0 : index
    %c0_14 = arith.constant 0 : index
    %10 = vector.load %arg8[%c0_13, %c0_14] : memref<1x64xf32, #tpu.memory_space<vmem>>, vector<1x64xf32>
    %c0_15 = arith.constant 0 : index
    %c0_16 = arith.constant 0 : index
    %11 = vector.load %arg11[%c0_15, %c0_16] : memref<1x8xf32, #tpu.memory_space<vmem>>, vector<1x8xf32>
    %c0_17 = arith.constant 0 : index
    %c0_18 = arith.constant 0 : index
    %12 = vector.load %arg12[%c0_17, %c0_18] : memref<1x8xf32, #tpu.memory_space<vmem>>, vector<1x8xf32>
    %13 = tpu.iota {dimensions = array<i32: 1>} : vector<16x4xi32>
    %c0_19 = arith.constant 0 : index
    %c0_20 = arith.constant 0 : index
    %14 = vector.load %arg17[%c0_19, %c0_20] : memref<16x32xf32, #tpu.memory_space<vmem>>, vector<16x8xf32>
    %15 = arith.truncf %14 : vector<16x8xf32> to vector<16x8xbf16>
    %cst_21 = arith.constant dense<0.000000e+00> : vector<16x4xf32>
    %16 = tpu.matmul %15, %7, %cst_21 {dimension_numbers = #tpu.dot_dimension_numbers<[1], [0], [0], [1], [0, 0, 1, 1], [], []>} : vector<16x8xbf16>, vector<8x4xbf16>, vector<16x4xf32> -> vector<16x4xf32>
    %17 = vector.broadcast %8 : vector<1x4xf32> to vector<16x4xf32>
    %18 = arith.addf %16, %17 : vector<16x4xf32>
    %19 = tpu.iota {dimensions = array<i32: 1>} : vector<16x4xi32>
    %false = arith.constant false
    %20 = vector.broadcast %false : i1 to vector<16x4xi1>
    %cst_22 = arith.constant dense<0xFF800000> : vector<16xf32>
    %21 = vector.multi_reduction <maximumf>, %18, %cst_22 [1] : vector<16x4xf32> to vector<16xf32>
    %22 = vector.shape_cast %21 : vector<16xf32> to vector<16x1xf32>
    %23 = vector.broadcast %22 : vector<16x1xf32> to vector<16x4xf32>
    %24 = arith.cmpf oeq, %18, %23 : vector<16x4xf32>
    %c4_i32 = arith.constant 4 : i32
    %25 = vector.broadcast %c4_i32 : i32 to vector<16x4xi32>
    %26 = arith.select %24, %19, %25 : vector<16x4xi1>, vector<16x4xi32>
    %cst_23 = arith.constant dense<2147483647> : vector<16xi32>
    %27 = vector.multi_reduction <minsi>, %26, %cst_23 [1] : vector<16x4xi32> to vector<16xi32>
    %28 = vector.shape_cast %27 : vector<16xi32> to vector<16x1xi32>
    %29 = vector.broadcast %28 : vector<16x1xi32> to vector<16x4xi32>
    %30 = arith.cmpi eq, %19, %29 : vector<16x4xi32>
    %31 = arith.ori %20, %30 : vector<16x4xi1>
    %cst_24 = arith.constant -1.000000e+30 : f32
    %32 = vector.broadcast %cst_24 : f32 to vector<16x4xf32>
    %33 = arith.select %30, %32, %18 : vector<16x4xi1>, vector<16x4xf32>
    %cst_25 = arith.constant dense<0xFF800000> : vector<16xf32>
    %34 = vector.multi_reduction <maximumf>, %33, %cst_25 [1] : vector<16x4xf32> to vector<16xf32>
    %35 = vector.shape_cast %34 : vector<16xf32> to vector<16x1xf32>
    %36 = vector.broadcast %35 : vector<16x1xf32> to vector<16x4xf32>
    %37 = arith.cmpf oeq, %33, %36 : vector<16x4xf32>
    %c4_i32_26 = arith.constant 4 : i32
    %38 = vector.broadcast %c4_i32_26 : i32 to vector<16x4xi32>
    %39 = arith.select %37, %19, %38 : vector<16x4xi1>, vector<16x4xi32>
    %cst_27 = arith.constant dense<2147483647> : vector<16xi32>
    %40 = vector.multi_reduction <minsi>, %39, %cst_27 [1] : vector<16x4xi32> to vector<16xi32>
    %41 = vector.shape_cast %40 : vector<16xi32> to vector<16x1xi32>
    %42 = vector.broadcast %41 : vector<16x1xi32> to vector<16x4xi32>
    %43 = arith.cmpi eq, %19, %42 : vector<16x4xi32>
    %44 = arith.ori %31, %43 : vector<16x4xi1>
    %cst_28 = arith.constant -1.000000e+30 : f32
    %45 = vector.broadcast %cst_28 : f32 to vector<16x4xf32>
    %46 = arith.select %44, %18, %45 : vector<16x4xi1>, vector<16x4xf32>
    %cst_29 = arith.constant dense<0xFF800000> : vector<16xf32>
    %47 = vector.multi_reduction <maximumf>, %46, %cst_29 [1] : vector<16x4xf32> to vector<16xf32>
    %48 = vector.shape_cast %47 : vector<16xf32> to vector<16x1xf32>
    %49 = vector.broadcast %48 : vector<16x1xf32> to vector<16x4xf32>
    %50 = arith.subf %46, %49 : vector<16x4xf32>
    %51 = math.exp %50 : vector<16x4xf32>
    %cst_30 = arith.constant dense<0.000000e+00> : vector<16xf32>
    %52 = vector.multi_reduction <add>, %51, %cst_30 [1] : vector<16x4xf32> to vector<16xf32>
    %53 = vector.shape_cast %52 : vector<16xf32> to vector<16x1xf32>
    %54 = vector.broadcast %53 : vector<16x1xf32> to vector<16x4xf32>
    %55 = arith.divf %51, %54 : vector<16x4xf32>
    %cst_31 = arith.constant dense<0.000000e+00> : vector<16x64xf32>
    %56 = tpu.matmul %15, %9, %cst_31 {dimension_numbers = #tpu.dot_dimension_numbers<[1], [0], [0], [1], [0, 0, 1, 1], [], []>} : vector<16x8xbf16>, vector<8x64xbf16>, vector<16x64xf32> -> vector<16x64xf32>
    %57 = vector.broadcast %10 : vector<1x64xf32> to vector<16x64xf32>
    %58 = arith.addf %56, %57 : vector<16x64xf32>
    %cst_32 = arith.constant 0.000000e+00 : f32
    %59 = vector.broadcast %cst_32 : f32 to vector<16x64xf32>
    %60 = arith.maximumf %58, %59 : vector<16x64xf32>
    %c0_33 = arith.constant 0 : index
    %c0_34 = arith.constant 0 : index
    %61 = vector.load %arg19[%c0_33, %c0_34] : memref<16x64xf32, #tpu.memory_space<vmem>>, vector<16x64xf32>
    tpu.vector_store %arg19[%c0_33, %c0_34], %60 {strides = array<i32>} : memref<16x64xf32, #tpu.memory_space<vmem>>, vector<16x64xf32>,
    %cst_35 = arith.constant 0.000000e+00 : f32
    %62 = vector.broadcast %cst_35 : f32 to vector<16x8xf32>
    %c0_i32 = arith.constant 0 : i32
    %63 = vector.broadcast %c0_i32 : i32 to vector<16x4xi32>
    %64 = arith.cmpi eq, %13, %63 : vector<16x4xi32>
    %cst_36 = arith.constant 0.000000e+00 : f32
    %65 = vector.broadcast %cst_36 : f32 to vector<16x4xf32>
    %66 = arith.select %64, %55, %65 : vector<16x4xi1>, vector<16x4xf32>
    %cst_37 = arith.constant dense<0.000000e+00> : vector<16xf32>
    %67 = vector.multi_reduction <add>, %66, %cst_37 [1] : vector<16x4xf32> to vector<16xf32>
    %68 = vector.shape_cast %67 : vector<16xf32> to vector<16x1xf32>
    %c0_38 = arith.constant 0 : index
    %c0_39 = arith.constant 0 : index
    %69 = vector.load %arg19[%c0_38, %c0_39] : memref<16x64xf32, #tpu.memory_space<vmem>>, vector<16x16xf32>
    %70 = arith.truncf %69 : vector<16x16xf32> to vector<16x16xbf16>
    %c0_40 = arith.constant 0 : index
    %c0_41 = arith.constant 0 : index
    %c0_42 = arith.constant 0 : index
    %71 = vector.load %arg9[%c0_40, %c0_41, %c0_42] : memref<4x16x8xbf16, #tpu.memory_space<vmem>>, vector<1x16x8xbf16>
    %72 = vector.shape_cast %71 : vector<1x16x8xbf16> to vector<16x8xbf16>
    %cst_43 = arith.constant dense<0.000000e+00> : vector<16x8xf32>
    %73 = tpu.matmul %70, %72, %cst_43 {dimension_numbers = #tpu.dot_dimension_numbers<[1], [0], [0], [1], [0, 0, 1, 1], [], []>} : vector<16x16xbf16>, vector<16x8xbf16>, vector<16x8xf32> -> vector<16x8xf32>
    %c0_44 = arith.constant 0 : index
    %c0_45 = arith.constant 0 : index
    %c0_46 = arith.constant 0 : index
    %74 = vector.load %arg10[%c0_44, %c0_45, %c0_46] : memref<4x1x8xf32, #tpu.memory_space<vmem>>, vector<1x1x8xf32>
    %75 = vector.shape_cast %74 : vector<1x1x8xf32> to vector<1x8xf32>
    %76 = vector.broadcast %75 : vector<1x8xf32> to vector<16x8xf32>
    %77 = arith.addf %73, %76 : vector<16x8xf32>
    %78 = vector.broadcast %68 : vector<16x1xf32> to vector<16x8xf32>
    %79 = arith.mulf %78, %77 : vector<16x8xf32>
    %80 = arith.addf %62, %79 : vector<16x8xf32>
    %c1_i32 = arith.constant 1 : i32
    %81 = vector.broadcast %c1_i32 : i32 to vector<16x4xi32>
    %82 = arith.cmpi eq, %13, %81 : vector<16x4xi32>
    %cst_47 = arith.constant 0.000000e+00 : f32
    %83 = vector.broadcast %cst_47 : f32 to vector<16x4xf32>
    %84 = arith.select %82, %55, %83 : vector<16x4xi1>, vector<16x4xf32>
    %cst_48 = arith.constant dense<0.000000e+00> : vector<16xf32>
    %85 = vector.multi_reduction <add>, %84, %cst_48 [1] : vector<16x4xf32> to vector<16xf32>
    %86 = vector.shape_cast %85 : vector<16xf32> to vector<16x1xf32>
    %c0_49 = arith.constant 0 : index
    %c16 = arith.constant 16 : index
    %87 = vector.load %arg19[%c0_49, %c16] : memref<16x64xf32, #tpu.memory_space<vmem>>, vector<16x16xf32>
    %88 = arith.truncf %87 : vector<16x16xf32> to vector<16x16xbf16>
    %c1 = arith.constant 1 : index
    %c0_50 = arith.constant 0 : index
    %c0_51 = arith.constant 0 : index
    %89 = vector.load %arg9[%c1, %c0_50, %c0_51] : memref<4x16x8xbf16, #tpu.memory_space<vmem>>, vector<1x16x8xbf16>
    %90 = vector.shape_cast %89 : vector<1x16x8xbf16> to vector<16x8xbf16>
    %cst_52 = arith.constant dense<0.000000e+00> : vector<16x8xf32>
    %91 = tpu.matmul %88, %90, %cst_52 {dimension_numbers = #tpu.dot_dimension_numbers<[1], [0], [0], [1], [0, 0, 1, 1], [], []>} : vector<16x16xbf16>, vector<16x8xbf16>, vector<16x8xf32> -> vector<16x8xf32>
    %c1_53 = arith.constant 1 : index
    %c0_54 = arith.constant 0 : index
    %c0_55 = arith.constant 0 : index
    %92 = vector.load %arg10[%c1_53, %c0_54, %c0_55] : memref<4x1x8xf32, #tpu.memory_space<vmem>>, vector<1x1x8xf32>
    %93 = vector.shape_cast %92 : vector<1x1x8xf32> to vector<1x8xf32>
    %94 = vector.broadcast %93 : vector<1x8xf32> to vector<16x8xf32>
    %95 = arith.addf %91, %94 : vector<16x8xf32>
    %96 = vector.broadcast %86 : vector<16x1xf32> to vector<16x8xf32>
    %97 = arith.mulf %96, %95 : vector<16x8xf32>
    %98 = arith.addf %80, %97 : vector<16x8xf32>
    %c2_i32 = arith.constant 2 : i32
    %99 = vector.broadcast %c2_i32 : i32 to vector<16x4xi32>
    %100 = arith.cmpi eq, %13, %99 : vector<16x4xi32>
    %cst_56 = arith.constant 0.000000e+00 : f32
    %101 = vector.broadcast %cst_56 : f32 to vector<16x4xf32>
    %102 = arith.select %100, %55, %101 : vector<16x4xi1>, vector<16x4xf32>
    %cst_57 = arith.constant dense<0.000000e+00> : vector<16xf32>
    %103 = vector.multi_reduction <add>, %102, %cst_57 [1] : vector<16x4xf32> to vector<16xf32>
    %104 = vector.shape_cast %103 : vector<16xf32> to vector<16x1xf32>
    %c0_58 = arith.constant 0 : index
    %c32 = arith.constant 32 : index
    %105 = vector.load %arg19[%c0_58, %c32] : memref<16x64xf32, #tpu.memory_space<vmem>>, vector<16x16xf32>
    %106 = arith.truncf %105 : vector<16x16xf32> to vector<16x16xbf16>
    %c2 = arith.constant 2 : index
    %c0_59 = arith.constant 0 : index
    %c0_60 = arith.constant 0 : index
    %107 = vector.load %arg9[%c2, %c0_59, %c0_60] : memref<4x16x8xbf16, #tpu.memory_space<vmem>>, vector<1x16x8xbf16>
    %108 = vector.shape_cast %107 : vector<1x16x8xbf16> to vector<16x8xbf16>
    %cst_61 = arith.constant dense<0.000000e+00> : vector<16x8xf32>
    %109 = tpu.matmul %106, %108, %cst_61 {dimension_numbers = #tpu.dot_dimension_numbers<[1], [0], [0], [1], [0, 0, 1, 1], [], []>} : vector<16x16xbf16>, vector<16x8xbf16>, vector<16x8xf32> -> vector<16x8xf32>
    %c2_62 = arith.constant 2 : index
    %c0_63 = arith.constant 0 : index
    %c0_64 = arith.constant 0 : index
    %110 = vector.load %arg10[%c2_62, %c0_63, %c0_64] : memref<4x1x8xf32, #tpu.memory_space<vmem>>, vector<1x1x8xf32>
    %111 = vector.shape_cast %110 : vector<1x1x8xf32> to vector<1x8xf32>
    %112 = vector.broadcast %111 : vector<1x8xf32> to vector<16x8xf32>
    %113 = arith.addf %109, %112 : vector<16x8xf32>
    %114 = vector.broadcast %104 : vector<16x1xf32> to vector<16x8xf32>
    %115 = arith.mulf %114, %113 : vector<16x8xf32>
    %116 = arith.addf %98, %115 : vector<16x8xf32>
    %c3_i32 = arith.constant 3 : i32
    %117 = vector.broadcast %c3_i32 : i32 to vector<16x4xi32>
    %118 = arith.cmpi eq, %13, %117 : vector<16x4xi32>
    %cst_65 = arith.constant 0.000000e+00 : f32
    %119 = vector.broadcast %cst_65 : f32 to vector<16x4xf32>
    %120 = arith.select %118, %55, %119 : vector<16x4xi1>, vector<16x4xf32>
    %cst_66 = arith.constant dense<0.000000e+00> : vector<16xf32>
    %121 = vector.multi_reduction <add>, %120, %cst_66 [1] : vector<16x4xf32> to vector<16xf32>
    %122 = vector.shape_cast %121 : vector<16xf32> to vector<16x1xf32>
    %c0_67 = arith.constant 0 : index
    %c48 = arith.constant 48 : index
    %123 = vector.load %arg19[%c0_67, %c48] : memref<16x64xf32, #tpu.memory_space<vmem>>, vector<16x16xf32>
    %124 = arith.truncf %123 : vector<16x16xf32> to vector<16x16xbf16>
    %c3 = arith.constant 3 : index
    %c0_68 = arith.constant 0 : index
    %c0_69 = arith.constant 0 : index
    %125 = vector.load %arg9[%c3, %c0_68, %c0_69] : memref<4x16x8xbf16, #tpu.memory_space<vmem>>, vector<1x16x8xbf16>
    %126 = vector.shape_cast %125 : vector<1x16x8xbf16> to vector<16x8xbf16>
    %cst_70 = arith.constant dense<0.000000e+00> : vector<16x8xf32>
    %127 = tpu.matmul %124, %126, %cst_70 {dimension_numbers = #tpu.dot_dimension_numbers<[1], [0], [0], [1], [0, 0, 1, 1], [], []>} : vector<16x16xbf16>, vector<16x8xbf16>, vector<16x8xf32> -> vector<16x8xf32>
    %c3_71 = arith.constant 3 : index
    %c0_72 = arith.constant 0 : index
    %c0_73 = arith.constant 0 : index
    %128 = vector.load %arg10[%c3_71, %c0_72, %c0_73] : memref<4x1x8xf32, #tpu.memory_space<vmem>>, vector<1x1x8xf32>
    %129 = vector.shape_cast %128 : vector<1x1x8xf32> to vector<1x8xf32>
    %130 = vector.broadcast %129 : vector<1x8xf32> to vector<16x8xf32>
    %131 = arith.addf %127, %130 : vector<16x8xf32>
    %132 = vector.broadcast %122 : vector<16x1xf32> to vector<16x8xf32>
    %133 = arith.mulf %132, %131 : vector<16x8xf32>
    %134 = arith.addf %116, %133 : vector<16x8xf32>
    %c0_74 = arith.constant 0 : index
    %c0_75 = arith.constant 0 : index
    %135 = vector.load %arg2[%c0_74, %c0_75] : memref<16x32xf32, #tpu.memory_space<vmem>>, vector<16x8xf32>
    %cst_76 = arith.constant 0.699999988 : f32
    %136 = vector.broadcast %cst_76 : f32 to vector<16x8xf32>
    %137 = arith.mulf %136, %135 : vector<16x8xf32>
    %cst_77 = arith.constant 1.000000e+00 : f32
    %138 = vector.broadcast %cst_77 : f32 to vector<16x8xf32>
    %139 = arith.mulf %138, %134 : vector<16x8xf32>
    %140 = arith.addf %137, %139 : vector<16x8xf32>
    %141 = arith.subf %14, %140 : vector<16x8xf32>
    %cst_78 = arith.constant dense<0.000000e+00> : vector<16xf32>
    %142 = vector.multi_reduction <add>, %141, %cst_78 [1] : vector<16x8xf32> to vector<16xf32>
    %143 = vector.shape_cast %142 : vector<16xf32> to vector<16x1xf32>
    %cst_79 = arith.constant 8.000000e+00 : f32
    %144 = vector.broadcast %cst_79 : f32 to vector<16x1xf32>
    %145 = arith.divf %143, %144 : vector<16x1xf32>
    %146 = vector.broadcast %145 : vector<16x1xf32> to vector<16x8xf32>
    %147 = arith.subf %141, %146 : vector<16x8xf32>
    %148 = arith.mulf %147, %147 : vector<16x8xf32>
    %cst_80 = arith.constant dense<0.000000e+00> : vector<16xf32>
    %149 = vector.multi_reduction <add>, %148, %cst_80 [1] : vector<16x8xf32> to vector<16xf32>
    %150 = vector.shape_cast %149 : vector<16xf32> to vector<16x1xf32>
    %cst_81 = arith.constant 8.000000e+00 : f32
    %151 = vector.broadcast %cst_81 : f32 to vector<16x1xf32>
    %152 = arith.divf %150, %151 : vector<16x1xf32>
    %153 = vector.broadcast %145 : vector<16x1xf32> to vector<16x8xf32>
    %154 = arith.subf %141, %153 : vector<16x8xf32>
    %cst_82 = arith.constant 9.99999974E-6 : f32
    %155 = vector.broadcast %cst_82 : f32 to vector<16x1xf32>
    %156 = arith.addf %152, %155 : vector<16x1xf32>
    %157 = math.rsqrt %156 : vector<16x1xf32>
    %158 = vector.broadcast %157 : vector<16x1xf32> to vector<16x8xf32>
    %159 = arith.mulf %154, %158 : vector<16x8xf32>
    %160 = vector.broadcast %11 : vector<1x8xf32> to vector<16x8xf32>
    %161 = arith.mulf %159, %160 : vector<16x8xf32>
    %162 = vector.broadcast %12 : vector<1x8xf32> to vector<16x8xf32>
    %163 = arith.addf %161, %162 : vector<16x8xf32>
    %c0_83 = arith.constant 0 : index
    %c0_84 = arith.constant 0 : index
    %164 = vector.load %arg18[%c0_83, %c0_84] : memref<16x32xf32, #tpu.memory_space<vmem>>, vector<16x8xf32>
    tpu.vector_store %arg18[%c0_83, %c0_84], %163 {strides = array<i32>} : memref<16x32xf32, #tpu.memory_space<vmem>>, vector<16x8xf32>,
    %c0_85 = arith.constant 0 : index
    %c0_86 = arith.constant 0 : index
    %165 = vector.load %arg16[%c0_85, %c0_86] : memref<16x32xf32, #tpu.memory_space<vmem>>, vector<16x8xf32>
    tpu.vector_store %arg16[%c0_85, %c0_86], %140 {strides = array<i32>} : memref<16x32xf32, #tpu.memory_space<vmem>>, vector<16x8xf32>,
    %c0_87 = arith.constant 0 : index
    %c8 = arith.constant 8 : index
    %166 = vector.load %arg17[%c0_87, %c8] : memref<16x32xf32, #tpu.memory_space<vmem>>, vector<16x8xf32>
    %167 = arith.truncf %166 : vector<16x8xf32> to vector<16x8xbf16>
    %cst_88 = arith.constant dense<0.000000e+00> : vector<16x4xf32>
    %168 = tpu.matmul %167, %7, %cst_88 {dimension_numbers = #tpu.dot_dimension_numbers<[1], [0], [0], [1], [0, 0, 1, 1], [], []>} : vector<16x8xbf16>, vector<8x4xbf16>, vector<16x4xf32> -> vector<16x4xf32>
    %169 = vector.broadcast %8 : vector<1x4xf32> to vector<16x4xf32>
    %170 = arith.addf %168, %169 : vector<16x4xf32>
    %171 = tpu.iota {dimensions = array<i32: 1>} : vector<16x4xi32>
    %false_89 = arith.constant false
    %172 = vector.broadcast %false_89 : i1 to vector<16x4xi1>
    %cst_90 = arith.constant dense<0xFF800000> : vector<16xf32>
    %173 = vector.multi_reduction <maximumf>, %170, %cst_90 [1] : vector<16x4xf32> to vector<16xf32>
    %174 = vector.shape_cast %173 : vector<16xf32> to vector<16x1xf32>
    %175 = vector.broadcast %174 : vector<16x1xf32> to vector<16x4xf32>
    %176 = arith.cmpf oeq, %170, %175 : vector<16x4xf32>
    %c4_i32_91 = arith.constant 4 : i32
    %177 = vector.broadcast %c4_i32_91 : i32 to vector<16x4xi32>
    %178 = arith.select %176, %171, %177 : vector<16x4xi1>, vector<16x4xi32>
    %cst_92 = arith.constant dense<2147483647> : vector<16xi32>
    %179 = vector.multi_reduction <minsi>, %178, %cst_92 [1] : vector<16x4xi32> to vector<16xi32>
    %180 = vector.shape_cast %179 : vector<16xi32> to vector<16x1xi32>
    %181 = vector.broadcast %180 : vector<16x1xi32> to vector<16x4xi32>
    %182 = arith.cmpi eq, %171, %181 : vector<16x4xi32>
    %183 = arith.ori %172, %182 : vector<16x4xi1>
    %cst_93 = arith.constant -1.000000e+30 : f32
    %184 = vector.broadcast %cst_93 : f32 to vector<16x4xf32>
    %185 = arith.select %182, %184, %170 : vector<16x4xi1>, vector<16x4xf32>
    %cst_94 = arith.constant dense<0xFF800000> : vector<16xf32>
    %186 = vector.multi_reduction <maximumf>, %185, %cst_94 [1] : vector<16x4xf32> to vector<16xf32>
    %187 = vector.shape_cast %186 : vector<16xf32> to vector<16x1xf32>
    %188 = vector.broadcast %187 : vector<16x1xf32> to vector<16x4xf32>
    %189 = arith.cmpf oeq, %185, %188 : vector<16x4xf32>
    %c4_i32_95 = arith.constant 4 : i32
    %190 = vector.broadcast %c4_i32_95 : i32 to vector<16x4xi32>
    %191 = arith.select %189, %171, %190 : vector<16x4xi1>, vector<16x4xi32>
    %cst_96 = arith.constant dense<2147483647> : vector<16xi32>
    %192 = vector.multi_reduction <minsi>, %191, %cst_96 [1] : vector<16x4xi32> to vector<16xi32>
    %193 = vector.shape_cast %192 : vector<16xi32> to vector<16x1xi32>
    %194 = vector.broadcast %193 : vector<16x1xi32> to vector<16x4xi32>
    %195 = arith.cmpi eq, %171, %194 : vector<16x4xi32>
    %196 = arith.ori %183, %195 : vector<16x4xi1>
    %cst_97 = arith.constant -1.000000e+30 : f32
    %197 = vector.broadcast %cst_97 : f32 to vector<16x4xf32>
    %198 = arith.select %196, %170, %197 : vector<16x4xi1>, vector<16x4xf32>
    %cst_98 = arith.constant dense<0xFF800000> : vector<16xf32>
    %199 = vector.multi_reduction <maximumf>, %198, %cst_98 [1] : vector<16x4xf32> to vector<16xf32>
    %200 = vector.shape_cast %199 : vector<16xf32> to vector<16x1xf32>
    %201 = vector.broadcast %200 : vector<16x1xf32> to vector<16x4xf32>
    %202 = arith.subf %198, %201 : vector<16x4xf32>
    %203 = math.exp %202 : vector<16x4xf32>
    %cst_99 = arith.constant dense<0.000000e+00> : vector<16xf32>
    %204 = vector.multi_reduction <add>, %203, %cst_99 [1] : vector<16x4xf32> to vector<16xf32>
    %205 = vector.shape_cast %204 : vector<16xf32> to vector<16x1xf32>
    %206 = vector.broadcast %205 : vector<16x1xf32> to vector<16x4xf32>
    %207 = arith.divf %203, %206 : vector<16x4xf32>
    %cst_100 = arith.constant dense<0.000000e+00> : vector<16x64xf32>
    %208 = tpu.matmul %167, %9, %cst_100 {dimension_numbers = #tpu.dot_dimension_numbers<[1], [0], [0], [1], [0, 0, 1, 1], [], []>} : vector<16x8xbf16>, vector<8x64xbf16>, vector<16x64xf32> -> vector<16x64xf32>
    %209 = vector.broadcast %10 : vector<1x64xf32> to vector<16x64xf32>
    %210 = arith.addf %208, %209 : vector<16x64xf32>
    %cst_101 = arith.constant 0.000000e+00 : f32
    %211 = vector.broadcast %cst_101 : f32 to vector<16x64xf32>
    %212 = arith.maximumf %210, %211 : vector<16x64xf32>
    %c0_102 = arith.constant 0 : index
    %c0_103 = arith.constant 0 : index
    %213 = vector.load %arg19[%c0_102, %c0_103] : memref<16x64xf32, #tpu.memory_space<vmem>>, vector<16x64xf32>
    tpu.vector_store %arg19[%c0_102, %c0_103], %212 {strides = array<i32>} : memref<16x64xf32, #tpu.memory_space<vmem>>, vector<16x64xf32>,
    %cst_104 = arith.constant 0.000000e+00 : f32
    %214 = vector.broadcast %cst_104 : f32 to vector<16x8xf32>
    %c0_i32_105 = arith.constant 0 : i32
    %215 = vector.broadcast %c0_i32_105 : i32 to vector<16x4xi32>
    %216 = arith.cmpi eq, %13, %215 : vector<16x4xi32>
    %cst_106 = arith.constant 0.000000e+00 : f32
    %217 = vector.broadcast %cst_106 : f32 to vector<16x4xf32>
    %218 = arith.select %216, %207, %217 : vector<16x4xi1>, vector<16x4xf32>
    %cst_107 = arith.constant dense<0.000000e+00> : vector<16xf32>
    %219 = vector.multi_reduction <add>, %218, %cst_107 [1] : vector<16x4xf32> to vector<16xf32>
    %220 = vector.shape_cast %219 : vector<16xf32> to vector<16x1xf32>
    %c0_108 = arith.constant 0 : index
    %c0_109 = arith.constant 0 : index
    %221 = vector.load %arg19[%c0_108, %c0_109] : memref<16x64xf32, #tpu.memory_space<vmem>>, vector<16x16xf32>
    %222 = arith.truncf %221 : vector<16x16xf32> to vector<16x16xbf16>
    %c0_110 = arith.constant 0 : index
    %c0_111 = arith.constant 0 : index
    %c0_112 = arith.constant 0 : index
    %223 = vector.load %arg9[%c0_110, %c0_111, %c0_112] : memref<4x16x8xbf16, #tpu.memory_space<vmem>>, vector<1x16x8xbf16>
    %224 = vector.shape_cast %223 : vector<1x16x8xbf16> to vector<16x8xbf16>
    %cst_113 = arith.constant dense<0.000000e+00> : vector<16x8xf32>
    %225 = tpu.matmul %222, %224, %cst_113 {dimension_numbers = #tpu.dot_dimension_numbers<[1], [0], [0], [1], [0, 0, 1, 1], [], []>} : vector<16x16xbf16>, vector<16x8xbf16>, vector<16x8xf32> -> vector<16x8xf32>
    %c0_114 = arith.constant 0 : index
    %c0_115 = arith.constant 0 : index
    %c0_116 = arith.constant 0 : index
    %226 = vector.load %arg10[%c0_114, %c0_115, %c0_116] : memref<4x1x8xf32, #tpu.memory_space<vmem>>, vector<1x1x8xf32>
    %227 = vector.shape_cast %226 : vector<1x1x8xf32> to vector<1x8xf32>
    %228 = vector.broadcast %227 : vector<1x8xf32> to vector<16x8xf32>
    %229 = arith.addf %225, %228 : vector<16x8xf32>
    %230 = vector.broadcast %220 : vector<16x1xf32> to vector<16x8xf32>
    %231 = arith.mulf %230, %229 : vector<16x8xf32>
    %232 = arith.addf %214, %231 : vector<16x8xf32>
    %c1_i32_117 = arith.constant 1 : i32
    %233 = vector.broadcast %c1_i32_117 : i32 to vector<16x4xi32>
    %234 = arith.cmpi eq, %13, %233 : vector<16x4xi32>
    %cst_118 = arith.constant 0.000000e+00 : f32
    %235 = vector.broadcast %cst_118 : f32 to vector<16x4xf32>
    %236 = arith.select %234, %207, %235 : vector<16x4xi1>, vector<16x4xf32>
    %cst_119 = arith.constant dense<0.000000e+00> : vector<16xf32>
    %237 = vector.multi_reduction <add>, %236, %cst_119 [1] : vector<16x4xf32> to vector<16xf32>
    %238 = vector.shape_cast %237 : vector<16xf32> to vector<16x1xf32>
    %c0_120 = arith.constant 0 : index
    %c16_121 = arith.constant 16 : index
    %239 = vector.load %arg19[%c0_120, %c16_121] : memref<16x64xf32, #tpu.memory_space<vmem>>, vector<16x16xf32>
    %240 = arith.truncf %239 : vector<16x16xf32> to vector<16x16xbf16>
    %c1_122 = arith.constant 1 : index
    %c0_123 = arith.constant 0 : index
    %c0_124 = arith.constant 0 : index
    %241 = vector.load %arg9[%c1_122, %c0_123, %c0_124] : memref<4x16x8xbf16, #tpu.memory_space<vmem>>, vector<1x16x8xbf16>
    %242 = vector.shape_cast %241 : vector<1x16x8xbf16> to vector<16x8xbf16>
    %cst_125 = arith.constant dense<0.000000e+00> : vector<16x8xf32>
    %243 = tpu.matmul %240, %242, %cst_125 {dimension_numbers = #tpu.dot_dimension_numbers<[1], [0], [0], [1], [0, 0, 1, 1], [], []>} : vector<16x16xbf16>, vector<16x8xbf16>, vector<16x8xf32> -> vector<16x8xf32>
    %c1_126 = arith.constant 1 : index
    %c0_127 = arith.constant 0 : index
    %c0_128 = arith.constant 0 : index
    %244 = vector.load %arg10[%c1_126, %c0_127, %c0_128] : memref<4x1x8xf32, #tpu.memory_space<vmem>>, vector<1x1x8xf32>
    %245 = vector.shape_cast %244 : vector<1x1x8xf32> to vector<1x8xf32>
    %246 = vector.broadcast %245 : vector<1x8xf32> to vector<16x8xf32>
    %247 = arith.addf %243, %246 : vector<16x8xf32>
    %248 = vector.broadcast %238 : vector<16x1xf32> to vector<16x8xf32>
    %249 = arith.mulf %248, %247 : vector<16x8xf32>
    %250 = arith.addf %232, %249 : vector<16x8xf32>
    %c2_i32_129 = arith.constant 2 : i32
    %251 = vector.broadcast %c2_i32_129 : i32 to vector<16x4xi32>
    %252 = arith.cmpi eq, %13, %251 : vector<16x4xi32>
    %cst_130 = arith.constant 0.000000e+00 : f32
    %253 = vector.broadcast %cst_130 : f32 to vector<16x4xf32>
    %254 = arith.select %252, %207, %253 : vector<16x4xi1>, vector<16x4xf32>
    %cst_131 = arith.constant dense<0.000000e+00> : vector<16xf32>
    %255 = vector.multi_reduction <add>, %254, %cst_131 [1] : vector<16x4xf32> to vector<16xf32>
    %256 = vector.shape_cast %255 : vector<16xf32> to vector<16x1xf32>
    %c0_132 = arith.constant 0 : index
    %c32_133 = arith.constant 32 : index
    %257 = vector.load %arg19[%c0_132, %c32_133] : memref<16x64xf32, #tpu.memory_space<vmem>>, vector<16x16xf32>
    %258 = arith.truncf %257 : vector<16x16xf32> to vector<16x16xbf16>
    %c2_134 = arith.constant 2 : index
    %c0_135 = arith.constant 0 : index
    %c0_136 = arith.constant 0 : index
    %259 = vector.load %arg9[%c2_134, %c0_135, %c0_136] : memref<4x16x8xbf16, #tpu.memory_space<vmem>>, vector<1x16x8xbf16>
    %260 = vector.shape_cast %259 : vector<1x16x8xbf16> to vector<16x8xbf16>
    %cst_137 = arith.constant dense<0.000000e+00> : vector<16x8xf32>
    %261 = tpu.matmul %258, %260, %cst_137 {dimension_numbers = #tpu.dot_dimension_numbers<[1], [0], [0], [1], [0, 0, 1, 1], [], []>} : vector<16x16xbf16>, vector<16x8xbf16>, vector<16x8xf32> -> vector<16x8xf32>
    %c2_138 = arith.constant 2 : index
    %c0_139 = arith.constant 0 : index
    %c0_140 = arith.constant 0 : index
    %262 = vector.load %arg10[%c2_138, %c0_139, %c0_140] : memref<4x1x8xf32, #tpu.memory_space<vmem>>, vector<1x1x8xf32>
    %263 = vector.shape_cast %262 : vector<1x1x8xf32> to vector<1x8xf32>
    %264 = vector.broadcast %263 : vector<1x8xf32> to vector<16x8xf32>
    %265 = arith.addf %261, %264 : vector<16x8xf32>
    %266 = vector.broadcast %256 : vector<16x1xf32> to vector<16x8xf32>
    %267 = arith.mulf %266, %265 : vector<16x8xf32>
    %268 = arith.addf %250, %267 : vector<16x8xf32>
    %c3_i32_141 = arith.constant 3 : i32
    %269 = vector.broadcast %c3_i32_141 : i32 to vector<16x4xi32>
    %270 = arith.cmpi eq, %13, %269 : vector<16x4xi32>
    %cst_142 = arith.constant 0.000000e+00 : f32
    %271 = vector.broadcast %cst_142 : f32 to vector<16x4xf32>
    %272 = arith.select %270, %207, %271 : vector<16x4xi1>, vector<16x4xf32>
    %cst_143 = arith.constant dense<0.000000e+00> : vector<16xf32>
    %273 = vector.multi_reduction <add>, %272, %cst_143 [1] : vector<16x4xf32> to vector<16xf32>
    %274 = vector.shape_cast %273 : vector<16xf32> to vector<16x1xf32>
    %c0_144 = arith.constant 0 : index
    %c48_145 = arith.constant 48 : index
    %275 = vector.load %arg19[%c0_144, %c48_145] : memref<16x64xf32, #tpu.memory_space<vmem>>, vector<16x16xf32>
    %276 = arith.truncf %275 : vector<16x16xf32> to vector<16x16xbf16>
    %c3_146 = arith.constant 3 : index
    %c0_147 = arith.constant 0 : index
    %c0_148 = arith.constant 0 : index
    %277 = vector.load %arg9[%c3_146, %c0_147, %c0_148] : memref<4x16x8xbf16, #tpu.memory_space<vmem>>, vector<1x16x8xbf16>
    %278 = vector.shape_cast %277 : vector<1x16x8xbf16> to vector<16x8xbf16>
    %cst_149 = arith.constant dense<0.000000e+00> : vector<16x8xf32>
    %279 = tpu.matmul %276, %278, %cst_149 {dimension_numbers = #tpu.dot_dimension_numbers<[1], [0], [0], [1], [0, 0, 1, 1], [], []>} : vector<16x16xbf16>, vector<16x8xbf16>, vector<16x8xf32> -> vector<16x8xf32>
    %c3_150 = arith.constant 3 : index
    %c0_151 = arith.constant 0 : index
    %c0_152 = arith.constant 0 : index
    %280 = vector.load %arg10[%c3_150, %c0_151, %c0_152] : memref<4x1x8xf32, #tpu.memory_space<vmem>>, vector<1x1x8xf32>
    %281 = vector.shape_cast %280 : vector<1x1x8xf32> to vector<1x8xf32>
    %282 = vector.broadcast %281 : vector<1x8xf32> to vector<16x8xf32>
    %283 = arith.addf %279, %282 : vector<16x8xf32>
    %284 = vector.broadcast %274 : vector<16x1xf32> to vector<16x8xf32>
    %285 = arith.mulf %284, %283 : vector<16x8xf32>
    %286 = arith.addf %268, %285 : vector<16x8xf32>
    %c0_153 = arith.constant 0 : index
    %c8_154 = arith.constant 8 : index
    %287 = vector.load %arg2[%c0_153, %c8_154] : memref<16x32xf32, #tpu.memory_space<vmem>>, vector<16x8xf32>
    %cst_155 = arith.constant 0.699999988 : f32
    %288 = vector.broadcast %cst_155 : f32 to vector<16x8xf32>
    %289 = arith.mulf %288, %287 : vector<16x8xf32>
    %cst_156 = arith.constant 1.000000e+00 : f32
    %290 = vector.broadcast %cst_156 : f32 to vector<16x8xf32>
    %291 = arith.mulf %290, %286 : vector<16x8xf32>
    %292 = arith.addf %289, %291 : vector<16x8xf32>
    %293 = arith.subf %166, %292 : vector<16x8xf32>
    %cst_157 = arith.constant dense<0.000000e+00> : vector<16xf32>
    %294 = vector.multi_reduction <add>, %293, %cst_157 [1] : vector<16x8xf32> to vector<16xf32>
    %295 = vector.shape_cast %294 : vector<16xf32> to vector<16x1xf32>
    %cst_158 = arith.constant 8.000000e+00 : f32
    %296 = vector.broadcast %cst_158 : f32 to vector<16x1xf32>
    %297 = arith.divf %295, %296 : vector<16x1xf32>
    %298 = vector.broadcast %297 : vector<16x1xf32> to vector<16x8xf32>
    %299 = arith.subf %293, %298 : vector<16x8xf32>
    %300 = arith.mulf %299, %299 : vector<16x8xf32>
    %cst_159 = arith.constant dense<0.000000e+00> : vector<16xf32>
    %301 = vector.multi_reduction <add>, %300, %cst_159 [1] : vector<16x8xf32> to vector<16xf32>
    %302 = vector.shape_cast %301 : vector<16xf32> to vector<16x1xf32>
    %cst_160 = arith.constant 8.000000e+00 : f32
    %303 = vector.broadcast %cst_160 : f32 to vector<16x1xf32>
    %304 = arith.divf %302, %303 : vector<16x1xf32>
    %305 = vector.broadcast %297 : vector<16x1xf32> to vector<16x8xf32>
    %306 = arith.subf %293, %305 : vector<16x8xf32>
    %cst_161 = arith.constant 9.99999974E-6 : f32
    %307 = vector.broadcast %cst_161 : f32 to vector<16x1xf32>
    %308 = arith.addf %304, %307 : vector<16x1xf32>
    %309 = math.rsqrt %308 : vector<16x1xf32>
    %310 = vector.broadcast %309 : vector<16x1xf32> to vector<16x8xf32>
    %311 = arith.mulf %306, %310 : vector<16x8xf32>
    %312 = vector.broadcast %11 : vector<1x8xf32> to vector<16x8xf32>
    %313 = arith.mulf %311, %312 : vector<16x8xf32>
    %314 = vector.broadcast %12 : vector<1x8xf32> to vector<16x8xf32>
    %315 = arith.addf %313, %314 : vector<16x8xf32>
    %c0_162 = arith.constant 0 : index
    %c8_163 = arith.constant 8 : index
    %316 = vector.load %arg18[%c0_162, %c8_163] : memref<16x32xf32, #tpu.memory_space<vmem>>, vector<16x8xf32>
    tpu.vector_store %arg18[%c0_162, %c8_163], %315 {strides = array<i32>} : memref<16x32xf32, #tpu.memory_space<vmem>>, vector<16x8xf32>,
    %c0_164 = arith.constant 0 : index
    %c8_165 = arith.constant 8 : index
    %317 = vector.load %arg16[%c0_164, %c8_165] : memref<16x32xf32, #tpu.memory_space<vmem>>, vector<16x8xf32>
    tpu.vector_store %arg16[%c0_164, %c8_165], %292 {strides = array<i32>} : memref<16x32xf32, #tpu.memory_space<vmem>>, vector<16x8xf32>,
    %c0_166 = arith.constant 0 : index
    %c16_167 = arith.constant 16 : index
    %318 = vector.load %arg17[%c0_166, %c16_167] : memref<16x32xf32, #tpu.memory_space<vmem>>, vector<16x8xf32>
    %319 = arith.truncf %318 : vector<16x8xf32> to vector<16x8xbf16>
    %cst_168 = arith.constant dense<0.000000e+00> : vector<16x4xf32>
    %320 = tpu.matmul %319, %7, %cst_168 {dimension_numbers = #tpu.dot_dimension_numbers<[1], [0], [0], [1], [0, 0, 1, 1], [], []>} : vector<16x8xbf16>, vector<8x4xbf16>, vector<16x4xf32> -> vector<16x4xf32>
    %321 = vector.broadcast %8 : vector<1x4xf32> to vector<16x4xf32>
    %322 = arith.addf %320, %321 : vector<16x4xf32>
    %323 = tpu.iota {dimensions = array<i32: 1>} : vector<16x4xi32>
    %false_169 = arith.constant false
    %324 = vector.broadcast %false_169 : i1 to vector<16x4xi1>
    %cst_170 = arith.constant dense<0xFF800000> : vector<16xf32>
    %325 = vector.multi_reduction <maximumf>, %322, %cst_170 [1] : vector<16x4xf32> to vector<16xf32>
    %326 = vector.shape_cast %325 : vector<16xf32> to vector<16x1xf32>
    %327 = vector.broadcast %326 : vector<16x1xf32> to vector<16x4xf32>
    %328 = arith.cmpf oeq, %322, %327 : vector<16x4xf32>
    %c4_i32_171 = arith.constant 4 : i32
    %329 = vector.broadcast %c4_i32_171 : i32 to vector<16x4xi32>
    %330 = arith.select %328, %323, %329 : vector<16x4xi1>, vector<16x4xi32>
    %cst_172 = arith.constant dense<2147483647> : vector<16xi32>
    %331 = vector.multi_reduction <minsi>, %330, %cst_172 [1] : vector<16x4xi32> to vector<16xi32>
    %332 = vector.shape_cast %331 : vector<16xi32> to vector<16x1xi32>
    %333 = vector.broadcast %332 : vector<16x1xi32> to vector<16x4xi32>
    %334 = arith.cmpi eq, %323, %333 : vector<16x4xi32>
    %335 = arith.ori %324, %334 : vector<16x4xi1>
    %cst_173 = arith.constant -1.000000e+30 : f32
    %336 = vector.broadcast %cst_173 : f32 to vector<16x4xf32>
    %337 = arith.select %334, %336, %322 : vector<16x4xi1>, vector<16x4xf32>
    %cst_174 = arith.constant dense<0xFF800000> : vector<16xf32>
    %338 = vector.multi_reduction <maximumf>, %337, %cst_174 [1] : vector<16x4xf32> to vector<16xf32>
    %339 = vector.shape_cast %338 : vector<16xf32> to vector<16x1xf32>
    %340 = vector.broadcast %339 : vector<16x1xf32> to vector<16x4xf32>
    %341 = arith.cmpf oeq, %337, %340 : vector<16x4xf32>
    %c4_i32_175 = arith.constant 4 : i32
    %342 = vector.broadcast %c4_i32_175 : i32 to vector<16x4xi32>
    %343 = arith.select %341, %323, %342 : vector<16x4xi1>, vector<16x4xi32>
    %cst_176 = arith.constant dense<2147483647> : vector<16xi32>
    %344 = vector.multi_reduction <minsi>, %343, %cst_176 [1] : vector<16x4xi32> to vector<16xi32>
    %345 = vector.shape_cast %344 : vector<16xi32> to vector<16x1xi32>
    %346 = vector.broadcast %345 : vector<16x1xi32> to vector<16x4xi32>
    %347 = arith.cmpi eq, %323, %346 : vector<16x4xi32>
    %348 = arith.ori %335, %347 : vector<16x4xi1>
    %cst_177 = arith.constant -1.000000e+30 : f32
    %349 = vector.broadcast %cst_177 : f32 to vector<16x4xf32>
    %350 = arith.select %348, %322, %349 : vector<16x4xi1>, vector<16x4xf32>
    %cst_178 = arith.constant dense<0xFF800000> : vector<16xf32>
    %351 = vector.multi_reduction <maximumf>, %350, %cst_178 [1] : vector<16x4xf32> to vector<16xf32>
    %352 = vector.shape_cast %351 : vector<16xf32> to vector<16x1xf32>
    %353 = vector.broadcast %352 : vector<16x1xf32> to vector<16x4xf32>
    %354 = arith.subf %350, %353 : vector<16x4xf32>
    %355 = math.exp %354 : vector<16x4xf32>
    %cst_179 = arith.constant dense<0.000000e+00> : vector<16xf32>
    %356 = vector.multi_reduction <add>, %355, %cst_179 [1] : vector<16x4xf32> to vector<16xf32>
    %357 = vector.shape_cast %356 : vector<16xf32> to vector<16x1xf32>
    %358 = vector.broadcast %357 : vector<16x1xf32> to vector<16x4xf32>
    %359 = arith.divf %355, %358 : vector<16x4xf32>
    %cst_180 = arith.constant dense<0.000000e+00> : vector<16x64xf32>
    %360 = tpu.matmul %319, %9, %cst_180 {dimension_numbers = #tpu.dot_dimension_numbers<[1], [0], [0], [1], [0, 0, 1, 1], [], []>} : vector<16x8xbf16>, vector<8x64xbf16>, vector<16x64xf32> -> vector<16x64xf32>
    %361 = vector.broadcast %10 : vector<1x64xf32> to vector<16x64xf32>
    %362 = arith.addf %360, %361 : vector<16x64xf32>
    %cst_181 = arith.constant 0.000000e+00 : f32
    %363 = vector.broadcast %cst_181 : f32 to vector<16x64xf32>
    %364 = arith.maximumf %362, %363 : vector<16x64xf32>
    %c0_182 = arith.constant 0 : index
    %c0_183 = arith.constant 0 : index
    %365 = vector.load %arg19[%c0_182, %c0_183] : memref<16x64xf32, #tpu.memory_space<vmem>>, vector<16x64xf32>
    tpu.vector_store %arg19[%c0_182, %c0_183], %364 {strides = array<i32>} : memref<16x64xf32, #tpu.memory_space<vmem>>, vector<16x64xf32>,
    %cst_184 = arith.constant 0.000000e+00 : f32
    %366 = vector.broadcast %cst_184 : f32 to vector<16x8xf32>
    %c0_i32_185 = arith.constant 0 : i32
    %367 = vector.broadcast %c0_i32_185 : i32 to vector<16x4xi32>
    %368 = arith.cmpi eq, %13, %367 : vector<16x4xi32>
    %cst_186 = arith.constant 0.000000e+00 : f32
    %369 = vector.broadcast %cst_186 : f32 to vector<16x4xf32>
    %370 = arith.select %368, %359, %369 : vector<16x4xi1>, vector<16x4xf32>
    %cst_187 = arith.constant dense<0.000000e+00> : vector<16xf32>
    %371 = vector.multi_reduction <add>, %370, %cst_187 [1] : vector<16x4xf32> to vector<16xf32>
    %372 = vector.shape_cast %371 : vector<16xf32> to vector<16x1xf32>
    %c0_188 = arith.constant 0 : index
    %c0_189 = arith.constant 0 : index
    %373 = vector.load %arg19[%c0_188, %c0_189] : memref<16x64xf32, #tpu.memory_space<vmem>>, vector<16x16xf32>
    %374 = arith.truncf %373 : vector<16x16xf32> to vector<16x16xbf16>
    %c0_190 = arith.constant 0 : index
    %c0_191 = arith.constant 0 : index
    %c0_192 = arith.constant 0 : index
    %375 = vector.load %arg9[%c0_190, %c0_191, %c0_192] : memref<4x16x8xbf16, #tpu.memory_space<vmem>>, vector<1x16x8xbf16>
    %376 = vector.shape_cast %375 : vector<1x16x8xbf16> to vector<16x8xbf16>
    %cst_193 = arith.constant dense<0.000000e+00> : vector<16x8xf32>
    %377 = tpu.matmul %374, %376, %cst_193 {dimension_numbers = #tpu.dot_dimension_numbers<[1], [0], [0], [1], [0, 0, 1, 1], [], []>} : vector<16x16xbf16>, vector<16x8xbf16>, vector<16x8xf32> -> vector<16x8xf32>
    %c0_194 = arith.constant 0 : index
    %c0_195 = arith.constant 0 : index
    %c0_196 = arith.constant 0 : index
    %378 = vector.load %arg10[%c0_194, %c0_195, %c0_196] : memref<4x1x8xf32, #tpu.memory_space<vmem>>, vector<1x1x8xf32>
    %379 = vector.shape_cast %378 : vector<1x1x8xf32> to vector<1x8xf32>
    %380 = vector.broadcast %379 : vector<1x8xf32> to vector<16x8xf32>
    %381 = arith.addf %377, %380 : vector<16x8xf32>
    %382 = vector.broadcast %372 : vector<16x1xf32> to vector<16x8xf32>
    %383 = arith.mulf %382, %381 : vector<16x8xf32>
    %384 = arith.addf %366, %383 : vector<16x8xf32>
    %c1_i32_197 = arith.constant 1 : i32
    %385 = vector.broadcast %c1_i32_197 : i32 to vector<16x4xi32>
    %386 = arith.cmpi eq, %13, %385 : vector<16x4xi32>
    %cst_198 = arith.constant 0.000000e+00 : f32
    %387 = vector.broadcast %cst_198 : f32 to vector<16x4xf32>
    %388 = arith.select %386, %359, %387 : vector<16x4xi1>, vector<16x4xf32>
    %cst_199 = arith.constant dense<0.000000e+00> : vector<16xf32>
    %389 = vector.multi_reduction <add>, %388, %cst_199 [1] : vector<16x4xf32> to vector<16xf32>
    %390 = vector.shape_cast %389 : vector<16xf32> to vector<16x1xf32>
    %c0_200 = arith.constant 0 : index
    %c16_201 = arith.constant 16 : index
    %391 = vector.load %arg19[%c0_200, %c16_201] : memref<16x64xf32, #tpu.memory_space<vmem>>, vector<16x16xf32>
    %392 = arith.truncf %391 : vector<16x16xf32> to vector<16x16xbf16>
    %c1_202 = arith.constant 1 : index
    %c0_203 = arith.constant 0 : index
    %c0_204 = arith.constant 0 : index
    %393 = vector.load %arg9[%c1_202, %c0_203, %c0_204] : memref<4x16x8xbf16, #tpu.memory_space<vmem>>, vector<1x16x8xbf16>
    %394 = vector.shape_cast %393 : vector<1x16x8xbf16> to vector<16x8xbf16>
    %cst_205 = arith.constant dense<0.000000e+00> : vector<16x8xf32>
    %395 = tpu.matmul %392, %394, %cst_205 {dimension_numbers = #tpu.dot_dimension_numbers<[1], [0], [0], [1], [0, 0, 1, 1], [], []>} : vector<16x16xbf16>, vector<16x8xbf16>, vector<16x8xf32> -> vector<16x8xf32>
    %c1_206 = arith.constant 1 : index
    %c0_207 = arith.constant 0 : index
    %c0_208 = arith.constant 0 : index
    %396 = vector.load %arg10[%c1_206, %c0_207, %c0_208] : memref<4x1x8xf32, #tpu.memory_space<vmem>>, vector<1x1x8xf32>
    %397 = vector.shape_cast %396 : vector<1x1x8xf32> to vector<1x8xf32>
    %398 = vector.broadcast %397 : vector<1x8xf32> to vector<16x8xf32>
    %399 = arith.addf %395, %398 : vector<16x8xf32>
    %400 = vector.broadcast %390 : vector<16x1xf32> to vector<16x8xf32>
    %401 = arith.mulf %400, %399 : vector<16x8xf32>
    %402 = arith.addf %384, %401 : vector<16x8xf32>
    %c2_i32_209 = arith.constant 2 : i32
    %403 = vector.broadcast %c2_i32_209 : i32 to vector<16x4xi32>
    %404 = arith.cmpi eq, %13, %403 : vector<16x4xi32>
    %cst_210 = arith.constant 0.000000e+00 : f32
    %405 = vector.broadcast %cst_210 : f32 to vector<16x4xf32>
    %406 = arith.select %404, %359, %405 : vector<16x4xi1>, vector<16x4xf32>
    %cst_211 = arith.constant dense<0.000000e+00> : vector<16xf32>
    %407 = vector.multi_reduction <add>, %406, %cst_211 [1] : vector<16x4xf32> to vector<16xf32>
    %408 = vector.shape_cast %407 : vector<16xf32> to vector<16x1xf32>
    %c0_212 = arith.constant 0 : index
    %c32_213 = arith.constant 32 : index
    %409 = vector.load %arg19[%c0_212, %c32_213] : memref<16x64xf32, #tpu.memory_space<vmem>>, vector<16x16xf32>
    %410 = arith.truncf %409 : vector<16x16xf32> to vector<16x16xbf16>
    %c2_214 = arith.constant 2 : index
    %c0_215 = arith.constant 0 : index
    %c0_216 = arith.constant 0 : index
    %411 = vector.load %arg9[%c2_214, %c0_215, %c0_216] : memref<4x16x8xbf16, #tpu.memory_space<vmem>>, vector<1x16x8xbf16>
    %412 = vector.shape_cast %411 : vector<1x16x8xbf16> to vector<16x8xbf16>
    %cst_217 = arith.constant dense<0.000000e+00> : vector<16x8xf32>
    %413 = tpu.matmul %410, %412, %cst_217 {dimension_numbers = #tpu.dot_dimension_numbers<[1], [0], [0], [1], [0, 0, 1, 1], [], []>} : vector<16x16xbf16>, vector<16x8xbf16>, vector<16x8xf32> -> vector<16x8xf32>
    %c2_218 = arith.constant 2 : index
    %c0_219 = arith.constant 0 : index
    %c0_220 = arith.constant 0 : index
    %414 = vector.load %arg10[%c2_218, %c0_219, %c0_220] : memref<4x1x8xf32, #tpu.memory_space<vmem>>, vector<1x1x8xf32>
    %415 = vector.shape_cast %414 : vector<1x1x8xf32> to vector<1x8xf32>
    %416 = vector.broadcast %415 : vector<1x8xf32> to vector<16x8xf32>
    %417 = arith.addf %413, %416 : vector<16x8xf32>
    %418 = vector.broadcast %408 : vector<16x1xf32> to vector<16x8xf32>
    %419 = arith.mulf %418, %417 : vector<16x8xf32>
    %420 = arith.addf %402, %419 : vector<16x8xf32>
    %c3_i32_221 = arith.constant 3 : i32
    %421 = vector.broadcast %c3_i32_221 : i32 to vector<16x4xi32>
    %422 = arith.cmpi eq, %13, %421 : vector<16x4xi32>
    %cst_222 = arith.constant 0.000000e+00 : f32
    %423 = vector.broadcast %cst_222 : f32 to vector<16x4xf32>
    %424 = arith.select %422, %359, %423 : vector<16x4xi1>, vector<16x4xf32>
    %cst_223 = arith.constant dense<0.000000e+00> : vector<16xf32>
    %425 = vector.multi_reduction <add>, %424, %cst_223 [1] : vector<16x4xf32> to vector<16xf32>
    %426 = vector.shape_cast %425 : vector<16xf32> to vector<16x1xf32>
    %c0_224 = arith.constant 0 : index
    %c48_225 = arith.constant 48 : index
    %427 = vector.load %arg19[%c0_224, %c48_225] : memref<16x64xf32, #tpu.memory_space<vmem>>, vector<16x16xf32>
    %428 = arith.truncf %427 : vector<16x16xf32> to vector<16x16xbf16>
    %c3_226 = arith.constant 3 : index
    %c0_227 = arith.constant 0 : index
    %c0_228 = arith.constant 0 : index
    %429 = vector.load %arg9[%c3_226, %c0_227, %c0_228] : memref<4x16x8xbf16, #tpu.memory_space<vmem>>, vector<1x16x8xbf16>
    %430 = vector.shape_cast %429 : vector<1x16x8xbf16> to vector<16x8xbf16>
    %cst_229 = arith.constant dense<0.000000e+00> : vector<16x8xf32>
    %431 = tpu.matmul %428, %430, %cst_229 {dimension_numbers = #tpu.dot_dimension_numbers<[1], [0], [0], [1], [0, 0, 1, 1], [], []>} : vector<16x16xbf16>, vector<16x8xbf16>, vector<16x8xf32> -> vector<16x8xf32>
    %c3_230 = arith.constant 3 : index
    %c0_231 = arith.constant 0 : index
    %c0_232 = arith.constant 0 : index
    %432 = vector.load %arg10[%c3_230, %c0_231, %c0_232] : memref<4x1x8xf32, #tpu.memory_space<vmem>>, vector<1x1x8xf32>
    %433 = vector.shape_cast %432 : vector<1x1x8xf32> to vector<1x8xf32>
    %434 = vector.broadcast %433 : vector<1x8xf32> to vector<16x8xf32>
    %435 = arith.addf %431, %434 : vector<16x8xf32>
    %436 = vector.broadcast %426 : vector<16x1xf32> to vector<16x8xf32>
    %437 = arith.mulf %436, %435 : vector<16x8xf32>
    %438 = arith.addf %420, %437 : vector<16x8xf32>
    %c0_233 = arith.constant 0 : index
    %c16_234 = arith.constant 16 : index
    %439 = vector.load %arg2[%c0_233, %c16_234] : memref<16x32xf32, #tpu.memory_space<vmem>>, vector<16x8xf32>
    %cst_235 = arith.constant 0.699999988 : f32
    %440 = vector.broadcast %cst_235 : f32 to vector<16x8xf32>
    %441 = arith.mulf %440, %439 : vector<16x8xf32>
    %cst_236 = arith.constant 1.000000e+00 : f32
    %442 = vector.broadcast %cst_236 : f32 to vector<16x8xf32>
    %443 = arith.mulf %442, %438 : vector<16x8xf32>
    %444 = arith.addf %441, %443 : vector<16x8xf32>
    %445 = arith.subf %318, %444 : vector<16x8xf32>
    %cst_237 = arith.constant dense<0.000000e+00> : vector<16xf32>
    %446 = vector.multi_reduction <add>, %445, %cst_237 [1] : vector<16x8xf32> to vector<16xf32>
    %447 = vector.shape_cast %446 : vector<16xf32> to vector<16x1xf32>
    %cst_238 = arith.constant 8.000000e+00 : f32
    %448 = vector.broadcast %cst_238 : f32 to vector<16x1xf32>
    %449 = arith.divf %447, %448 : vector<16x1xf32>
    %450 = vector.broadcast %449 : vector<16x1xf32> to vector<16x8xf32>
    %451 = arith.subf %445, %450 : vector<16x8xf32>
    %452 = arith.mulf %451, %451 : vector<16x8xf32>
    %cst_239 = arith.constant dense<0.000000e+00> : vector<16xf32>
    %453 = vector.multi_reduction <add>, %452, %cst_239 [1] : vector<16x8xf32> to vector<16xf32>
    %454 = vector.shape_cast %453 : vector<16xf32> to vector<16x1xf32>
    %cst_240 = arith.constant 8.000000e+00 : f32
    %455 = vector.broadcast %cst_240 : f32 to vector<16x1xf32>
    %456 = arith.divf %454, %455 : vector<16x1xf32>
    %457 = vector.broadcast %449 : vector<16x1xf32> to vector<16x8xf32>
    %458 = arith.subf %445, %457 : vector<16x8xf32>
    %cst_241 = arith.constant 9.99999974E-6 : f32
    %459 = vector.broadcast %cst_241 : f32 to vector<16x1xf32>
    %460 = arith.addf %456, %459 : vector<16x1xf32>
    %461 = math.rsqrt %460 : vector<16x1xf32>
    %462 = vector.broadcast %461 : vector<16x1xf32> to vector<16x8xf32>
    %463 = arith.mulf %458, %462 : vector<16x8xf32>
    %464 = vector.broadcast %11 : vector<1x8xf32> to vector<16x8xf32>
    %465 = arith.mulf %463, %464 : vector<16x8xf32>
    %466 = vector.broadcast %12 : vector<1x8xf32> to vector<16x8xf32>
    %467 = arith.addf %465, %466 : vector<16x8xf32>
    %c0_242 = arith.constant 0 : index
    %c16_243 = arith.constant 16 : index
    %468 = vector.load %arg18[%c0_242, %c16_243] : memref<16x32xf32, #tpu.memory_space<vmem>>, vector<16x8xf32>
    tpu.vector_store %arg18[%c0_242, %c16_243], %467 {strides = array<i32>} : memref<16x32xf32, #tpu.memory_space<vmem>>, vector<16x8xf32>,
    %c0_244 = arith.constant 0 : index
    %c16_245 = arith.constant 16 : index
    %469 = vector.load %arg16[%c0_244, %c16_245] : memref<16x32xf32, #tpu.memory_space<vmem>>, vector<16x8xf32>
    tpu.vector_store %arg16[%c0_244, %c16_245], %444 {strides = array<i32>} : memref<16x32xf32, #tpu.memory_space<vmem>>, vector<16x8xf32>,
    %c0_246 = arith.constant 0 : index
    %c24 = arith.constant 24 : index
    %470 = vector.load %arg17[%c0_246, %c24] : memref<16x32xf32, #tpu.memory_space<vmem>>, vector<16x8xf32>
    %471 = arith.truncf %470 : vector<16x8xf32> to vector<16x8xbf16>
    %cst_247 = arith.constant dense<0.000000e+00> : vector<16x4xf32>
    %472 = tpu.matmul %471, %7, %cst_247 {dimension_numbers = #tpu.dot_dimension_numbers<[1], [0], [0], [1], [0, 0, 1, 1], [], []>} : vector<16x8xbf16>, vector<8x4xbf16>, vector<16x4xf32> -> vector<16x4xf32>
    %473 = vector.broadcast %8 : vector<1x4xf32> to vector<16x4xf32>
    %474 = arith.addf %472, %473 : vector<16x4xf32>
    %475 = tpu.iota {dimensions = array<i32: 1>} : vector<16x4xi32>
    %false_248 = arith.constant false
    %476 = vector.broadcast %false_248 : i1 to vector<16x4xi1>
    %cst_249 = arith.constant dense<0xFF800000> : vector<16xf32>
    %477 = vector.multi_reduction <maximumf>, %474, %cst_249 [1] : vector<16x4xf32> to vector<16xf32>
    %478 = vector.shape_cast %477 : vector<16xf32> to vector<16x1xf32>
    %479 = vector.broadcast %478 : vector<16x1xf32> to vector<16x4xf32>
    %480 = arith.cmpf oeq, %474, %479 : vector<16x4xf32>
    %c4_i32_250 = arith.constant 4 : i32
    %481 = vector.broadcast %c4_i32_250 : i32 to vector<16x4xi32>
    %482 = arith.select %480, %475, %481 : vector<16x4xi1>, vector<16x4xi32>
    %cst_251 = arith.constant dense<2147483647> : vector<16xi32>
    %483 = vector.multi_reduction <minsi>, %482, %cst_251 [1] : vector<16x4xi32> to vector<16xi32>
    %484 = vector.shape_cast %483 : vector<16xi32> to vector<16x1xi32>
    %485 = vector.broadcast %484 : vector<16x1xi32> to vector<16x4xi32>
    %486 = arith.cmpi eq, %475, %485 : vector<16x4xi32>
    %487 = arith.ori %476, %486 : vector<16x4xi1>
    %cst_252 = arith.constant -1.000000e+30 : f32
    %488 = vector.broadcast %cst_252 : f32 to vector<16x4xf32>
    %489 = arith.select %486, %488, %474 : vector<16x4xi1>, vector<16x4xf32>
    %cst_253 = arith.constant dense<0xFF800000> : vector<16xf32>
    %490 = vector.multi_reduction <maximumf>, %489, %cst_253 [1] : vector<16x4xf32> to vector<16xf32>
    %491 = vector.shape_cast %490 : vector<16xf32> to vector<16x1xf32>
    %492 = vector.broadcast %491 : vector<16x1xf32> to vector<16x4xf32>
    %493 = arith.cmpf oeq, %489, %492 : vector<16x4xf32>
    %c4_i32_254 = arith.constant 4 : i32
    %494 = vector.broadcast %c4_i32_254 : i32 to vector<16x4xi32>
    %495 = arith.select %493, %475, %494 : vector<16x4xi1>, vector<16x4xi32>
    %cst_255 = arith.constant dense<2147483647> : vector<16xi32>
    %496 = vector.multi_reduction <minsi>, %495, %cst_255 [1] : vector<16x4xi32> to vector<16xi32>
    %497 = vector.shape_cast %496 : vector<16xi32> to vector<16x1xi32>
    %498 = vector.broadcast %497 : vector<16x1xi32> to vector<16x4xi32>
    %499 = arith.cmpi eq, %475, %498 : vector<16x4xi32>
    %500 = arith.ori %487, %499 : vector<16x4xi1>
    %cst_256 = arith.constant -1.000000e+30 : f32
    %501 = vector.broadcast %cst_256 : f32 to vector<16x4xf32>
    %502 = arith.select %500, %474, %501 : vector<16x4xi1>, vector<16x4xf32>
    %cst_257 = arith.constant dense<0xFF800000> : vector<16xf32>
    %503 = vector.multi_reduction <maximumf>, %502, %cst_257 [1] : vector<16x4xf32> to vector<16xf32>
    %504 = vector.shape_cast %503 : vector<16xf32> to vector<16x1xf32>
    %505 = vector.broadcast %504 : vector<16x1xf32> to vector<16x4xf32>
    %506 = arith.subf %502, %505 : vector<16x4xf32>
    %507 = math.exp %506 : vector<16x4xf32>
    %cst_258 = arith.constant dense<0.000000e+00> : vector<16xf32>
    %508 = vector.multi_reduction <add>, %507, %cst_258 [1] : vector<16x4xf32> to vector<16xf32>
    %509 = vector.shape_cast %508 : vector<16xf32> to vector<16x1xf32>
    %510 = vector.broadcast %509 : vector<16x1xf32> to vector<16x4xf32>
    %511 = arith.divf %507, %510 : vector<16x4xf32>
    %cst_259 = arith.constant dense<0.000000e+00> : vector<16x64xf32>
    %512 = tpu.matmul %471, %9, %cst_259 {dimension_numbers = #tpu.dot_dimension_numbers<[1], [0], [0], [1], [0, 0, 1, 1], [], []>} : vector<16x8xbf16>, vector<8x64xbf16>, vector<16x64xf32> -> vector<16x64xf32>
    %513 = vector.broadcast %10 : vector<1x64xf32> to vector<16x64xf32>
    %514 = arith.addf %512, %513 : vector<16x64xf32>
    %cst_260 = arith.constant 0.000000e+00 : f32
    %515 = vector.broadcast %cst_260 : f32 to vector<16x64xf32>
    %516 = arith.maximumf %514, %515 : vector<16x64xf32>
    %c0_261 = arith.constant 0 : index
    %c0_262 = arith.constant 0 : index
    %517 = vector.load %arg19[%c0_261, %c0_262] : memref<16x64xf32, #tpu.memory_space<vmem>>, vector<16x64xf32>
    tpu.vector_store %arg19[%c0_261, %c0_262], %516 {strides = array<i32>} : memref<16x64xf32, #tpu.memory_space<vmem>>, vector<16x64xf32>,
    %cst_263 = arith.constant 0.000000e+00 : f32
    %518 = vector.broadcast %cst_263 : f32 to vector<16x8xf32>
    %c0_i32_264 = arith.constant 0 : i32
    %519 = vector.broadcast %c0_i32_264 : i32 to vector<16x4xi32>
    %520 = arith.cmpi eq, %13, %519 : vector<16x4xi32>
    %cst_265 = arith.constant 0.000000e+00 : f32
    %521 = vector.broadcast %cst_265 : f32 to vector<16x4xf32>
    %522 = arith.select %520, %511, %521 : vector<16x4xi1>, vector<16x4xf32>
    %cst_266 = arith.constant dense<0.000000e+00> : vector<16xf32>
    %523 = vector.multi_reduction <add>, %522, %cst_266 [1] : vector<16x4xf32> to vector<16xf32>
    %524 = vector.shape_cast %523 : vector<16xf32> to vector<16x1xf32>
    %c0_267 = arith.constant 0 : index
    %c0_268 = arith.constant 0 : index
    %525 = vector.load %arg19[%c0_267, %c0_268] : memref<16x64xf32, #tpu.memory_space<vmem>>, vector<16x16xf32>
    %526 = arith.truncf %525 : vector<16x16xf32> to vector<16x16xbf16>
    %c0_269 = arith.constant 0 : index
    %c0_270 = arith.constant 0 : index
    %c0_271 = arith.constant 0 : index
    %527 = vector.load %arg9[%c0_269, %c0_270, %c0_271] : memref<4x16x8xbf16, #tpu.memory_space<vmem>>, vector<1x16x8xbf16>
    %528 = vector.shape_cast %527 : vector<1x16x8xbf16> to vector<16x8xbf16>
    %cst_272 = arith.constant dense<0.000000e+00> : vector<16x8xf32>
    %529 = tpu.matmul %526, %528, %cst_272 {dimension_numbers = #tpu.dot_dimension_numbers<[1], [0], [0], [1], [0, 0, 1, 1], [], []>} : vector<16x16xbf16>, vector<16x8xbf16>, vector<16x8xf32> -> vector<16x8xf32>
    %c0_273 = arith.constant 0 : index
    %c0_274 = arith.constant 0 : index
    %c0_275 = arith.constant 0 : index
    %530 = vector.load %arg10[%c0_273, %c0_274, %c0_275] : memref<4x1x8xf32, #tpu.memory_space<vmem>>, vector<1x1x8xf32>
    %531 = vector.shape_cast %530 : vector<1x1x8xf32> to vector<1x8xf32>
    %532 = vector.broadcast %531 : vector<1x8xf32> to vector<16x8xf32>
    %533 = arith.addf %529, %532 : vector<16x8xf32>
    %534 = vector.broadcast %524 : vector<16x1xf32> to vector<16x8xf32>
    %535 = arith.mulf %534, %533 : vector<16x8xf32>
    %536 = arith.addf %518, %535 : vector<16x8xf32>
    %c1_i32_276 = arith.constant 1 : i32
    %537 = vector.broadcast %c1_i32_276 : i32 to vector<16x4xi32>
    %538 = arith.cmpi eq, %13, %537 : vector<16x4xi32>
    %cst_277 = arith.constant 0.000000e+00 : f32
    %539 = vector.broadcast %cst_277 : f32 to vector<16x4xf32>
    %540 = arith.select %538, %511, %539 : vector<16x4xi1>, vector<16x4xf32>
    %cst_278 = arith.constant dense<0.000000e+00> : vector<16xf32>
    %541 = vector.multi_reduction <add>, %540, %cst_278 [1] : vector<16x4xf32> to vector<16xf32>
    %542 = vector.shape_cast %541 : vector<16xf32> to vector<16x1xf32>
    %c0_279 = arith.constant 0 : index
    %c16_280 = arith.constant 16 : index
    %543 = vector.load %arg19[%c0_279, %c16_280] : memref<16x64xf32, #tpu.memory_space<vmem>>, vector<16x16xf32>
    %544 = arith.truncf %543 : vector<16x16xf32> to vector<16x16xbf16>
    %c1_281 = arith.constant 1 : index
    %c0_282 = arith.constant 0 : index
    %c0_283 = arith.constant 0 : index
    %545 = vector.load %arg9[%c1_281, %c0_282, %c0_283] : memref<4x16x8xbf16, #tpu.memory_space<vmem>>, vector<1x16x8xbf16>
    %546 = vector.shape_cast %545 : vector<1x16x8xbf16> to vector<16x8xbf16>
    %cst_284 = arith.constant dense<0.000000e+00> : vector<16x8xf32>
    %547 = tpu.matmul %544, %546, %cst_284 {dimension_numbers = #tpu.dot_dimension_numbers<[1], [0], [0], [1], [0, 0, 1, 1], [], []>} : vector<16x16xbf16>, vector<16x8xbf16>, vector<16x8xf32> -> vector<16x8xf32>
    %c1_285 = arith.constant 1 : index
    %c0_286 = arith.constant 0 : index
    %c0_287 = arith.constant 0 : index
    %548 = vector.load %arg10[%c1_285, %c0_286, %c0_287] : memref<4x1x8xf32, #tpu.memory_space<vmem>>, vector<1x1x8xf32>
    %549 = vector.shape_cast %548 : vector<1x1x8xf32> to vector<1x8xf32>
    %550 = vector.broadcast %549 : vector<1x8xf32> to vector<16x8xf32>
    %551 = arith.addf %547, %550 : vector<16x8xf32>
    %552 = vector.broadcast %542 : vector<16x1xf32> to vector<16x8xf32>
    %553 = arith.mulf %552, %551 : vector<16x8xf32>
    %554 = arith.addf %536, %553 : vector<16x8xf32>
    %c2_i32_288 = arith.constant 2 : i32
    %555 = vector.broadcast %c2_i32_288 : i32 to vector<16x4xi32>
    %556 = arith.cmpi eq, %13, %555 : vector<16x4xi32>
    %cst_289 = arith.constant 0.000000e+00 : f32
    %557 = vector.broadcast %cst_289 : f32 to vector<16x4xf32>
    %558 = arith.select %556, %511, %557 : vector<16x4xi1>, vector<16x4xf32>
    %cst_290 = arith.constant dense<0.000000e+00> : vector<16xf32>
    %559 = vector.multi_reduction <add>, %558, %cst_290 [1] : vector<16x4xf32> to vector<16xf32>
    %560 = vector.shape_cast %559 : vector<16xf32> to vector<16x1xf32>
    %c0_291 = arith.constant 0 : index
    %c32_292 = arith.constant 32 : index
    %561 = vector.load %arg19[%c0_291, %c32_292] : memref<16x64xf32, #tpu.memory_space<vmem>>, vector<16x16xf32>
    %562 = arith.truncf %561 : vector<16x16xf32> to vector<16x16xbf16>
    %c2_293 = arith.constant 2 : index
    %c0_294 = arith.constant 0 : index
    %c0_295 = arith.constant 0 : index
    %563 = vector.load %arg9[%c2_293, %c0_294, %c0_295] : memref<4x16x8xbf16, #tpu.memory_space<vmem>>, vector<1x16x8xbf16>
    %564 = vector.shape_cast %563 : vector<1x16x8xbf16> to vector<16x8xbf16>
    %cst_296 = arith.constant dense<0.000000e+00> : vector<16x8xf32>
    %565 = tpu.matmul %562, %564, %cst_296 {dimension_numbers = #tpu.dot_dimension_numbers<[1], [0], [0], [1], [0, 0, 1, 1], [], []>} : vector<16x16xbf16>, vector<16x8xbf16>, vector<16x8xf32> -> vector<16x8xf32>
    %c2_297 = arith.constant 2 : index
    %c0_298 = arith.constant 0 : index
    %c0_299 = arith.constant 0 : index
    %566 = vector.load %arg10[%c2_297, %c0_298, %c0_299] : memref<4x1x8xf32, #tpu.memory_space<vmem>>, vector<1x1x8xf32>
    %567 = vector.shape_cast %566 : vector<1x1x8xf32> to vector<1x8xf32>
    %568 = vector.broadcast %567 : vector<1x8xf32> to vector<16x8xf32>
    %569 = arith.addf %565, %568 : vector<16x8xf32>
    %570 = vector.broadcast %560 : vector<16x1xf32> to vector<16x8xf32>
    %571 = arith.mulf %570, %569 : vector<16x8xf32>
    %572 = arith.addf %554, %571 : vector<16x8xf32>
    %c3_i32_300 = arith.constant 3 : i32
    %573 = vector.broadcast %c3_i32_300 : i32 to vector<16x4xi32>
    %574 = arith.cmpi eq, %13, %573 : vector<16x4xi32>
    %cst_301 = arith.constant 0.000000e+00 : f32
    %575 = vector.broadcast %cst_301 : f32 to vector<16x4xf32>
    %576 = arith.select %574, %511, %575 : vector<16x4xi1>, vector<16x4xf32>
    %cst_302 = arith.constant dense<0.000000e+00> : vector<16xf32>
    %577 = vector.multi_reduction <add>, %576, %cst_302 [1] : vector<16x4xf32> to vector<16xf32>
    %578 = vector.shape_cast %577 : vector<16xf32> to vector<16x1xf32>
    %c0_303 = arith.constant 0 : index
    %c48_304 = arith.constant 48 : index
    %579 = vector.load %arg19[%c0_303, %c48_304] : memref<16x64xf32, #tpu.memory_space<vmem>>, vector<16x16xf32>
    %580 = arith.truncf %579 : vector<16x16xf32> to vector<16x16xbf16>
    %c3_305 = arith.constant 3 : index
    %c0_306 = arith.constant 0 : index
    %c0_307 = arith.constant 0 : index
    %581 = vector.load %arg9[%c3_305, %c0_306, %c0_307] : memref<4x16x8xbf16, #tpu.memory_space<vmem>>, vector<1x16x8xbf16>
    %582 = vector.shape_cast %581 : vector<1x16x8xbf16> to vector<16x8xbf16>
    %cst_308 = arith.constant dense<0.000000e+00> : vector<16x8xf32>
    %583 = tpu.matmul %580, %582, %cst_308 {dimension_numbers = #tpu.dot_dimension_numbers<[1], [0], [0], [1], [0, 0, 1, 1], [], []>} : vector<16x16xbf16>, vector<16x8xbf16>, vector<16x8xf32> -> vector<16x8xf32>
    %c3_309 = arith.constant 3 : index
    %c0_310 = arith.constant 0 : index
    %c0_311 = arith.constant 0 : index
    %584 = vector.load %arg10[%c3_309, %c0_310, %c0_311] : memref<4x1x8xf32, #tpu.memory_space<vmem>>, vector<1x1x8xf32>
    %585 = vector.shape_cast %584 : vector<1x1x8xf32> to vector<1x8xf32>
    %586 = vector.broadcast %585 : vector<1x8xf32> to vector<16x8xf32>
    %587 = arith.addf %583, %586 : vector<16x8xf32>
    %588 = vector.broadcast %578 : vector<16x1xf32> to vector<16x8xf32>
    %589 = arith.mulf %588, %587 : vector<16x8xf32>
    %590 = arith.addf %572, %589 : vector<16x8xf32>
    %c0_312 = arith.constant 0 : index
    %c24_313 = arith.constant 24 : index
    %591 = vector.load %arg2[%c0_312, %c24_313] : memref<16x32xf32, #tpu.memory_space<vmem>>, vector<16x8xf32>
    %cst_314 = arith.constant 0.699999988 : f32
    %592 = vector.broadcast %cst_314 : f32 to vector<16x8xf32>
    %593 = arith.mulf %592, %591 : vector<16x8xf32>
    %cst_315 = arith.constant 1.000000e+00 : f32
    %594 = vector.broadcast %cst_315 : f32 to vector<16x8xf32>
    %595 = arith.mulf %594, %590 : vector<16x8xf32>
    %596 = arith.addf %593, %595 : vector<16x8xf32>
    %597 = arith.subf %470, %596 : vector<16x8xf32>
    %cst_316 = arith.constant dense<0.000000e+00> : vector<16xf32>
    %598 = vector.multi_reduction <add>, %597, %cst_316 [1] : vector<16x8xf32> to vector<16xf32>
    %599 = vector.shape_cast %598 : vector<16xf32> to vector<16x1xf32>
    %cst_317 = arith.constant 8.000000e+00 : f32
    %600 = vector.broadcast %cst_317 : f32 to vector<16x1xf32>
    %601 = arith.divf %599, %600 : vector<16x1xf32>
    %602 = vector.broadcast %601 : vector<16x1xf32> to vector<16x8xf32>
    %603 = arith.subf %597, %602 : vector<16x8xf32>
    %604 = arith.mulf %603, %603 : vector<16x8xf32>
    %cst_318 = arith.constant dense<0.000000e+00> : vector<16xf32>
    %605 = vector.multi_reduction <add>, %604, %cst_318 [1] : vector<16x8xf32> to vector<16xf32>
    %606 = vector.shape_cast %605 : vector<16xf32> to vector<16x1xf32>
    %cst_319 = arith.constant 8.000000e+00 : f32
    %607 = vector.broadcast %cst_319 : f32 to vector<16x1xf32>
    %608 = arith.divf %606, %607 : vector<16x1xf32>
    %609 = vector.broadcast %601 : vector<16x1xf32> to vector<16x8xf32>
    %610 = arith.subf %597, %609 : vector<16x8xf32>
    %cst_320 = arith.constant 9.99999974E-6 : f32
    %611 = vector.broadcast %cst_320 : f32 to vector<16x1xf32>
    %612 = arith.addf %608, %611 : vector<16x1xf32>
    %613 = math.rsqrt %612 : vector<16x1xf32>
    %614 = vector.broadcast %613 : vector<16x1xf32> to vector<16x8xf32>
    %615 = arith.mulf %610, %614 : vector<16x8xf32>
    %616 = vector.broadcast %11 : vector<1x8xf32> to vector<16x8xf32>
    %617 = arith.mulf %615, %616 : vector<16x8xf32>
    %618 = vector.broadcast %12 : vector<1x8xf32> to vector<16x8xf32>
    %619 = arith.addf %617, %618 : vector<16x8xf32>
    %c0_321 = arith.constant 0 : index
    %c24_322 = arith.constant 24 : index
    %620 = vector.load %arg18[%c0_321, %c24_322] : memref<16x32xf32, #tpu.memory_space<vmem>>, vector<16x8xf32>
    tpu.vector_store %arg18[%c0_321, %c24_322], %619 {strides = array<i32>} : memref<16x32xf32, #tpu.memory_space<vmem>>, vector<16x8xf32>,
    %c0_323 = arith.constant 0 : index
    %c24_324 = arith.constant 24 : index
    %621 = vector.load %arg16[%c0_323, %c24_324] : memref<16x32xf32, #tpu.memory_space<vmem>>, vector<16x8xf32>
    tpu.vector_store %arg16[%c0_323, %c24_324], %596 {strides = array<i32>} : memref<16x32xf32, #tpu.memory_space<vmem>>, vector<16x8xf32>,
    %c0_325 = arith.constant 0 : index
    %c0_326 = arith.constant 0 : index
    %622 = vector.load %arg18[%c0_325, %c0_326] : memref<16x32xf32, #tpu.memory_space<vmem>>, vector<16x32xf32>
    %623 = arith.truncf %622 : vector<16x32xf32> to vector<16x32xbf16>
    %c0_327 = arith.constant 0 : index
    %c0_328 = arith.constant 0 : index
    %624 = vector.load %arg13[%c0_327, %c0_328] : memref<32x32xbf16, #tpu.memory_space<vmem>>, vector<32x32xbf16>
    %cst_329 = arith.constant dense<0.000000e+00> : vector<16x32xf32>
    %625 = tpu.matmul %623, %624, %cst_329 {dimension_numbers = #tpu.dot_dimension_numbers<[1], [0], [0], [1], [0, 0, 1, 1], [], []>} : vector<16x32xbf16>, vector<32x32xbf16>, vector<16x32xf32> -> vector<16x32xf32>
    %c0_330 = arith.constant 0 : index
    %c0_331 = arith.constant 0 : index
    %626 = vector.load %arg14[%c0_330, %c0_331] : memref<1x32xf32, #tpu.memory_space<vmem>>, vector<1x32xf32>
    %627 = vector.broadcast %626 : vector<1x32xf32> to vector<16x32xf32>
    %628 = arith.addf %625, %627 : vector<16x32xf32>
    %c0_332 = arith.constant 0 : index
    %c0_333 = arith.constant 0 : index
    %629 = vector.load %arg15[%c0_332, %c0_333] : memref<16x32xf32, #tpu.memory_space<vmem>>, vector<16x32xf32>
    tpu.vector_store %arg15[%c0_332, %c0_333], %628 {strides = array<i32>} : memref<16x32xf32, #tpu.memory_space<vmem>>, vector<16x32xf32>,
    return
  }
  func.func @transform_0(%arg0: i32) -> (i32, i32) {
    %c0_i32 = arith.constant 0 : i32
    %c0_i32_0 = arith.constant 0 : i32
    return %arg0, %c0_i32 : i32, i32
  }
  func.func @transform_1(%arg0: i32) -> (i32, i32) {
    %c0_i32 = arith.constant 0 : i32
    %c0_i32_0 = arith.constant 0 : i32
    return %arg0, %c0_i32 : i32, i32
  }
  func.func @transform_2(%arg0: i32) -> (i32, i32) {
    %c0_i32 = arith.constant 0 : i32
    %c0_i32_0 = arith.constant 0 : i32
    %c0_i32_1 = arith.constant 0 : i32
    return %c0_i32, %c0_i32_0 : i32, i32
  }
  func.func @transform_3(%arg0: i32) -> (i32, i32) {
    %c0_i32 = arith.constant 0 : i32
    %c0_i32_0 = arith.constant 0 : i32
    %c0_i32_1 = arith.constant 0 : i32
    return %c0_i32, %c0_i32_0 : i32, i32
  }
  func.func @transform_4(%arg0: i32) -> (i32, i32) {
    %c0_i32 = arith.constant 0 : i32
    %c0_i32_0 = arith.constant 0 : i32
    %c0_i32_1 = arith.constant 0 : i32
    return %c0_i32, %c0_i32_0 : i32, i32
  }
  func.func @transform_5(%arg0: i32) -> (i32, i32) {
    %c0_i32 = arith.constant 0 : i32
    %c0_i32_0 = arith.constant 0 : i32
    %c0_i32_1 = arith.constant 0 : i32
    return %c0_i32, %c0_i32_0 : i32, i32
  }
  func.func @transform_6(%arg0: i32) -> (i32, i32) {
    %c0_i32 = arith.constant 0 : i32
    %c0_i32_0 = arith.constant 0 : i32
    %c0_i32_1 = arith.constant 0 : i32
    return %c0_i32, %c0_i32_0 : i32, i32
  }
  func.func @transform_7(%arg0: i32) -> (i32, i32) {
    %c0_i32 = arith.constant 0 : i32
    %c0_i32_0 = arith.constant 0 : i32
    %c0_i32_1 = arith.constant 0 : i32
    return %c0_i32, %c0_i32_0 : i32, i32
  }
  func.func @transform_8(%arg0: i32) -> (i32, i32, i32) {
    %c0_i32 = arith.constant 0 : i32
    %c0_i32_0 = arith.constant 0 : i32
    %c0_i32_1 = arith.constant 0 : i32
    %c0_i32_2 = arith.constant 0 : i32
    return %c0_i32, %c0_i32_0, %c0_i32_1 : i32, i32, i32
  }
  func.func @transform_9(%arg0: i32) -> (i32, i32, i32) {
    %c0_i32 = arith.constant 0 : i32
    %c0_i32_0 = arith.constant 0 : i32
    %c0_i32_1 = arith.constant 0 : i32
    %c0_i32_2 = arith.constant 0 : i32
    return %c0_i32, %c0_i32_0, %c0_i32_1 : i32, i32, i32
  }
  func.func @transform_10(%arg0: i32) -> (i32, i32) {
    %c0_i32 = arith.constant 0 : i32
    %c0_i32_0 = arith.constant 0 : i32
    %c0_i32_1 = arith.constant 0 : i32
    return %c0_i32, %c0_i32_0 : i32, i32
  }
  func.func @transform_11(%arg0: i32) -> (i32, i32) {
    %c0_i32 = arith.constant 0 : i32
    %c0_i32_0 = arith.constant 0 : i32
    %c0_i32_1 = arith.constant 0 : i32
    return %c0_i32, %c0_i32_0 : i32, i32
  }
  func.func @transform_12(%arg0: i32) -> (i32, i32) {
    %c0_i32 = arith.constant 0 : i32
    %c0_i32_0 = arith.constant 0 : i32
    %c0_i32_1 = arith.constant 0 : i32
    return %c0_i32, %c0_i32_0 : i32, i32
  }
  func.func @transform_13(%arg0: i32) -> (i32, i32) {
    %c0_i32 = arith.constant 0 : i32
    %c0_i32_0 = arith.constant 0 : i32
    %c0_i32_1 = arith.constant 0 : i32
    return %c0_i32, %c0_i32_0 : i32, i32
  }
  func.func @transform_14(%arg0: i32) -> (i32, i32) {
    %c0_i32 = arith.constant 0 : i32
    %c0_i32_0 = arith.constant 0 : i32
    return %arg0, %c0_i32 : i32, i32
  }
  func.func @transform_15(%arg0: i32) -> (i32, i32) {
    %c0_i32 = arith.constant 0 : i32
    %c0_i32_0 = arith.constant 0 : i32
    return %arg0, %c0_i32 : i32, i32
  }
}

</mosaic_0001>

<bundles_post_ra>
// kernel: multi_head_momentum_forward.1
= control target key start
LH: loop header
LB: loop body
LE: loop exit
PB: predicated region body
PF: predicated region fallthrough
CT: control target
= control target key end

     0   :  { %vm78_vm0 = vcmask 261120   ;;  %s3323_s0 = inlined_call_operand.vmem [shape: bf16[16,32], index: 0, kind: input, shape index: {}]   ;;  %s3324_s1 = inlined_call_operand.vmem [shape: f32[16,32], index: 1, kind: input, shape index: {}, may-alias: {1,15}]   ;;  %s3325_s2 = inlined_call_operand.vmem [shape: bf16[32,32], index: 2, kind: input, shape index: {}]   ;;  %s3326_s3 = inlined_call_operand.vmem [shape: f32[1,32], index: 3, kind: input, shape index: {}]   ;;  %s3327_s4 = inlined_call_operand.vmem [shape: bf16[8,4], index: 4, kind: input, shape index: {}]   ;;  %s3328_s5 = inlined_call_operand.vmem [shape: f32[1,4], index: 5, kind: input, shape index: {}]   ;;  %s3329_s6 = inlined_call_operand.vmem [shape: bf16[8,64], index: 6, kind: input, shape index: {}]   ;;  %s3330_s7 = inlined_call_operand.vmem [shape: f32[1,64], index: 7, kind: input, shape index: {}]   ;;  %s3331_s8 = inlined_call_operand.vmem [shape: bf16[4,16,8], index: 8, kind: input, shape index: {}]   ;;  %s3332_s9 = inlined_call_operand.vmem [shape: f32[4,1,8], index: 9, kind: input, shape index: {}]   ;;  %s3333_s10 = inlined_call_operand.vmem [shape: f32[1,8], index: 10, kind: input, shape index: {}]   ;;  %s3334_s11 = inlined_call_operand.vmem [shape: f32[1,8], index: 11, kind: input, shape index: {}]   ;;  %s3335_s12 = inlined_call_operand.vmem [shape: bf16[32,32], index: 12, kind: input, shape index: {}]   ;;  %s3336_s13 = inlined_call_operand.vmem [shape: f32[1,32], index: 13, kind: input, shape index: {}]   ;;  %s3337_s14 = inlined_call_operand.hbm [shape: f32[16,32], index: 14, kind: output, shape index: {0}]   ;;  %s3338_s15 = inlined_call_operand.vmem [shape: f32[16,32], index: 15, kind: output, shape index: {1}, may-alias: {1,15}]  }
   0x1   :  { %v2100_v0 = vld [vmem:[%s3325_s2 + $0x8] sm:$0xff]  ;;  %v2099_v1 = vld [vmem:[%s3325_s2] sm:$0xff] }
   0x2   :  { %88 = vmatpush.bf16.msra.mxu0 %v2100_v0  ;;  %v2098_v2 = vld [vmem:[%s3323_s0] sm:$0xff] }
   0x6   :  { %89 = vmatpush.bf16.msra.mxu0 %v2099_v1 }
   0x7   :  { %21 = vsyncpa [#allocation6], 0  ;;  %v98_v3 = vld [vmem:[%s3327_s4] sm:$0xf]  ;;  %vm116_vm1 = vcmask 1043456   ;;  %vm112_vm2 = vcmask 64512   ;;  %v104_v63 = vlaneseq }
   0x8   :  { %v100_v4 = vld [vmem:[%s3329_s6] sm:$0xf]  ;;  %v2338_v5 = vsel %vm116_vm1, %v98_v3, 0  ;;  %s2231_s4 = smov 112   ;;  %v2103_v18 = vld [vmem:[%s3331_s8 + $0x10] sm:$0xff]  ;;  %vm295_vm3 = vcmask 523264  }
   0x9   :  { %1964 = vmatmul.msk.bf16.vlgmr.msra.gmra.mxu0 %vm78_vm0, %v2098_v2  ;;  %v2340_v6 = vsel %vm116_vm1, %v100_v4, 0  ;;  %127 = vmatpush.bf16.msra.mxu1 %v2338_v5  ;;  %v2130_v7 = vld [vmem:[%s3326_s3] ss:$0 sm:$0xff]  ;;  %vm322_vm4 = vcmask 130048   ;;  %s2233_s17 = smov 80   ;;  %s2234_s18 = smov 120  }
   0xa   :  { %286 = vmatpush.bf16.msra.mxu2 %v2340_v6  ;;  %572 = vmatpush.bf16.msrb.mxu0 %v2338_v5  ;;  %v2101_v15 = vld [vmem:[%s3331_s8] sm:$0xff]  ;;  %v2102_v27 = vld [vmem:[%s3331_s8 + $0x8] sm:$0xff]  ;;  %v2104_v28 = vld [vmem:[%s3331_s8 + $0x18] sm:$0xff]  ;;  %vm134_vm5 = vcmask 31744   ;;  %v2452_v0 = vand.u32 127, %v104_v63  ;;  %s2237_s25 = smov 16  }
   0xb   :  { %333 = vmatpush.bf16.msra.mxu3 %v2101_v15  ;;  %v2364_v16 = vld [vmem:[%s3330_s7] ss:$0 sm:$0xff]  ;;  %s2232_s7 = smov 96   ;;  %v2135_v39 = vld [vmem:[%s3332_s9 + $0x1] ss:$0 sm:$0xff]  ;;  %v2106_v61 = vld [vmem:[%s3331_s8 + $0x8] sm:$0xff] }
   0xc   :  { %v2105_v36 = vld [vmem:[%s3331_s8] sm:$0xff]  ;;  %v2107_v62 = vld [vmem:[%s3331_s8 + $0x10] sm:$0xff]  ;;  %s2238_s28 = smov 24   ;;  %s2240_s26 = smov [#allocation5]  }
   0xd   :  { %380 = vmatpush.bf16.msrb.mxu1 %v2102_v27  ;;  %v2402_v38 = vld [vmem:[%s3328_s5] ss:$0 sm:$0xff]  ;;  %s2235_s5 = smov 104   ;;  %s1934_s27 = sshll.u32 %s2240_s26, 4  ;;  %s1935_s27 = int_to_ptr.vmem [resolvable:$true] %s1934_s27 }
   0xe   :  { %426 = vmatpush.bf16.msrb.mxu2 %v2103_v18  ;;  %855 = vmatpush.bf16.msra.mxu0 %v2107_v62  ;;  %s2241_s0 = smov 128  }
   0xf   :  { %472 = vmatpush.bf16.msrb.mxu3 %v2104_v28 }
  0x86   :  { %v91_v8 = vpop.f32.mrf.mxu0 }
  0x87   :  { %v92_v9 = vadd.f32 %v2130_v7, %v91_v8 }
  0x89   :  { %96 = vst.msk [vmem:[#allocation2] sm:$0xff] %vm78_vm0, %v92_v9 }
  0x8e   :  { %v93_v10 = vpop.f32.mrf.mxu0 }
  0x8f   :  { %v94_v11 = vadd.f32 %v2130_v7, %v93_v10 }
  0x90   :  { %v1000_v12 = vld [vmem:[#allocation2] sm:$0xff] }
  0x91   :  { %97 = vst.msk [vmem:[#allocation2 + $0x8] sm:$0xff] %vm78_vm0, %v94_v11 }
  0x98   :  { %v1001_v13 = vld [vmem:[#allocation2 + $0x8] sm:$0xff] }
  0x99   :  { %v2350_v14 = vpack.c.bf16 %v1001_v13, %v1000_v12 }
  0x9b   :  { %1004 = vrot.lane.b32.xlu2 %v2350_v14, %s2231_s4  ;;  %1965 = vmatmul.msk.bf16.vlgmr.msra.gmra.mxu1 %vm112_vm2, %v2350_v14 }
  0x9c   :  { %1966 = vmatmul.msk.bf16.vlgmr.msra.gmra.mxu2 %vm112_vm2, %v2350_v14  ;;  %724 = vmatpush.bf16.msra.mxu1 %v2340_v6 }
  0x9d   :  { %768 = vmatpush.bf16.msra.mxu2 %v2105_v36 }
  0xf5   :  { %v2386_v29 = vpop.permute.xlu2 %1004 }
 0x118   :  { %v129_v34 = vpop.f32.mrf.mxu1 }
 0x119   :  { %v2441_v59 = vadd.f32 %v2402_v38, %v129_v34 }
 0x11b   :  { %v135_v60 = vsel %vm134_vm5, %v2441_v59, -inf }
 0x11f   :  { %v288_v17 = vpop.f32.mrf.mxu2 }
 0x120   :  { %v289_v19 = vadd.f32 %v2364_v16, %v288_v17  ;;  %v131_v35 = vpop.f32.mrf.mxu1 }
 0x121   :  { %v2415_v45 = vadd.f32 %v2402_v38, %v131_v35 }
 0x122   :  { %v293_v20 = vmax.f32 %v289_v19, 0.0 }
 0x123   :  { %v138_v49 = vsel %vm134_vm5, %v2415_v45, -inf }
 0x124   :  { %296 = vst.msk [vmem:[#allocation4] sm:$0xff] %vm295_vm3, %v293_v20 }
 0x127   :  { %v290_v21 = vpop.f32.mrf.mxu2 }
 0x128   :  { %v291_v22 = vadd.f32 %v2364_v16, %v290_v21 }
 0x12a   :  { %v294_v23 = vmax.f32 %v291_v22, 0.0 }
 0x12b   :  { %v307_v24 = vld [vmem:[#allocation4] sm:$0xff] }
 0x12c   :  { %297 = vst.msk [vmem:[#allocation4 + $0x8] sm:$0xff] %vm295_vm3, %v294_v23 }
 0x133   :  { %v308_v25 = vld [vmem:[#allocation4 + $0x8] sm:$0xff] }
 0x134   :  { %v309_v26 = vpack.c.bf16 %v308_v25, %v307_v24 }
 0x136   :  { %408 = vrot.lane.b32.xlu2 %v309_v26, %s2232_s7  ;;  %454 = vrot.lane.b32.xlu1 %v309_v26, %s2233_s17 }
 0x137   :  { %362 = vrot.lane.b32.xlu0 %v309_v26, %s2231_s4  ;;  %1971 = vmatmul.msk.bf16.vlgmr.msra.gmra.mxu3 %vm322_vm4, %v309_v26 }
 0x138   :  { %812 = vmatpush.bf16.msra.mxu3 %v2106_v61 }
 0x13f   :  { %560 = vrot.lane.b32.xlu0 %v2350_v14, %s2234_s18 }
 0x190   :  { %v409_v30 = vpop.permute.xlu2 %408 }
 0x191   :  { %1987 = vmatmul.msk.bf16.vlgmr.msrb.gmra.mxu2 %vm322_vm4, %v409_v30 }
 0x192   :  { %1016 = vmatpush.bf16.msrb.mxu2 %v2338_v5 }
 0x1a8   :  { %v455_v31 = vpop.permute.xlu1 %454 }
 0x1a9   :  { %v363_v32 = vpop.permute.xlu0 %362  ;;  %1995 = vmatmul.msk.bf16.vlgmr.msrb.gmra.mxu3 %vm322_vm4, %v455_v31 }
 0x1aa   :  { %1979 = vmatmul.msk.bf16.vlgmr.msrb.gmra.mxu1 %vm322_vm4, %v363_v32  ;;  %1168 = vmatpush.bf16.msrb.mxu3 %v2340_v6  ;;  %v2109_v32 = vld [vmem:[%s3331_s8] sm:$0xff] }
 0x1b1   :  { %v561_v33 = vpop.permute.xlu0 %560 }
 0x1b2   :  { %1996 = vmatmul.msk.bf16.vlgmr.msrb.gmra.mxu0 %vm112_vm2, %v561_v33 }
 0x1b3   :  { %1212 = vmatpush.bf16.msrb.mxu0 %v2109_v32 }
 0x1ba   :  { %1997 = vmatmul.msk.bf16.vlgmr.msra.gmra.mxu1 %vm112_vm2, %v561_v33  ;;  %v2478_v27 = vpop.f32.mrf.mxu3 }
 0x1c2   :  { %v2480_v28 = vpop.f32.mrf.mxu3 }
 0x227   :  { %v2396_v37 = vpop.f32.mrf.mxu1 }
 0x22f   :  { %v384_v40 = vpop.f32.mrf.mxu1  ;;  %v574_v41 = vpop.f32.mrf.mxu0 }
 0x230   :  { %v2407_v42 = vadd.f32 %v2135_v39, %v384_v40  ;;  %v2410_v43 = vadd.f32 %v2402_v38, %v574_v41 }
 0x232   :  { %v579_v44 = vsel %vm134_vm5, %v2410_v43, -inf }
 0x233   :  { %580 = vmax.xlane.f32.xlu2 %v579_v44 }
 0x237   :  { %v726_v46 = vpop.f32.mrf.mxu1  ;;  %v576_v56 = vpop.f32.mrf.mxu0 }
 0x238   :  { %v727_v47 = vadd.f32 %v2364_v16, %v726_v46  ;;  %v2436_v57 = vadd.f32 %v2402_v38, %v576_v56 }
 0x23a   :  { %v731_v48 = vmax.f32 %v727_v47, 0.0  ;;  %v582_v58 = vsel %vm134_vm5, %v2436_v57, -inf }
 0x23b   :  { %139 = vmax.xlane.f32.xlu2 %v138_v49 }
 0x23c   :  { %733 = vst.msk [vmem:[#allocation4] sm:$0xff] %vm295_vm3, %v731_v48 }
 0x23f   :  { %v728_v50 = vpop.f32.mrf.mxu1 }
 0x240   :  { %v729_v51 = vadd.f32 %v2364_v16, %v728_v50 }
 0x242   :  { %v732_v52 = vmax.f32 %v729_v51, 0.0 }
 0x243   :  { %v743_v53 = vld [vmem:[#allocation4] sm:$0xff] }
 0x244   :  { %734 = vst.msk [vmem:[#allocation4 + $0x8] sm:$0xff] %vm295_vm3, %v732_v52 }
 0x24b   :  { %v744_v54 = vld [vmem:[#allocation4 + $0x8] sm:$0xff] }
 0x24c   :  { %v2423_v55 = vpack.c.bf16 %v744_v54, %v743_v53 }
 0x24e   :  { %837 = vrot.lane.b32.xlu0 %v2423_v55, %s2232_s7  ;;  %794 = vrot.lane.b32.xlu1 %v2423_v55, %s2231_s4 }
 0x24f   :  { %2002 = vmatmul.msk.bf16.vlgmr.msra.gmra.mxu2 %vm322_vm4, %v2423_v55 }
 0x256   :  { %1448 = vrot.lane.b32.xlu1 %v2350_v14, %s2235_s5 }
 0x25f   :  { %2027 = vmatmul.msk.bf16.vlgmr.msrb.gmra.mxu2 %vm112_vm2, %v2386_v29 }
 0x278   :  { %583 = vmax.xlane.f32.xlu0 %v582_v58 }
 0x280   :  { %136 = vmax.xlane.f32.xlu1 %v135_v60 }
 0x2a6   :  { %v581_v1 = vpop.xlane.xlu2 %580 }
 0x2a7   :  { %vm585_vm6 = vcmp.eq.f32.partialorder %v2410_v43, %v581_v1 }
 0x2a8   :  { %v587_v2 = vsel %vm585_vm6, %v2452_v0, 4 }
 0x2a9   :  { %v2457_v3 = vsel %vm134_vm5, %v587_v2, 2147483647 }
 0x2aa   :  { %v591_v4 = vshra.s32 %v2457_v3, 16  ;;  %v590_v63 = vand.u32 65535, %v2457_v3 }
 0x2ac   :  { %v2460_v7 = vcvt.s32.f32 %v591_v4  ;;  %v592_v1 = vcvt.s32.f32 %v590_v63  ;;  %v2507_v4 = vpop.f32.mrf.mxu2 }
 0x2ae   :  { %594 = vmin.xlane.f32.xlu0 %v2460_v7  ;;  %v140_v10 = vpop.xlane.xlu2 %139 }
 0x2af   :  { %vm142_vm7 = vcmp.eq.f32.partialorder %v2415_v45, %v140_v10 }
 0x2b0   :  { %v144_v15 = vsel %vm142_vm7, %v2452_v0, 4 }
 0x2b1   :  { %v160_v19 = vsel %vm134_vm5, %v144_v15, 2147483647 }
 0x2b2   :  { %v162_v22 = vshra.s32 %v160_v19, 16  ;;  %v161_v52 = vand.u32 65535, %v160_v19 }
 0x2b4   :  { %v164_v25 = vcvt.s32.f32 %v162_v22  ;;  %v163_v58 = vcvt.s32.f32 %v161_v52 }
 0x2c0   :  { %v838_v8 = vpop.permute.xlu0 %837  ;;  %v795_v9 = vpop.permute.xlu1 %794 }
 0x2c1   :  { %2010 = vmatmul.msk.bf16.vlgmr.msra.gmra.mxu3 %vm322_vm4, %v795_v9  ;;  %2018 = vmatmul.msk.bf16.vlgmr.msra.gmra.mxu0 %vm322_vm4, %v838_v8  ;;  %v2511_v8 = vpop.f32.mrf.mxu2 }
 0x2c2   :  { %1460 = vmatpush.bf16.msra.mxu0 %v2338_v5 }
 0x2c8   :  { %v2467_v11 = vpop.permute.xlu1 %1448 }
 0x2d1   :  { %2028 = vmatmul.msk.bf16.vlgmr.msrb.gmra.mxu3 %vm112_vm2, %v2386_v29  ;;  %v2482_v29 = vpop.f32.mrf.mxu3 }
 0x2d2   :  { %v2515_v9 = vpop.f32.mrf.mxu2 }
 0x2d9   :  { %v2484_v30 = vpop.f32.mrf.mxu3 }
 0x2da   :  { %v2517_v10 = vpop.f32.mrf.mxu2 }
 0x2e2   :  { %v1018_v3 = vpop.f32.mrf.mxu2 }
 0x2eb   :  { %v584_v12 = vpop.xlane.xlu0 %583 }
 0x2ec   :  { %vm586_vm8 = vcmp.eq.f32.partialorder %v2436_v57, %v584_v12  ;;  %v1020_v12 = vpop.f32.mrf.mxu2 }
 0x2ed   :  { %v588_v13 = vsel %vm586_vm8, %v2452_v0, 4 }
 0x2ee   :  { %v604_v14 = vsel %vm134_vm5, %v588_v13, 2147483647 }
 0x2ef   :  { %v606_v17 = vshra.s32 %v604_v14, 16  ;;  %v605_v44 = vand.u32 65535, %v604_v14  ;;  %v2108_v14 = vld [vmem:[%s3331_s8 + $0x18] sm:$0xff] }
 0x2f0   :  { %898 = vmatpush.bf16.msrb.mxu1 %v2108_v14 }
 0x2f1   :  { %v608_v18 = vcvt.s32.f32 %v606_v17  ;;  %v607_v47 = vcvt.s32.f32 %v605_v44 }
 0x2f3   :  { %609 = vmin.xlane.f32.xlu1 %v608_v18  ;;  %v137_v20 = vpop.xlane.xlu1 %136 }
 0x2f4   :  { %vm141_vm9 = vcmp.eq.f32.partialorder %v2441_v59, %v137_v20 }
 0x2f5   :  { %v143_v21 = vsel %vm141_vm9, %v2452_v0, 4 }
 0x2f6   :  { %v145_v23 = vsel %vm134_vm5, %v143_v21, 2147483647 }
 0x2f7   :  { %v147_v24 = vshra.s32 %v145_v23, 16  ;;  %v146_v51 = vand.u32 65535, %v145_v23 }
 0x2f9   :  { %v149_v26 = vcvt.s32.f32 %v147_v24  ;;  %v148_v56 = vcvt.s32.f32 %v146_v51 }
 0x2fb   :  { %165 = vmin.xlane.f32.xlu1 %v164_v25  ;;  %150 = vmin.xlane.f32.xlu2 %v149_v26 }
 0x321   :  { %v595_v62 = vpop.xlane.xlu0 %594 }
 0x322   :  { %vm596_vm13 = vcmp.eq.f32.partialorder %v2460_v7, %v595_v62  ;;  %v2520_v7 = vadd.f32 %v2402_v38, %v1020_v12 }
 0x323   :  { %v597_v2 = vsel %vm596_vm13, %v592_v1, inf }
 0x324   :  { %v1026_v13 = vsel %vm134_vm5, %v2520_v7, -inf }
 0x33e   :  { %v2527_v15 = vpop.f32.mrf.mxu0 }
 0x344   :  { %v2486_v31 = vpop.f32.mrf.mxu3 }
 0x346   :  { %v2531_v21 = vpop.f32.mrf.mxu0 }
 0x34c   :  { %v2492_v33 = vpop.f32.mrf.mxu3 }
 0x354   :  { %v1170_v34 = vpop.f32.mrf.mxu3 }
 0x355   :  { %v1171_v35 = vadd.f32 %v2364_v16, %v1170_v34 }
 0x357   :  { %v1175_v36 = vmax.f32 %v1171_v35, 0.0 }
 0x359   :  { %1177 = vst.msk [vmem:[#allocation4] sm:$0xff] %vm295_vm3, %v1175_v36 }
 0x35c   :  { %v1172_v39 = vpop.f32.mrf.mxu3 }
 0x35d   :  { %v1173_v40 = vadd.f32 %v2364_v16, %v1172_v39 }
 0x35f   :  { %v1176_v41 = vmax.f32 %v1173_v40, 0.0  ;;  %v601_v40 = vcvt.f32.s32 %v595_v62 }
 0x360   :  { %v1187_v5 = vld [vmem:[#allocation4] sm:$0xff] }
 0x361   :  { %1178 = vst.msk [vmem:[#allocation4 + $0x8] sm:$0xff] %vm295_vm3, %v1176_v41 }
 0x366   :  { %v610_v46 = vpop.xlane.xlu1 %609 }
 0x367   :  { %vm611_vm10 = vcmp.eq.f32.partialorder %v608_v18, %v610_v46 }
 0x368   :  { %v612_v48 = vsel %vm611_vm10, %v607_v47, inf  ;;  %v1188_v49 = vld [vmem:[#allocation4 + $0x8] sm:$0xff] }
 0x369   :  { %613 = vmin.xlane.f32.xlu1 %v612_v48  ;;  %v2498_v50 = vpack.c.bf16 %v1188_v49, %v1187_v5  ;;  %v2559_v48 = vadd.f32 %v2402_v38, %v1018_v3  ;;  %v602_v5 = vshll.u32 %v601_v40, 16 }
 0x36b   :  { %2033 = vmatmul.msk.bf16.vlgmr.msrb.gmra.mxu0 %vm322_vm4, %v2498_v50 }
 0x36e   :  { %v151_v53 = vpop.xlane.xlu2 %150  ;;  %v2502_v54 = vpop.xlane.xlu1 %165 }
 0x36f   :  { %vm152_vm11 = vcmp.eq.f32.partialorder %v149_v26, %v151_v53  ;;  %vm167_vm12 = vcmp.eq.f32.partialorder %v164_v25, %v2502_v54  ;;  %v157_v22 = vcvt.f32.s32 %v151_v53  ;;  %v172_v52 = vcvt.f32.s32 %v2502_v54 }
 0x370   :  { %v153_v60 = vsel %vm152_vm11, %v148_v56, inf  ;;  %v168_v61 = vsel %vm167_vm12, %v163_v58, inf  ;;  %v1023_v53 = vsel %vm134_vm5, %v2559_v48, -inf }
 0x371   :  { %154 = vmin.xlane.f32.xlu2 %v153_v60  ;;  %169 = vmin.xlane.f32.xlu0 %v168_v61  ;;  %v158_v32 = vshll.u32 %v157_v22, 16  ;;  %v173_v58 = vshll.u32 %v172_v52, 16  ;;  %v2110_v52 = vld [vmem:[%s3331_s8 + $0x8] sm:$0xff] }
 0x372   :  { %1256 = vmatpush.bf16.msra.mxu1 %v2110_v52 }
 0x379   :  { %598 = vmin.xlane.f32.xlu0 %v597_v2 }
 0x37b   :  { %2058 = vmatmul.msk.bf16.vlgmr.msra.gmra.mxu0 %vm112_vm2, %v2467_v11 }
 0x389   :  { %880 = vrot.lane.b32.xlu2 %v2423_v55, %s2233_s17  ;;  %v616_v55 = vcvt.f32.s32 %v610_v46 }
 0x38b   :  { %v617_v18 = vshll.u32 %v616_v55, 16 }
 0x3b2   :  { %1027 = vmax.xlane.f32.xlu2 %v1026_v13 }
 0x3dc   :  { %v614_v17 = vpop.xlane.xlu1 %613 }
 0x3dd   :  { %v615_v19 = vcvt.f32.s32 %v614_v17 }
 0x3df   :  { %v2529_v20 = vadd.s32 %v617_v18, %v615_v19 }
 0x3e1   :  { %vm620_vm14 = vcmp.eq.s32.totalorder %v2452_v0, %v2529_v20  ;;  %v2116_v20 = vld [vmem:[%s3331_s8 + $0x18] sm:$0xff] }
 0x3e2   :  { %v2539_v23 = vsel %vm620_vm14, -1e+30, %v2436_v57 }
 0x3e3   :  { %v626_v24 = vsel %vm134_vm5, %v2539_v23, -inf }
 0x3e4   :  { %v155_v25 = vpop.xlane.xlu2 %154  ;;  %v170_v26 = vpop.xlane.xlu0 %169  ;;  %627 = vmax.xlane.f32.xlu2 %v626_v24 }
 0x3e5   :  { %v156_v34 = vcvt.f32.s32 %v155_v25  ;;  %v171_v56 = vcvt.f32.s32 %v170_v26 }
 0x3e7   :  { %v2543_v35 = vadd.s32 %v158_v32, %v156_v34  ;;  %v2574_v62 = vadd.s32 %v173_v58, %v171_v56 }
 0x3e8   :  { %v2545_v36 = vpop.f32.mrf.mxu0 }
 0x3e9   :  { %vm175_vm15 = vcmp.eq.s32.totalorder %v2452_v0, %v2543_v35  ;;  %vm176_vm6 = vcmp.eq.s32.totalorder %v2452_v0, %v2574_v62 }
 0x3ea   :  { %v2553_v39 = vsel %vm175_vm15, -1e+30, %v2441_v59  ;;  %v2588_v2 = vsel %vm176_vm6, -1e+30, %v2415_v45 }
 0x3eb   :  { %v179_v41 = vsel %vm134_vm5, %v2553_v39, -inf  ;;  %v182_v3 = vsel %vm134_vm5, %v2588_v2, -inf }
 0x3ec   :  { %v881_v44 = vpop.permute.xlu2 %880  ;;  %180 = vmax.xlane.f32.xlu1 %v179_v41  ;;  %v599_v46 = vpop.xlane.xlu0 %598 }
 0x3ed   :  { %v600_v47 = vcvt.f32.s32 %v599_v46  ;;  %2026 = vmatmul.msk.bf16.vlgmr.msrb.gmra.mxu1 %vm322_vm4, %v881_v44 }
 0x3ee   :  { %1612 = vmatpush.bf16.msrb.mxu1 %v2340_v6 }
 0x3ef   :  { %v2563_v51 = vadd.s32 %v602_v5, %v600_v47 }
 0x3f0   :  { %v2561_v49 = vpop.f32.mrf.mxu0 }
 0x3f1   :  { %vm619_vm1 = vcmp.eq.s32.totalorder %v2452_v0, %v2563_v51 }
 0x3f2   :  { %v621_v61 = vsel %vm619_vm1, -1e+30, %v2410_v43 }
 0x3f3   :  { %v623_v54 = vsel %vm134_vm5, %v621_v61, -inf }
 0x3f4   :  { %1024 = vmax.xlane.f32.xlu1 %v1023_v53 }
 0x3f8   :  { %v1462_v60 = vpop.f32.mrf.mxu0 }
 0x3f9   :  { %v2577_v63 = vadd.f32 %v2402_v38, %v1462_v60 }
 0x3fb   :  { %v1467_v1 = vsel %vm134_vm5, %v2577_v63, -inf }
 0x3fc   :  { %624 = vmax.xlane.f32.xlu1 %v623_v54  ;;  %1468 = vmax.xlane.f32.xlu2 %v1467_v1 }
 0x400   :  { %v1464_v34 = vpop.f32.mrf.mxu0 }
 0x401   :  { %v2601_v40 = vadd.f32 %v2402_v38, %v1464_v34 }
 0x403   :  { %v1470_v46 = vsel %vm134_vm5, %v2601_v40, -inf }
 0x404   :  { %183 = vmax.xlane.f32.xlu2 %v182_v3 }
 0x425   :  { %v1028_v12 = vpop.xlane.xlu2 %1027 }
 0x426   :  { %vm1030_vm7 = vcmp.eq.f32.partialorder %v2520_v7, %v1028_v12 }
 0x427   :  { %v1032_v13 = vsel %vm1030_vm7, %v2452_v0, 4 }
 0x428   :  { %v1048_v14 = vsel %vm134_vm5, %v1032_v13, 2147483647 }
 0x429   :  { %v1050_v55 = vshra.s32 %v1048_v14, 16 }
 0x42b   :  { %v1052_v17 = vcvt.s32.f32 %v1050_v55 }
 0x42d   :  { %1053 = vmin.xlane.f32.xlu1 %v1052_v17 }
 0x45f   :  { %v181_v18 = vpop.xlane.xlu1 %180 }
 0x460   :  { %vm185_vm13 = vcmp.eq.f32.partialorder %v2553_v39, %v181_v18 }
 0x467   :  { %v1025_v19 = vpop.xlane.xlu1 %1024 }
 0x468   :  { %vm1029_vm8 = vcmp.eq.f32.partialorder %v2559_v48, %v1025_v19 }
 0x469   :  { %v1031_v22 = vsel %vm1029_vm8, %v2452_v0, 4 }
 0x46a   :  { %v1033_v24 = vsel %vm134_vm5, %v1031_v22, 2147483647 }
 0x46b   :  { %v1035_v25 = vshra.s32 %v1033_v24, 16  ;;  %v1034_v38 = vand.u32 65535, %v1033_v24 }
 0x46d   :  { %v1037_v26 = vcvt.s32.f32 %v1035_v25  ;;  %v1036_v56 = vcvt.s32.f32 %v1034_v38 }
 0x46f   :  { %1038 = vmin.xlane.f32.xlu0 %v1037_v26  ;;  %v625_v32 = vpop.xlane.xlu1 %624 }
 0x470   :  { %vm629_vm9 = vcmp.eq.f32.partialorder %v621_v61, %v625_v32  ;;  %v1049_v61 = vand.u32 65535, %v1048_v14 }
 0x471   :  { %v631_v41 = vsel %vm629_vm9, %v2452_v0, 4 }
 0x472   :  { %v633_v44 = vsel %vm134_vm5, %v631_v41, 2147483647  ;;  %v1051_v54 = vcvt.s32.f32 %v1049_v61 }
 0x473   :  { %v635_v47 = vshra.s32 %v633_v44, 16  ;;  %v634_v6 = vand.u32 65535, %v633_v44 }
 0x475   :  { %v637_v5 = vcvt.s32.f32 %v635_v47  ;;  %v636_v55 = vcvt.s32.f32 %v634_v6 }
 0x483   :  { %1238 = vrot.lane.b32.xlu0 %v2498_v50, %s2231_s4 }
 0x4a0   :  { %v1054_v60 = vpop.xlane.xlu1 %1053 }
 0x4a1   :  { %vm1055_vm11 = vcmp.eq.f32.partialorder %v1052_v17, %v1054_v60  ;;  %v628_v17 = vpop.xlane.xlu2 %627  ;;  %v1060_v32 = vcvt.f32.s32 %v1054_v60 }
 0x4a2   :  { %v1056_v1 = vsel %vm1055_vm11, %v1051_v54, inf  ;;  %vm630_vm11 = vcmp.eq.f32.partialorder %v2539_v23, %v628_v17 }
 0x4a3   :  { %v1061_v47 = vshll.u32 %v1060_v32, 16 }
 0x4a9   :  { %v1469_v34 = vpop.xlane.xlu2 %1468 }
 0x4aa   :  { %vm1473_vm8 = vcmp.eq.f32.partialorder %v2577_v63, %v1469_v34 }
 0x4ad   :  { %1471 = vmax.xlane.f32.xlu0 %v1470_v46  ;;  %v2629_v46 = vpop.f32.mrf.mxu1 }
 0x4b5   :  { %638 = vmin.xlane.f32.xlu0 %v637_v5 }
 0x4e2   :  { %v1039_v53 = vpop.xlane.xlu0 %1038 }
 0x4e3   :  { %vm1040_vm10 = vcmp.eq.f32.partialorder %v1037_v26, %v1039_v53  ;;  %v1045_v14 = vcvt.f32.s32 %v1039_v53  ;;  %v1475_v53 = vsel %vm1473_vm8, %v2452_v0, 4 }
 0x4e4   :  { %v1041_v58 = vsel %vm1040_vm10, %v1036_v56, inf  ;;  %v1477_v60 = vsel %vm134_vm5, %v1475_v53, 2147483647 }
 0x4e5   :  { %1042 = vmin.xlane.f32.xlu1 %v1041_v58  ;;  %v1046_v24 = vshll.u32 %v1045_v14, 16  ;;  %v1479_v54 = vshra.s32 %v1477_v60, 16 }
 0x4e7   :  { %v1481_v6 = vcvt.s32.f32 %v1479_v54 }
 0x4ed   :  { %1057 = vmin.xlane.f32.xlu1 %v1056_v1  ;;  %v2647_v1 = vpop.f32.mrf.mxu1 }
 0x4f5   :  { %v1239_v3 = vpop.permute.xlu0 %1238 }
 0x4f6   :  { %2041 = vmatmul.msk.bf16.vlgmr.msra.gmra.mxu1 %vm322_vm4, %v1239_v3 }
 0x4f7   :  { %1786 = vmatpush.bf16.msra.mxu1 %v2116_v20 }
 0x506   :  { %2059 = vmatmul.msk.bf16.vlgmr.msrb.gmra.mxu1 %vm112_vm2, %v2467_v11  ;;  %v187_v11 = vsel %vm185_vm13, %v2452_v0, 4 }
 0x507   :  { %v189_v44 = vsel %vm134_vm5, %v187_v11, 2147483647 }
 0x508   :  { %v191_v52 = vshra.s32 %v189_v44, 16 }
 0x50a   :  { %v193_v56 = vcvt.s32.f32 %v191_v52 }
 0x520   :  { %v1472_v12 = vpop.xlane.xlu0 %1471 }
 0x521   :  { %vm1474_vm10 = vcmp.eq.f32.partialorder %v2601_v40, %v1472_v12 }
 0x522   :  { %v1476_v3 = vsel %vm1474_vm10, %v2452_v0, 4 }
 0x528   :  { %v2614_v13 = vpop.xlane.xlu0 %638 }
 0x529   :  { %vm640_vm12 = vcmp.eq.f32.partialorder %v637_v5, %v2614_v13 }
 0x52a   :  { %v641_v19 = vsel %vm640_vm12, %v636_v55, inf  ;;  %v1492_v55 = vsel %vm134_vm5, %v1476_v3, 2147483647  ;;  %v190_v3 = vand.u32 65535, %v189_v44 }
 0x52b   :  { %642 = vmin.xlane.f32.xlu2 %v641_v19  ;;  %v1494_v19 = vshra.s32 %v1492_v55, 16  ;;  %v1493_v44 = vand.u32 65535, %v1492_v55 }
 0x558   :  { %v1043_v22 = vpop.xlane.xlu1 %1042 }
 0x559   :  { %v1044_v25 = vcvt.f32.s32 %v1043_v22  ;;  %v632_v22 = vsel %vm630_vm11, %v2452_v0, 4 }
 0x55a   :  { %v648_v12 = vsel %vm134_vm5, %v632_v22, 2147483647 }
 0x55b   :  { %v2618_v26 = vadd.s32 %v1046_v24, %v1044_v25  ;;  %v184_v24 = vpop.xlane.xlu2 %183  ;;  %v1496_v25 = vcvt.s32.f32 %v1494_v19  ;;  %v650_v11 = vshra.s32 %v648_v12, 16 }
 0x55c   :  { %vm186_vm12 = vcmp.eq.f32.partialorder %v2588_v2, %v184_v24 }
 0x55d   :  { %vm1063_vm7 = vcmp.eq.s32.totalorder %v2452_v0, %v2618_v26  ;;  %v188_v34 = vsel %vm186_vm12, %v2452_v0, 4 }
 0x55e   :  { %v1065_v41 = vsel %vm1063_vm7, -1e+30, %v2559_v48  ;;  %v204_v23 = vsel %vm134_vm5, %v188_v34, 2147483647 }
 0x55f   :  { %v1067_v39 = vsel %vm134_vm5, %v1065_v41, -inf  ;;  %v206_v17 = vshra.s32 %v204_v23, 16 }
 0x560   :  { %1068 = vmax.xlane.f32.xlu0 %v1067_v39  ;;  %v1058_v18 = vpop.xlane.xlu1 %1057  ;;  %v652_v39 = vcvt.s32.f32 %v650_v11  ;;  %v192_v11 = vcvt.s32.f32 %v190_v3 }
 0x561   :  { %v1059_v5 = vcvt.f32.s32 %v1058_v18  ;;  %v208_v52 = vcvt.s32.f32 %v206_v17 }
 0x563   :  { %v2632_v38 = vadd.s32 %v1061_v47, %v1059_v5 }
 0x565   :  { %vm1064_vm9 = vcmp.eq.s32.totalorder %v2452_v0, %v2632_v38 }
 0x566   :  { %v2641_v58 = vsel %vm1064_vm9, -1e+30, %v2520_v7 }
 0x567   :  { %v1070_v61 = vsel %vm134_vm5, %v2641_v58, -inf }
 0x568   :  { %194 = vmin.xlane.f32.xlu0 %v193_v56  ;;  %1071 = vmax.xlane.f32.xlu1 %v1070_v61 }
 0x570   :  { %1482 = vmin.xlane.f32.xlu1 %v1481_v6 }
 0x573   :  { %v2652_v14 = vpop.f32.mrf.mxu1 }
 0x578   :  { %1497 = vmin.xlane.f32.xlu1 %v1496_v25 }
 0x57b   :  { %v2657_v32 = vpop.f32.mrf.mxu1 }
 0x580   :  { %653 = vmin.xlane.f32.xlu1 %v652_v39 }
 0x583   :  { %v1614_v18 = vpop.f32.mrf.mxu1 }
 0x584   :  { %v1615_v47 = vadd.f32 %v2364_v16, %v1614_v18  ;;  %v1478_v18 = vand.u32 65535, %v1477_v60 }
 0x586   :  { %v1619_v5 = vmax.f32 %v1615_v47, 0.0 }
 0x588   :  { %1621 = vst.msk [vmem:[#allocation4] sm:$0xff] %vm295_vm3, %v1619_v5  ;;  %209 = vmin.xlane.f32.xlu1 %v208_v52  ;;  %v1480_v5 = vcvt.s32.f32 %v1478_v18 }
 0x58b   :  { %v1616_v53 = vpop.f32.mrf.mxu1 }
 0x58c   :  { %v1617_v2 = vadd.f32 %v2364_v16, %v1616_v53 }
 0x58e   :  { %v1620_v61 = vmax.f32 %v1617_v2, 0.0 }
 0x590   :  { %1622 = vst.msk [vmem:[#allocation4 + $0x8] sm:$0xff] %vm295_vm3, %v1620_v61  ;;  %v1495_v61 = vcvt.s32.f32 %v1493_v44 }
 0x5d3   :  { %v1069_v54 = vpop.xlane.xlu0 %1068 }
 0x5d4   :  { %vm1073_vm13 = vcmp.eq.f32.partialorder %v1065_v41, %v1069_v54  ;;  %v649_v54 = vand.u32 65535, %v648_v12 }
 0x5d5   :  { %v1075_v19 = vsel %vm1073_vm13, %v2452_v0, 4 }
 0x5d6   :  { %v1077_v34 = vsel %vm134_vm5, %v1075_v19, 2147483647  ;;  %v651_v19 = vcvt.s32.f32 %v649_v54 }
 0x5d7   :  { %v1079_v16 = vshra.s32 %v1077_v34, 16  ;;  %v1078_v54 = vand.u32 65535, %v1077_v34  ;;  %v2113_v34 = vld [vmem:[%s3331_s8] sm:$0xff] }
 0x5d9   :  { %v1081_v53 = vcvt.s32.f32 %v1079_v16 }
 0x5db   :  { %v2666_v22 = vpop.xlane.xlu0 %194  ;;  %v1072_v24 = vpop.xlane.xlu1 %1071 }
 0x5dc   :  { %vm196_vm8 = vcmp.eq.f32.partialorder %v193_v56, %v2666_v22  ;;  %vm1074_vm12 = vcmp.eq.f32.partialorder %v2641_v58, %v1072_v24  ;;  %v643_v58 = vpop.xlane.xlu2 %642  ;;  %v1632_v24 = vld [vmem:[#allocation4 + $0x8] sm:$0xff] }
 0x5dd   :  { %v197_v17 = vsel %vm196_vm8, %v192_v11, inf  ;;  %v205_v11 = vand.u32 65535, %v204_v23  ;;  %v645_v23 = vcvt.f32.s32 %v2614_v13 }
 0x5de   :  { %198 = vmin.xlane.f32.xlu2 %v197_v17 }
 0x5df   :  { %v207_v18 = vcvt.s32.f32 %v205_v11  ;;  %v646_v16 = vshll.u32 %v645_v23, 16  ;;  %v2114_v23 = vld [vmem:[%s3331_s8 + $0x8] sm:$0xff] }
 0x5e3   :  { %v2670_v47 = vpop.xlane.xlu1 %1482 }
 0x5e4   :  { %vm1484_vm3 = vcmp.eq.f32.partialorder %v1481_v6, %v2670_v47  ;;  %v1076_v6 = vsel %vm1074_vm12, %v2452_v0, 4 }
 0x5e5   :  { %v1485_v41 = vsel %vm1484_vm3, %v1480_v5, inf  ;;  %v2679_v55 = vsel %vm134_vm5, %v1076_v6, 2147483647  ;;  %v1631_v5 = vld [vmem:[#allocation4] sm:$0xff] }
 0x5e6   :  { %1082 = vmin.xlane.f32.xlu2 %v1081_v53  ;;  %1486 = vmin.xlane.f32.xlu1 %v1485_v41  ;;  %v1094_v12 = vshra.s32 %v2679_v55, 16  ;;  %v2690_v41 = vpack.c.bf16 %v1632_v24, %v1631_v5  ;;  %v1093_v62 = vand.u32 65535, %v2679_v55 }
 0x5eb   :  { %v1498_v2 = vpop.xlane.xlu1 %1497 }
 0x5ec   :  { %vm1499_vm10 = vcmp.eq.f32.partialorder %v1496_v25, %v1498_v2  ;;  %v1504_v6 = vcvt.f32.s32 %v1498_v2 }
 0x5ed   :  { %v1500_v56 = vsel %vm1499_vm10, %v1495_v61, inf  ;;  %v2112_v61 = vld [vmem:[%s3331_s8 + $0x18] sm:$0xff] }
 0x5ee   :  { %1501 = vmin.xlane.f32.xlu1 %v1500_v56  ;;  %1342 = vmatpush.bf16.msra.mxu3 %v2112_v61  ;;  %v2111_v56 = vld [vmem:[%s3331_s8 + $0x10] sm:$0xff] }
 0x5ef   :  { %1299 = vmatpush.bf16.msra.mxu2 %v2111_v56 }
 0x5f2   :  { %1700 = vmatpush.bf16.msrb.mxu3 %v2114_v23 }
 0x5f3   :  { %v654_v3 = vpop.xlane.xlu1 %653  ;;  %1656 = vmatpush.bf16.msrb.mxu2 %v2113_v34 }
 0x5f4   :  { %vm655_vm11 = vcmp.eq.f32.partialorder %v652_v39, %v654_v3  ;;  %v2684_v39 = vcvt.s32.f32 %v1094_v12  ;;  %v1505_v12 = vshll.u32 %v1504_v6, 16  ;;  %v660_v2 = vcvt.f32.s32 %v654_v3 }
 0x5f5   :  { %v656_v60 = vsel %vm655_vm11, %v651_v19, inf }
 0x5f6   :  { %657 = vmin.xlane.f32.xlu0 %v656_v60  ;;  %v1080_v60 = vcvt.s32.f32 %v1078_v54  ;;  %v2115_v54 = vld [vmem:[%s3331_s8 + $0x10] sm:$0xff]  ;;  %s2236_s8 = smov 8  }
 0x5f7   :  { %1743 = vmatpush.bf16.msrb.mxu0 %v2115_v54 }
 0x5fb   :  { %v2675_v17 = vpop.xlane.xlu1 %209 }
 0x5fc   :  { %vm211_vm13 = vcmp.eq.f32.partialorder %v208_v52, %v2675_v17  ;;  %v644_v52 = vcvt.f32.s32 %v643_v58 }
 0x5fd   :  { %v212_v25 = vsel %vm211_vm13, %v207_v18, inf }
 0x5fe   :  { %1324 = vrot.lane.b32.xlu2 %v2498_v50, %s2233_s17  ;;  %213 = vmin.xlane.f32.xlu0 %v212_v25  ;;  %v647_v44 = vadd.s32 %v646_v16, %v644_v52 }
 0x600   :  { %vm663_vm8 = vcmp.eq.s32.totalorder %v2452_v0, %v647_v44  ;;  %v661_v44 = vshll.u32 %v660_v2, 16 }
 0x601   :  { %vm665_vm3 = vmor %vm619_vm1, %vm663_vm8 }
 0x606   :  { %1097 = vmin.xlane.f32.xlu0 %v2684_v39 }
 0x607   :  { %1281 = vrot.lane.b32.xlu1 %v2498_v50, %s2232_s7  ;;  %v2701_v50 = vsel %vm665_vm3, %v2410_v43, -1e+30 }
 0x608   :  { %v669_v13 = vsel %vm134_vm5, %v2701_v50, -inf }
 0x61a   :  { %1682 = vrot.lane.b32.xlu0 %v2690_v41, %s2231_s4 }
 0x622   :  { %1725 = vrot.lane.b32.xlu0 %v2690_v41, %s2232_s7 }
 0x627   :  { %670 = vmax.xlane.f32.xlu2 %v669_v13 }
 0x62a   :  { %1768 = vrot.lane.b32.xlu0 %v2690_v41, %s2233_s17  ;;  %s1936_s17 = sshll.u32 %s3337_s14, 4  ;;  %s1937_s17 = int_to_ptr.hbm [resolvable:$true] %s1936_s17 }
 0x651   :  { %v199_v51 = vpop.xlane.xlu2 %198 }
 0x652   :  { %v200_v24 = vcvt.f32.s32 %v199_v51 }
 0x659   :  { %v2713_v43 = vpop.xlane.xlu2 %1082  ;;  %v1487_v19 = vpop.xlane.xlu1 %1486 }
 0x65a   :  { %vm1084_vm1 = vcmp.eq.f32.partialorder %v1081_v53, %v2713_v43  ;;  %v201_v53 = vcvt.f32.s32 %v2666_v22  ;;  %v1488_v23 = vcvt.f32.s32 %v1487_v19 }
 0x65b   :  { %v2716_v11 = vsel %vm1084_vm1, %v1080_v60, inf  ;;  %v216_v60 = vcvt.f32.s32 %v2675_v17 }
 0x65c   :  { %v202_v5 = vshll.u32 %v201_v53, 16 }
 0x65d   :  { %v217_v6 = vshll.u32 %v216_v60, 16 }
 0x65e   :  { %v203_v61 = vadd.s32 %v202_v5, %v200_v24 }
 0x660   :  { %vm219_vm12 = vcmp.eq.s32.totalorder %v2452_v0, %v203_v61 }
 0x661   :  { %v1325_v18 = vpop.permute.xlu2 %1324  ;;  %v1502_v25 = vpop.xlane.xlu1 %1501  ;;  %vm221_vm13 = vmor %vm175_vm15, %vm219_vm12 }
 0x662   :  { %v1503_v58 = vcvt.f32.s32 %v1502_v25  ;;  %2057 = vmatmul.msk.bf16.vlgmr.msra.gmra.mxu3 %vm322_vm4, %v1325_v18  ;;  %v223_v25 = vsel %vm221_vm13, %v2441_v59, -1e+30  ;;  %vm298_vm13 = vcmp.eq.s32.totalorder %v2452_v0, 0 }
 0x664   :  { %v2725_v52 = vadd.s32 %v1505_v12, %v1503_v58  ;;  %v1489_v12 = vcvt.f32.s32 %v2670_v47  ;;  %v225_v58 = vsel %vm134_vm5, %v223_v25, -inf  ;;  %v1095_v47 = vcvt.s32.f32 %v1093_v62 }
 0x666   :  { %v1490_v53 = vshll.u32 %v1489_v12, 16 }
 0x669   :  { %v658_v16 = vpop.xlane.xlu0 %657 }
 0x66a   :  { %v659_v13 = vcvt.f32.s32 %v658_v16 }
 0x66c   :  { %v662_v56 = vadd.s32 %v661_v44, %v659_v13 }
 0x66e   :  { %vm664_vm10 = vcmp.eq.s32.totalorder %v2452_v0, %v662_v56 }
 0x66f   :  { %vm666_vm11 = vmor %vm620_vm14, %vm664_vm10 }
 0x670   :  { %v668_v22 = vsel %vm666_vm11, %v2436_v57, -1e+30 }
 0x671   :  { %v214_v3 = vpop.xlane.xlu0 %213  ;;  %v672_v51 = vsel %vm134_vm5, %v668_v22, -inf }
 0x672   :  { %v215_v18 = vcvt.f32.s32 %v214_v3  ;;  %673 = vmax.xlane.f32.xlu1 %v672_v51 }
 0x674   :  { %v218_v17 = vadd.s32 %v217_v6, %v215_v18 }
 0x676   :  { %vm220_vm14 = vcmp.eq.s32.totalorder %v2452_v0, %v218_v17 }
 0x677   :  { %vm222_vm8 = vmor %vm176_vm6, %vm220_vm14 }
 0x678   :  { %v224_v57 = vsel %vm222_vm8, %v2415_v45, -1e+30  ;;  %v2760_v45 = vadd.s32 %v1490_v53, %v1488_v23 }
 0x679   :  { %v1282_v35 = vpop.permute.xlu1 %1281  ;;  %v228_v34 = vsel %vm134_vm5, %v224_v57, -inf  ;;  %v2754_v59 = vpop.xlane.xlu0 %1097 }
 0x67a   :  { %226 = vmax.xlane.f32.xlu1 %v225_v58  ;;  %229 = vmax.xlane.f32.xlu2 %v228_v34  ;;  %vm1099_vm15 = vcmp.eq.f32.partialorder %v2684_v39, %v2754_v59  ;;  %vm1507_vm6 = vcmp.eq.s32.totalorder %v2452_v0, %v2760_v45 }
 0x67b   :  { %2049 = vmatmul.msk.bf16.vlgmr.msra.gmra.mxu2 %vm322_vm4, %v1282_v35  ;;  %v1100_v2 = vsel %vm1099_vm15, %v1095_v47, inf  ;;  %v1509_v19 = vsel %vm1507_vm6, -1e+30, %v2577_v63 }
 0x67c   :  { %v1511_v24 = vsel %vm134_vm5, %v1509_v19, -inf }
 0x682   :  { %1101 = vmin.xlane.f32.xlu2 %v1100_v2 }
 0x68a   :  { %1512 = vmax.xlane.f32.xlu2 %v1511_v24 }
 0x68b   :  { %2064 = vmatmul.msk.bf16.vlgmr.msrb.gmra.mxu2 %vm322_vm4, %v2690_v41 }
 0x68c   :  { %v1683_v55 = vpop.permute.xlu0 %1682 }
 0x68d   :  { %2072 = vmatmul.msk.bf16.vlgmr.msrb.gmra.mxu3 %vm322_vm4, %v1683_v55 }
 0x694   :  { %v1726_v39 = vpop.permute.xlu0 %1725 }
 0x695   :  { %2080 = vmatmul.msk.bf16.vlgmr.msrb.gmra.mxu0 %vm322_vm4, %v1726_v39 }
 0x69a   :  { %v671_v16 = vpop.xlane.xlu2 %670 }
 0x69b   :  { %v675_v5 = vsub.f32 %v2701_v50, %v671_v16  ;;  %v1104_v16 = vcvt.f32.s32 %v2754_v59 }
 0x69c   :  { %v1769_v44 = vpop.permute.xlu0 %1768 }
 0x69d   :  { %v677_v13 = vmul.f32 1.442695, %v675_v5  ;;  %2088 = vmatmul.msk.bf16.vlgmr.msra.gmra.mxu1 %vm322_vm4, %v1769_v44  ;;  %vm1508_vm4 = vcmp.eq.s32.totalorder %v2452_v0, %v2725_v52 }
 0x69f   :  { %2152 = vpow2.f32 %v677_v13 }
 0x6a5   :  { %v2153_v61 = vpop.eup %2152 }
 0x6a6   :  { %v681_v56 = vsel %vm134_vm5, %v2153_v61, 0.0 }
 0x6a7   :  { %682 = vadd.xlane.f32.xlu1 %v681_v56 }
 0x6e5   :  { %v674_v54 = vpop.xlane.xlu1 %673 }
 0x6e6   :  { %v676_v41 = vsub.f32 %v668_v22, %v674_v54  ;;  %v2786_v22 = vsel %vm1508_vm4, -1e+30, %v2601_v40 }
 0x6e8   :  { %v679_v60 = vmul.f32 1.442695, %v676_v41  ;;  %v1105_v41 = vshll.u32 %v1104_v16, 16 }
 0x6ea   :  { %2154 = vpow2.f32 %v679_v60 }
 0x6ed   :  { %v230_v3 = vpop.xlane.xlu2 %229  ;;  %v227_v51 = vpop.xlane.xlu1 %226 }
 0x6ee   :  { %v231_v6 = vsub.f32 %v223_v25, %v227_v51  ;;  %v232_v17 = vsub.f32 %v224_v57, %v230_v3  ;;  %v1514_v57 = vsel %vm134_vm5, %v2786_v22, -inf }
 0x6f0   :  { %v2776_v18 = vpop.eup %2154  ;;  %v233_v50 = vmul.f32 1.442695, %v231_v6  ;;  %v235_v12 = vmul.f32 1.442695, %v232_v17 }
 0x6f1   :  { %v684_v20 = vsel %vm134_vm5, %v2776_v18, 0.0 }
 0x6f2   :  { %685 = vadd.xlane.f32.xlu0 %v684_v20  ;;  %2156 = vpow2.f32 %v233_v50 }
 0x6f3   :  { %2158 = vpow2.f32 %v235_v12 }
 0x6f5   :  { %v1102_v35 = vpop.xlane.xlu2 %1101 }
 0x6f6   :  { %v1103_v13 = vcvt.f32.s32 %v1102_v35 }
 0x6f8   :  { %v2788_v25 = vpop.eup %2156  ;;  %v1106_v3 = vadd.s32 %v1105_v41, %v1103_v13 }
 0x6f9   :  { %v237_v58 = vsel %vm134_vm5, %v2788_v25, 0.0  ;;  %v2794_v23 = vpop.eup %2158 }
 0x6fa   :  { %1515 = vmax.xlane.f32.xlu0 %v1514_v57  ;;  %238 = vadd.xlane.f32.xlu1 %v237_v58  ;;  %v240_v53 = vsel %vm134_vm5, %v2794_v23, 0.0  ;;  %vm1108_vm14 = vcmp.eq.s32.totalorder %v2452_v0, %v1106_v3 }
 0x6fb   :  { %vm1110_vm8 = vmor %vm1064_vm9, %vm1108_vm14 }
 0x6fc   :  { %v2817_v20 = vsel %vm1110_vm8, %v2520_v7, -1e+30  ;;  %vm391_vm8 = vcmp.eq.s32.totalorder %v2452_v0, 2 }
 0x6fd   :  { %v1513_v34 = vpop.xlane.xlu2 %1512  ;;  %v1116_v12 = vsel %vm134_vm5, %v2817_v20, -inf }
 0x6fe   :  { %vm1517_vm3 = vcmp.eq.f32.partialorder %v1509_v19, %v1513_v34 }
 0x6ff   :  { %v1519_v62 = vsel %vm1517_vm3, %v2452_v0, 4 }
 0x700   :  { %v2800_v47 = vsel %vm134_vm5, %v1519_v62, 2147483647 }
 0x701   :  { %v1523_v2 = vshra.s32 %v2800_v47, 16 }
 0x702   :  { %241 = vadd.xlane.f32.xlu0 %v240_v53  ;;  %1086 = vmin.xlane.f32.xlu1 %v2716_v11 }
 0x703   :  { %v2804_v24 = vcvt.s32.f32 %v1523_v2 }
 0x70a   :  { %1526 = vmin.xlane.f32.xlu1 %v2804_v24 }
 0x71a   :  { %v683_v55 = vpop.xlane.xlu1 %682 }
 0x71b   :  { %2160 = vrcp.f32 %v683_v55  ;;  %v698_v44 = vand.u32 2147483648, %v683_v55  ;;  %v696_v54 = vand.u32 2147483647, %v683_v55  ;;  %vm692_vm10 = vweird.f32 %v683_v55 }
 0x71d   :  { %v699_v60 = vor.u32 1.1754944e-38, %v698_v44  ;;  %vm697_vm12 = vcmp.eq.f32.partialorder %v696_v54, 8.507059e+37 }
 0x721   :  { %v2161_v19 = vpop.eup %2160 }
 0x722   :  { %v688_v39 = vmul.f32 %v2161_v19, %v683_v55  ;;  %vm693_vm1 = vweird.f32 %v2161_v19  ;;  %v1089_v55 = vcvt.f32.s32 %v2713_v43 }
 0x723   :  { %vm694_vm11 = vmor %vm692_vm10, %vm693_vm1  ;;  %vm344_vm10 = vcmp.eq.s32.totalorder %v2452_v0, 1 }
 0x724   :  { %v689_v5 = vsub.f32 1.0, %v688_v39  ;;  %v1090_v44 = vshll.u32 %v1089_v55, 16 }
 0x726   :  { %v690_v56 = vmul.f32 %v2161_v19, %v689_v5 }
 0x728   :  { %v691_v11 = vadd.f32 %v2161_v19, %v690_v56 }
 0x72a   :  { %v695_v51 = vsel %vm694_vm11, %v2161_v19, %v691_v11 }
 0x72b   :  { %v700_v6 = vsel %vm697_vm12, %v699_v60, %v695_v51 }
 0x72c   :  { %v701_v17 = vmul.f32 %v2153_v61, %v700_v6 }
 0x72e   :  { %v735_v59 = vsel %vm298_vm13, %v701_v17, 0.0  ;;  %v823_v26 = vsel %vm391_vm8, %v701_v17, 0.0 }
 0x72f   :  { %v737_v50 = vsel %vm134_vm5, %v735_v59, 0.0 }
 0x730   :  { %738 = vadd.xlane.f32.xlu2 %v737_v50 }
 0x738   :  { %1117 = vmax.xlane.f32.xlu2 %v1116_v12  ;;  %v825_v12 = vsel %vm134_vm5, %v823_v26, 0.0 }
 0x765   :  { %v686_v61 = vpop.xlane.xlu0 %685 }
 0x766   :  { %2162 = vrcp.f32 %v686_v61  ;;  %v713_v2 = vand.u32 2147483648, %v686_v61  ;;  %v711_v38 = vand.u32 2147483647, %v686_v61  ;;  %vm707_vm9 = vweird.f32 %v686_v61 }
 0x768   :  { %v714_v39 = vor.u32 1.1754944e-38, %v713_v2  ;;  %vm712_vm1 = vcmp.eq.f32.partialorder %v711_v38, 8.507059e+37 }
 0x76c   :  { %v2163_v35 = vpop.eup %2162 }
 0x76d   :  { %v703_v57 = vmul.f32 %v2163_v35, %v686_v61  ;;  %v1516_v58 = vpop.xlane.xlu0 %1515  ;;  %v2821_v34 = vpop.xlane.xlu1 %238  ;;  %vm708_vm15 = vweird.f32 %v2163_v35 }
 0x76e   :  { %vm709_vm3 = vmor %vm707_vm9, %vm708_vm15  ;;  %vm1518_vm14 = vcmp.eq.f32.partialorder %v2786_v22, %v1516_v58  ;;  %vm437_vm15 = vcmp.eq.s32.totalorder %v2452_v0, 3 }
 0x76f   :  { %v704_v62 = vsub.f32 1.0, %v703_v57  ;;  %v1520_v59 = vsel %vm1518_vm14, %v2452_v0, 4  ;;  %v866_v22 = vsel %vm437_vm15, %v701_v17, 0.0  ;;  %vm248_vm14 = vweird.f32 %v2821_v34 }
 0x770   :  { %v868_v61 = vsel %vm134_vm5, %v866_v22, 0.0 }
 0x771   :  { %v705_v53 = vmul.f32 %v2163_v35, %v704_v62 }
 0x773   :  { %v706_v7 = vadd.f32 %v2163_v35, %v705_v53 }
 0x775   :  { %v710_v19 = vsel %vm709_vm3, %v2163_v35, %v706_v7  ;;  %v242_v16 = vpop.xlane.xlu0 %241  ;;  %v1087_v5 = vpop.xlane.xlu1 %1086  ;;  %v779_v35 = vsel %vm344_vm10, %v701_v17, 0.0 }
 0x776   :  { %v1088_v13 = vcvt.f32.s32 %v1087_v5  ;;  %v715_v56 = vsel %vm712_vm1, %v714_v39, %v710_v19  ;;  %2164 = vrcp.f32 %v242_v16  ;;  %v781_v58 = vsel %vm134_vm5, %v779_v35, 0.0 }
 0x777   :  { %v716_v54 = vmul.f32 %v2776_v18, %v715_v56  ;;  %v269_v19 = vand.u32 2147483648, %v242_v16  ;;  %vm263_vm9 = vweird.f32 %v242_v16  ;;  %v267_v5 = vand.u32 2147483647, %v242_v16 }
 0x778   :  { %v1091_v41 = vadd.s32 %v1090_v44, %v1088_v13  ;;  %v1522_v13 = vand.u32 65535, %v2800_v47  ;;  %v2137_v47 = vld [vmem:[%s3332_s9] ss:$0 sm:$0xff] }
 0x779   :  { %v736_v43 = vsel %vm298_vm13, %v716_v54, 0.0  ;;  %v780_v11 = vsel %vm344_vm10, %v716_v54, 0.0  ;;  %v867_v53 = vsel %vm437_vm15, %v716_v54, 0.0  ;;  %v824_v7 = vsel %vm391_vm8, %v716_v54, 0.0 }
 0x77a   :  { %v740_v60 = vsel %vm134_vm5, %v736_v43, 0.0  ;;  %v784_v3 = vsel %vm134_vm5, %v780_v11, 0.0  ;;  %vm1107_vm11 = vcmp.eq.s32.totalorder %v2452_v0, %v1091_v41  ;;  %v871_v55 = vsel %vm134_vm5, %v867_v53, 0.0 }
 0x77b   :  { %741 = vadd.xlane.f32.xlu1 %v740_v60  ;;  %785 = vadd.xlane.f32.xlu2 %v784_v3  ;;  %vm1109_vm12 = vmor %vm1063_vm7, %vm1107_vm11  ;;  %v828_v39 = vsel %vm134_vm5, %v824_v7, 0.0  ;;  %v270_v41 = vor.u32 1.1754944e-38, %v269_v19  ;;  %vm268_vm1 = vcmp.eq.f32.partialorder %v267_v5, 8.507059e+37  ;;  %v1524_v54 = vcvt.s32.f32 %v1522_v13  ;;  %v2138_v19 = vld [vmem:[%s3332_s9 + $0x2] ss:$0 sm:$0xff] }
 0x77c   :  { %v2838_v18 = vsel %vm1109_vm12, %v2559_v48, -1e+30  ;;  %v2165_v51 = vpop.eup %2164  ;;  %v2850_v48 = vsel %vm134_vm5, %v1520_v59, 2147483647 }
 0x77d   :  { %v1113_v6 = vsel %vm134_vm5, %v2838_v18, -inf  ;;  %v259_v50 = vmul.f32 %v2165_v51, %v242_v16  ;;  %v1538_v62 = vshra.s32 %v2850_v48, 16  ;;  %vm264_vm7 = vweird.f32 %v2165_v51  ;;  %v2867_v44 = vpop.xlane.xlu1 %1526 }
 0x77e   :  { %1114 = vmax.xlane.f32.xlu0 %v1113_v6  ;;  %vm265_vm3 = vmor %vm263_vm9, %vm264_vm7  ;;  %vm1528_vm11 = vcmp.eq.f32.partialorder %v2804_v24, %v2867_v44  ;;  %v771_v24 = vadd.f32 %v2137_v47, %v2515_v9 }
 0x77f   :  { %v260_v57 = vsub.f32 1.0, %v259_v50  ;;  %v2860_v38 = vcvt.s32.f32 %v1538_v62  ;;  %v1529_v11 = vsel %vm1528_vm11, %v1524_v54, inf }
 0x781   :  { %v261_v2 = vmul.f32 %v2165_v51, %v260_v57  ;;  %v2139_v57 = vld [vmem:[%s3332_s9 + $0x1] ss:$0 sm:$0xff] }
 0x782   :  { %v817_v62 = vadd.f32 %v2139_v57, %v2492_v33 }
 0x783   :  { %826 = vadd.xlane.f32.xlu1 %v825_v12  ;;  %869 = vadd.xlane.f32.xlu2 %v868_v61  ;;  %v262_v17 = vadd.f32 %v2165_v51, %v261_v2 }
 0x785   :  { %v266_v56 = vsel %vm265_vm3, %v2165_v51, %v262_v17 }
 0x786   :  { %782 = vadd.xlane.f32.xlu0 %v781_v58  ;;  %v271_v43 = vsel %vm268_vm1, %v270_v41, %v266_v56  ;;  %v858_v41 = vadd.f32 %v2138_v19, %v2527_v15 }
 0x787   :  { %v2873_v60 = vmul.f32 %v2794_v23, %v271_v43  ;;  %v254_v43 = vand.u32 2147483648, %v2821_v34 }
 0x789   :  { %v300_v16 = vsel %vm298_vm13, %v2873_v60, 0.0  ;;  %v393_v51 = vsel %vm391_vm8, %v2873_v60, 0.0 }
 0x78a   :  { %v304_v3 = vsel %vm134_vm5, %v300_v16, 0.0  ;;  %v397_v59 = vsel %vm134_vm5, %v393_v51, 0.0 }
 0x78b   :  { %872 = vadd.xlane.f32.xlu1 %v871_v55  ;;  %1541 = vmin.xlane.f32.xlu2 %v2860_v38 }
 0x78e   :  { %829 = vadd.xlane.f32.xlu0 %v828_v39  ;;  %v2141_v39 = vld [vmem:[%s3332_s9 + $0x3] ss:$0 sm:$0xff] }
 0x78f   :  { %v901_v54 = vadd.f32 %v2141_v39, %v2629_v46  ;;  %v1537_v46 = vand.u32 65535, %v2850_v48 }
 0x796   :  { %1530 = vmin.xlane.f32.xlu0 %v1529_v11  ;;  %v252_v11 = vand.u32 2147483647, %v2821_v34 }
 0x798   :  { %vm253_vm9 = vcmp.eq.f32.partialorder %v252_v11, 8.507059e+37 }
 0x79e   :  { %305 = vadd.xlane.f32.xlu0 %v304_v3 }
 0x7a3   :  { %v739_v6 = vpop.xlane.xlu2 %738 }
 0x7a4   :  { %v775_v23 = vmul.f32 %v771_v24, %v739_v6  ;;  %v255_v6 = vor.u32 1.1754944e-38, %v254_v43 }
 0x7a6   :  { %398 = vadd.xlane.f32.xlu0 %v397_v59 }
 0x7ab   :  { %v1118_v26 = vpop.xlane.xlu2 %1117 }
 0x7ac   :  { %v1120_v22 = vsub.f32 %v2817_v20, %v1118_v26  ;;  %v773_v20 = vadd.f32 %v2137_v47, %v2517_v10 }
 0x7ae   :  { %v1123_v50 = vmul.f32 1.442695, %v1120_v22 }
 0x7b0   :  { %2166 = vpow2.f32 %v1123_v50 }
 0x7b1   :  { %2168 = vrcp.f32 %v2821_v34 }
 0x7b6   :  { %v2888_v12 = vpop.eup %2166 }
 0x7b7   :  { %v1128_v61 = vsel %vm134_vm5, %v2888_v12, 0.0  ;;  %v2169_v9 = vpop.eup %2168 }
 0x7b8   :  { %1129 = vadd.xlane.f32.xlu1 %v1128_v61  ;;  %v244_v35 = vmul.f32 %v2169_v9, %v2821_v34  ;;  %vm249_vm12 = vweird.f32 %v2169_v9 }
 0x7b9   :  { %vm250_vm7 = vmor %vm248_vm14, %vm249_vm12 }
 0x7ba   :  { %v245_v58 = vsub.f32 1.0, %v244_v35 }
 0x7bc   :  { %v246_v17 = vmul.f32 %v2169_v9, %v245_v58  ;;  %v1539_v58 = vcvt.s32.f32 %v1537_v46 }
 0x7be   :  { %v247_v10 = vadd.f32 %v2169_v9, %v246_v17 }
 0x7c0   :  { %v251_v51 = vsel %vm250_vm7, %v2169_v9, %v247_v10  ;;  %v860_v9 = vadd.f32 %v2138_v19, %v2531_v21 }
 0x7c1   :  { %v256_v26 = vsel %vm253_vm9, %v255_v6, %v251_v51 }
 0x7ee   :  { %v786_v53 = vpop.xlane.xlu2 %785  ;;  %v742_v2 = vpop.xlane.xlu1 %741 }
 0x7ef   :  { %v820_v55 = vmul.f32 %v817_v62, %v786_v53  ;;  %v776_v7 = vmul.f32 %v773_v20, %v742_v2  ;;  %v903_v62 = vadd.f32 %v2141_v39, %v2647_v1  ;;  %v346_v39 = vsel %vm344_vm10, %v2873_v60, 0.0 }
 0x7f1   :  { %v822_v5 = vadd.f32 %v820_v55, %v776_v7  ;;  %v1115_v13 = vpop.xlane.xlu0 %1114 }
 0x7f2   :  { %v1119_v56 = vsub.f32 %v2838_v18, %v1115_v13  ;;  %v815_v18 = vadd.f32 %v2139_v57, %v2486_v31  ;;  %v257_v31 = vmul.f32 %v2788_v25, %v256_v26 }
 0x7f4   :  { %v1121_v33 = vmul.f32 1.442695, %v1119_v56  ;;  %v345_v2 = vsel %vm344_vm10, %v257_v31, 0.0  ;;  %v438_v1 = vsel %vm437_vm15, %v257_v31, 0.0  ;;  %v392_v13 = vsel %vm391_vm8, %v257_v31, 0.0 }
 0x7f5   :  { %v347_v25 = vsel %vm134_vm5, %v345_v2, 0.0  ;;  %v440_v19 = vsel %vm134_vm5, %v438_v1, 0.0  ;;  %v394_v56 = vsel %vm134_vm5, %v392_v13, 0.0  ;;  %v1533_v1 = vcvt.f32.s32 %v2867_v44 }
 0x7f6   :  { %2170 = vpow2.f32 %v1121_v33  ;;  %v870_v16 = vpop.xlane.xlu2 %869  ;;  %v827_v3 = vpop.xlane.xlu1 %826 }
 0x7f7   :  { %v905_v47 = vmul.f32 %v901_v54, %v870_v16  ;;  %v862_v24 = vmul.f32 %v858_v41, %v827_v3  ;;  %v2133_v3 = vld [vmem:[%s3332_s9] ss:$0 sm:$0xff] }
 0x7f9   :  { %v783_v59 = vpop.xlane.xlu0 %782 }
 0x7fa   :  { %v819_v15 = vmul.f32 %v815_v18, %v783_v59  ;;  %v336_v59 = vadd.f32 %v2133_v3, %v2478_v27 }
 0x7fc   :  { %v2913_v22 = vpop.eup %2170  ;;  %v821_v50 = vadd.f32 %v819_v15, %v775_v23  ;;  %v2202_v15 = vld [vmem:[%s3332_s9 + $0x1] ss:$0 sm:$0xff] }
 0x7fd   :  { %v1125_v34 = vsel %vm134_vm5, %v2913_v22, 0.0  ;;  %v383_v46 = vadd.f32 %v2202_v15, %v2396_v37 }
 0x7fe   :  { %v864_v61 = vadd.f32 %v862_v24, %v821_v50  ;;  %v2917_v35 = vpop.xlane.xlu2 %1541  ;;  %1126 = vadd.xlane.f32.xlu2 %v1125_v34  ;;  %v873_v20 = vpop.xlane.xlu1 %872 }
 0x7ff   :  { %vm1543_vm3 = vcmp.eq.f32.partialorder %v2860_v38, %v2917_v35  ;;  %v906_v55 = vmul.f32 %v903_v62, %v873_v20  ;;  %v299_v38 = vsel %vm298_vm13, %v257_v31, 0.0 }
 0x800   :  { %v1544_v48 = vsel %vm1543_vm3, %v1539_v58, inf  ;;  %v2923_v57 = vadd.f32 %v905_v47, %v864_v61  ;;  %v301_v17 = vsel %vm134_vm5, %v299_v38, 0.0 }
 0x801   :  { %1545 = vmin.xlane.f32.xlu1 %v1544_v48  ;;  %v830_v23 = vpop.xlane.xlu0 %829 }
 0x802   :  { %v863_v53 = vmul.f32 %v860_v9, %v830_v23 }
 0x804   :  { %v865_v7 = vadd.f32 %v863_v53, %v822_v5  ;;  %v350_v5 = vsel %vm134_vm5, %v346_v39, 0.0 }
 0x806   :  { %348 = vadd.xlane.f32.xlu2 %v347_v25  ;;  %v2931_v21 = vadd.f32 %v906_v55, %v865_v7  ;;  %v338_v7 = vadd.f32 %v2133_v3, %v2480_v28  ;;  %v2134_v25 = vld [vmem:[%s3332_s9 + $0x2] ss:$0 sm:$0xff] }
 0x807   :  { %v431_v39 = vadd.f32 %v2134_v25, %v2511_v8 }
 0x809   :  { %302 = vadd.xlane.f32.xlu1 %v301_v17  ;;  %v2944_v41 = vpop.xlane.xlu0 %1530 }
 0x80e   :  { %441 = vadd.xlane.f32.xlu2 %v440_v19 }
 0x811   :  { %351 = vadd.xlane.f32.xlu1 %v350_v5  ;;  %v306_v51 = vpop.xlane.xlu0 %305  ;;  %v1532_v5 = vcvt.f32.s32 %v2944_v41 }
 0x812   :  { %v341_v13 = vmul.f32 %v338_v7, %v306_v51  ;;  %v1548_v7 = vcvt.f32.s32 %v2917_v35  ;;  %v2142_v35 = vld [vmem:[%s3332_s9 + $0x1] ss:$0 sm:$0xff] }
 0x819   :  { %395 = vadd.xlane.f32.xlu1 %v394_v56  ;;  %v399_v56 = vpop.xlane.xlu0 %398 }
 0x81a   :  { %v434_v3 = vmul.f32 %v431_v39, %v399_v56  ;;  %v1301_v56 = vpop.f32.mrf.mxu2 }
 0x82b   :  { %v1130_v10 = vpop.xlane.xlu1 %1129 }
 0x82c   :  { %2172 = vrcp.f32 %v1130_v10  ;;  %vm1151_vm12 = vweird.f32 %v1130_v10  ;;  %v1157_v20 = vand.u32 2147483648, %v1130_v10  ;;  %v1155_v23 = vand.u32 2147483647, %v1130_v10 }
 0x82e   :  { %v1158_v38 = vor.u32 1.1754944e-38, %v1157_v20 }
 0x832   :  { %v2173_v33 = vpop.eup %2172 }
 0x833   :  { %v1147_v54 = vmul.f32 %v2173_v33, %v1130_v10  ;;  %vm1152_vm1 = vweird.f32 %v2173_v33 }
 0x834   :  { %vm2956_vm14 = vmor %vm1151_vm12, %vm1152_vm1  ;;  %vm1156_vm1 = vcmp.eq.f32.partialorder %v1155_v23, 8.507059e+37 }
 0x835   :  { %v1148_v11 = vsub.f32 1.0, %v1147_v54 }
 0x837   :  { %v1149_v24 = vmul.f32 %v2173_v33, %v1148_v11  ;;  %v1534_v11 = vshll.u32 %v1533_v1, 16 }
 0x839   :  { %v1150_v50 = vadd.f32 %v2173_v33, %v1149_v24  ;;  %v2984_v24 = vld [vmem:[%s3332_s9 + $0x3] ss:$0 sm:$0xff] }
 0x83b   :  { %v1154_v2 = vsel %vm2956_vm14, %v2173_v33, %v1150_v50 }
 0x83c   :  { %v1159_v33 = vsel %vm1156_vm1, %v1158_v38, %v1154_v2  ;;  %v439_v2 = vsel %vm437_vm15, %v2873_v60, 0.0  ;;  %v1549_v38 = vshll.u32 %v1548_v7, 16 }
 0x871   :  { %v1127_v43 = vpop.xlane.xlu2 %1126 }
 0x872   :  { %2174 = vrcp.f32 %v1127_v43  ;;  %v1140_v34 = vand.u32 2147483647, %v1127_v43  ;;  %v1142_v61 = vand.u32 2147483648, %v1127_v43  ;;  %vm1136_vm7 = vweird.f32 %v1127_v43 }
 0x874   :  { %v2946_v16 = vpop.xlane.xlu1 %1545  ;;  %v1143_v53 = vor.u32 1.1754944e-38, %v1142_v61  ;;  %vm1141_vm3 = vcmp.eq.f32.partialorder %v1140_v34, 8.507059e+37  ;;  %v475_v34 = vadd.f32 %v2984_v24, %v2482_v29 }
 0x878   :  { %v2175_v47 = vpop.eup %2174 }
 0x879   :  { %v1132_v18 = vmul.f32 %v2175_v47, %v1127_v43  ;;  %v349_v6 = vpop.xlane.xlu2 %348  ;;  %vm1137_vm11 = vweird.f32 %v2175_v47 }
 0x87a   :  { %v387_v9 = vmul.f32 %v383_v46, %v349_v6  ;;  %vm1138_vm9 = vmor %vm1136_vm7, %vm1137_vm11  ;;  %v429_v6 = vadd.f32 %v2134_v25, %v2507_v4  ;;  %v1547_v25 = vcvt.f32.s32 %v2946_v16  ;;  %v1259_v16 = vadd.f32 %v2142_v35, %v2652_v14 }
 0x87b   :  { %v1133_v26 = vsub.f32 1.0, %v1132_v18  ;;  %v1535_v18 = vadd.s32 %v1534_v11, %v1532_v5  ;;  %v2143_v11 = vld [vmem:[%s3332_s9 + $0x3] ss:$0 sm:$0xff]  ;;  %vm1439_vm7 = vcmask 195712  }
 0x87c   :  { %v303_v58 = vpop.xlane.xlu1 %302 }
 0x87d   :  { %v1134_v31 = vmul.f32 %v2175_v47, %v1133_v26  ;;  %v340_v48 = vmul.f32 %v336_v59, %v303_v58  ;;  %vm1551_vm11 = vcmp.eq.s32.totalorder %v2452_v0, %v1535_v18 }
 0x87e   :  { %vm1553_vm12 = vmor %vm1507_vm6, %vm1551_vm11 }
 0x87f   :  { %v1135_v62 = vadd.f32 %v2175_v47, %v1134_v31  ;;  %v389_v37 = vadd.f32 %v387_v9, %v340_v48  ;;  %v3010_v23 = vsel %vm1553_vm12, %v2577_v63, -1e+30 }
 0x880   :  { %v1557_v45 = vsel %vm134_vm5, %v3010_v23, -inf }
 0x881   :  { %v1139_v55 = vsel %vm1138_vm9, %v2175_v47, %v1135_v62  ;;  %v442_v46 = vpop.xlane.xlu2 %441 }
 0x882   :  { %v1144_v17 = vsel %vm1141_vm3, %v1143_v53, %v1139_v55  ;;  %v479_v31 = vmul.f32 %v475_v34, %v442_v46  ;;  %v443_v55 = vsel %vm134_vm5, %v439_v2, 0.0 }
 0x883   :  { %v1145_v19 = vmul.f32 %v2913_v22, %v1144_v17  ;;  %v1550_v17 = vadd.s32 %v1549_v38, %v1547_v25 }
 0x884   :  { %v352_v10 = vpop.xlane.xlu1 %351 }
 0x885   :  { %v388_v28 = vmul.f32 %v2407_v42, %v352_v10  ;;  %v1267_v54 = vsel %vm391_vm8, %v1145_v19, 0.0  ;;  %v1223_v43 = vsel %vm344_vm10, %v1145_v19, 0.0  ;;  %v1179_v44 = vsel %vm298_vm13, %v1145_v19, 0.0  ;;  %v1344_v10 = vpop.f32.mrf.mxu3 }
 0x886   :  { %v1269_v22 = vsel %vm134_vm5, %v1267_v54, 0.0  ;;  %v1225_v8 = vsel %vm134_vm5, %v1223_v43, 0.0  ;;  %v1181_v41 = vsel %vm134_vm5, %v1179_v44, 0.0  ;;  %v1160_v42 = vmul.f32 %v2888_v12, %v1159_v33  ;;  %v483_v12 = vld [vmem:[%s3324_s1] sm:$0xff]  ;;  %v1303_v43 = vpop.f32.mrf.mxu2 }
 0x887   :  { %v390_v47 = vadd.f32 %v388_v28, %v341_v13  ;;  %1270 = vadd.xlane.f32.xlu2 %v1269_v22  ;;  %1226 = vadd.xlane.f32.xlu1 %v1225_v8  ;;  %v1310_v50 = vsel %vm437_vm15, %v1145_v19, 0.0  ;;  %v485_v9 = vmul.f32 0.7, %v483_v12  ;;  %vm1552_vm6 = vcmp.eq.s32.totalorder %v2452_v0, %v1550_v17  ;;  %v2145_v0 = vld [vmem:[%s3332_s9] ss:$0 sm:$0xff] }
 0x888   :  { %1182 = vadd.xlane.f32.xlu0 %v1181_v41  ;;  %v1268_v59 = vsel %vm391_vm8, %v1160_v42, 0.0  ;;  %v1180_v15 = vsel %vm298_vm13, %v1160_v42, 0.0  ;;  %v1312_v20 = vsel %vm134_vm5, %v1310_v50, 0.0  ;;  %v1311_v62 = vsel %vm437_vm15, %v1160_v42, 0.0  ;;  %vm1554_vm14 = vmor %vm1508_vm4, %vm1552_vm6 }
 0x889   :  { %v2986_v51 = vadd.f32 %v434_v3, %v390_v47  ;;  %v1272_v4 = vsel %vm134_vm5, %v1268_v59, 0.0  ;;  %v1184_v58 = vsel %vm134_vm5, %v1180_v15, 0.0  ;;  %v1315_v53 = vsel %vm134_vm5, %v1311_v62, 0.0 }
 0x88a   :  { %v3040_v60 = vsel %vm1554_vm14, %v2601_v40, -1e+30  ;;  %v1261_v22 = vadd.f32 %v2142_v35, %v2657_v32  ;;  %v477_v12 = vadd.f32 %v2984_v24, %v2484_v30  ;;  %vm995_vm4 = vcmask 130112  }
 0x88c   :  { %v396_v26 = vpop.xlane.xlu1 %395 }
 0x88d   :  { %v433_v61 = vmul.f32 %v429_v6, %v396_v26  ;;  %v1346_v8 = vpop.f32.mrf.mxu3 }
 0x88e   :  { %v1347_v6 = vadd.f32 %v2143_v11, %v1346_v8 }
 0x88f   :  { %v435_v48 = vadd.f32 %v433_v61, %v389_v37  ;;  %1273 = vadd.xlane.f32.xlu1 %v1272_v4  ;;  %1185 = vadd.xlane.f32.xlu2 %v1184_v58  ;;  %v1224_v37 = vsel %vm344_vm10, %v1160_v42, 0.0 }
 0x890   :  { %1313 = vadd.xlane.f32.xlu0 %v1312_v20  ;;  %v1228_v63 = vsel %vm134_vm5, %v1224_v37, 0.0  ;;  %v1345_v37 = vadd.f32 %v2143_v11, %v1344_v10 }
 0x891   :  { %v481_v29 = vadd.f32 %v479_v31, %v435_v48  ;;  %v3080_v48 = vld [vmem:[#allocation2] sm:$0xff] }
 0x893   :  { %v3007_v27 = vadd.f32 %v485_v9, %v481_v29 }
 0x895   :  { %554 = vst.msk [vmem:[%s3338_s15] sm:$0xff] %vm112_vm2, %v3007_v27 }
 0x897   :  { %1558 = vmax.xlane.f32.xlu1 %v1557_v45  ;;  %1316 = vadd.xlane.f32.xlu2 %v1315_v53 }
 0x898   :  { %1229 = vadd.xlane.f32.xlu0 %v1228_v63 }
 0x89c   :  { %v484_v46 = vld [vmem:[%s3324_s1 + $0x8] sm:$0xff] }
 0x89d   :  { %v486_v34 = vmul.f32 0.7, %v484_v46 }
 0x89f   :  { %444 = vadd.xlane.f32.xlu1 %v443_v55 }
 0x8ac   :  { %915 = vrot.lane.b32.xlu0 %v2923_v57, %s2236_s8  ;;  %v1560_v57 = vsel %vm134_vm5, %v3040_v60, -inf }
 0x8af   :  { %917 = vrot.lane.b32.xlu2 %v2931_v21, %s2236_s8  ;;  %v2140_v21 = vld [vmem:[%s3332_s9] ss:$0 sm:$0xff] }
 0x8b0   :  { %v1215_v52 = vadd.f32 %v2140_v21, %v2545_v36  ;;  %v1217_v44 = vadd.f32 %v2140_v21, %v2561_v49  ;;  %v2144_v36 = vld [vmem:[%s3332_s9 + $0x2] ss:$0 sm:$0xff] }
 0x8b1   :  { %v1304_v3 = vadd.f32 %v2144_v36, %v1303_v43  ;;  %v1302_v45 = vadd.f32 %v2144_v36, %v1301_v56 }
 0x8d8   :  { %1561 = vmax.xlane.f32.xlu2 %v1560_v57 }
 0x8fa   :  { %v1271_v1 = vpop.xlane.xlu2 %1270  ;;  %v1227_v19 = vpop.xlane.xlu1 %1226 }
 0x8fb   :  { %v1183_v40 = vpop.xlane.xlu0 %1182  ;;  %v1263_v39 = vmul.f32 %v1259_v16, %v1227_v19  ;;  %v1306_v63 = vmul.f32 %v1302_v45, %v1271_v1 }
 0x8fc   :  { %v1219_v5 = vmul.f32 %v1215_v52, %v1183_v40  ;;  %v3099_v52 = vld [vmem:[#allocation2 + $0x8] sm:$0xff] }
 0x8fe   :  { %v1265_v13 = vadd.f32 %v1263_v39, %v1219_v5 }
 0x900   :  { %v1308_v55 = vadd.f32 %v1306_v63, %v1265_v13 }
 0x902   :  { %v1274_v33 = vpop.xlane.xlu1 %1273  ;;  %v1186_v54 = vpop.xlane.xlu2 %1185 }
 0x903   :  { %v1314_v28 = vpop.xlane.xlu0 %1313  ;;  %v1220_v47 = vmul.f32 %v1217_v44, %v1186_v54  ;;  %v1307_v59 = vmul.f32 %v1304_v3, %v1274_v33 }
 0x904   :  { %v1349_v2 = vmul.f32 %v1345_v37, %v1314_v28 }
 0x906   :  { %v1351_v7 = vadd.f32 %v1349_v2, %v1308_v55 }
 0x90a   :  { %v1559_v14 = vpop.xlane.xlu1 %1558  ;;  %v1317_v18 = vpop.xlane.xlu2 %1316 }
 0x90b   :  { %v1230_v41 = vpop.xlane.xlu0 %1229  ;;  %v1350_v32 = vmul.f32 %v1347_v6, %v1317_v18  ;;  %v1563_v25 = vsub.f32 %v3010_v23, %v1559_v14 }
 0x90c   :  { %v1264_v42 = vmul.f32 %v1261_v22, %v1230_v41 }
 0x90d   :  { %v1565_v38 = vmul.f32 1.442695, %v1563_v25 }
 0x90e   :  { %v1266_v49 = vadd.f32 %v1264_v42, %v1220_v47 }
 0x90f   :  { %2176 = vpow2.f32 %v1565_v38 }
 0x910   :  { %v1309_v15 = vadd.f32 %v1307_v59, %v1266_v49 }
 0x912   :  { %v1352_v26 = vadd.f32 %v1350_v32, %v1309_v15  ;;  %v445_v50 = vpop.xlane.xlu1 %444  ;;  %v918_v62 = vpop.permute.xlu2 %917 }
 0x913   :  { %v480_v61 = vmul.f32 %v477_v12, %v445_v50 }
 0x914   :  { %1361 = vrot.lane.b32.xlu0 %v1352_v26, %s2237_s25 }
 0x915   :  { %v482_v4 = vadd.f32 %v480_v61, %v2986_v51  ;;  %v2177_v17 = vpop.eup %2176 }
 0x916   :  { %v1569_v57 = vsel %vm134_vm5, %v2177_v17, 0.0 }
 0x917   :  { %v3067_v58 = vadd.f32 %v486_v34, %v482_v4 }
 0x919   :  { %555 = vst.msk [vmem:[%s3338_s15 + $0x8] sm:$0xff] %vm112_vm2, %v3067_v58 }
 0x91e   :  { %v916_v31 = vpop.permute.xlu0 %915 }
 0x920   :  { %v909_v30 = vld [vmem:[%s3324_s1] sm:$0xff]  ;;  %v910_v51 = vld [vmem:[%s3324_s1 + $0x8] sm:$0xff] }
 0x921   :  { %v911_v24 = vmul.f32 0.7, %v909_v30  ;;  %v912_v29 = vmul.f32 0.7, %v910_v51 }
 0x923   :  { %v921_v9 = vadd.f32 %v916_v31, %v911_v24  ;;  %v922_v53 = vadd.f32 %v918_v62, %v912_v29 }
 0x925   :  { %v3083_v20 = vsub.f32 %v3080_v48, %v921_v9  ;;  %998 = vst.msk [vmem:[%s3338_s15] sm:$0xff] %vm995_vm4, %v921_v9  ;;  %v3102_v1 = vsub.f32 %v3099_v52, %v922_v53 }
 0x926   :  { %999 = vst.msk [vmem:[%s3338_s15 + $0x8] sm:$0xff] %vm995_vm4, %v922_v53 }
 0x927   :  { %927 = vrot.lane.b32.xlu1 %v3083_v20, %s2234_s18 }
 0x92f   :  { %1359 = vrot.lane.b32.xlu1 %v1351_v7, %s2237_s25 }
 0x93e   :  { %1570 = vadd.xlane.f32.xlu0 %v1569_v57 }
 0x94b   :  { %v1562_v35 = vpop.xlane.xlu2 %1561 }
 0x94c   :  { %v1564_v21 = vsub.f32 %v3040_v60, %v1562_v35  ;;  %v1354_v60 = vld [vmem:[%s3324_s1 + $0x8] sm:$0xff] }
 0x94d   :  { %v1356_v40 = vmul.f32 0.7, %v1354_v60  ;;  %v1702_v60 = vpop.f32.mrf.mxu3 }
 0x94e   :  { %v1567_v16 = vmul.f32 1.442695, %v1564_v21 }
 0x950   :  { %2178 = vpow2.f32 %v1567_v16 }
 0x952   :  { %929 = vrot.lane.b32.xlu0 %v3102_v1, %s2234_s18 }
 0x956   :  { %v3106_v23 = vpop.eup %2178 }
 0x957   :  { %v1572_v19 = vsel %vm134_vm5, %v3106_v23, 0.0 }
 0x958   :  { %1573 = vadd.xlane.f32.xlu2 %v1572_v19  ;;  %v2146_v19 = vld [vmem:[%s3332_s9 + $0x1] ss:$0 sm:$0xff] }
 0x986   :  { %v1362_v39 = vpop.permute.xlu0 %1361 }
 0x987   :  { %v3113_v5 = vadd.f32 %v1362_v39, %v1356_v40  ;;  %v2147_v39 = vld [vmem:[%s3332_s9 + $0x2] ss:$0 sm:$0xff] }
 0x989   :  { %1443 = vst.msk [vmem:[%s3338_s15 + $0x8] sm:$0xff] %vm1439_vm7, %v3113_v5  ;;  %v3162_v35 = vsub.f32 %v3099_v52, %v3113_v5  ;;  %v1745_v5 = vpop.f32.mrf.mxu0 }
 0x990   :  { %v1353_v56 = vld [vmem:[%s3324_s1] sm:$0xff] }
 0x991   :  { %v1355_v10 = vmul.f32 0.7, %v1353_v56 }
 0x999   :  { %v3120_v13 = vpop.permute.xlu1 %927 }
 0x99a   :  { %v933_v21 = vsel %vm112_vm2, %v3120_v13, 0.0 }
 0x9a1   :  { %v1360_v33 = vpop.permute.xlu1 %1359 }
 0x9a2   :  { %v1365_v28 = vadd.f32 %v1360_v33, %v1355_v10  ;;  %v1703_v10 = vadd.f32 %v2146_v19, %v1702_v60  ;;  %v2148_v33 = vld [vmem:[%s3332_s9 + $0x3] ss:$0 sm:$0xff] }
 0x9a4   :  { %v3126_v54 = vsub.f32 %v3080_v48, %v1365_v28  ;;  %1442 = vst.msk [vmem:[%s3338_s15] sm:$0xff] %vm1439_vm7, %v1365_v28  ;;  %v1788_v28 = vpop.f32.mrf.mxu1 }
 0x9a6   :  { %1371 = vrot.lane.b32.xlu2 %v3126_v54, %s2231_s4 }
 0x9b1   :  { %v1571_v43 = vpop.xlane.xlu0 %1570 }
 0x9b2   :  { %2180 = vrcp.f32 %v1571_v43  ;;  %v1586_v14 = vand.u32 2147483648, %v1571_v43  ;;  %v1584_v41 = vand.u32 2147483647, %v1571_v43  ;;  %vm1580_vm3 = vweird.f32 %v1571_v43 }
 0x9b4   :  { %v1587_v3 = vor.u32 1.1754944e-38, %v1586_v14  ;;  %vm1585_vm11 = vcmp.eq.f32.partialorder %v1584_v41, 8.507059e+37  ;;  %v1789_v14 = vadd.f32 %v2148_v33, %v1788_v28 }
 0x9b8   :  { %v2181_v44 = vpop.eup %2180 }
 0x9b9   :  { %v1576_v22 = vmul.f32 %v2181_v44, %v1571_v43  ;;  %vm1581_vm9 = vweird.f32 %v2181_v44 }
 0x9ba   :  { %vm1582_vm1 = vmor %vm1580_vm3, %vm1581_vm9 }
 0x9bb   :  { %v1577_v36 = vsub.f32 1.0, %v1576_v22 }
 0x9bd   :  { %v1578_v8 = vmul.f32 %v2181_v44, %v1577_v36 }
 0x9bf   :  { %v1579_v11 = vadd.f32 %v2181_v44, %v1578_v8 }
 0x9c1   :  { %v1583_v47 = vsel %vm1582_vm1, %v2181_v44, %v1579_v11  ;;  %v1746_v44 = vadd.f32 %v2147_v39, %v1745_v5 }
 0x9c2   :  { %v1588_v42 = vsel %vm1585_vm11, %v1587_v3, %v1583_v47 }
 0x9c3   :  { %v1589_v18 = vmul.f32 %v2177_v17, %v1588_v42 }
 0x9c4   :  { %v930_v25 = vpop.permute.xlu0 %929 }
 0x9c5   :  { %v1623_v6 = vsel %vm298_vm13, %v1589_v18, 0.0  ;;  %v1711_v59 = vsel %vm391_vm8, %v1589_v18, 0.0  ;;  %v1667_v32 = vsel %vm344_vm10, %v1589_v18, 0.0  ;;  %v1754_v26 = vsel %vm437_vm15, %v1589_v18, 0.0 }
 0x9c6   :  { %v1625_v49 = vsel %vm134_vm5, %v1623_v6, 0.0  ;;  %v1713_v15 = vsel %vm134_vm5, %v1711_v59, 0.0  ;;  %v1669_v46 = vsel %vm134_vm5, %v1667_v32, 0.0  ;;  %v1756_v50 = vsel %vm134_vm5, %v1754_v26, 0.0  ;;  %v1704_v6 = vpop.f32.mrf.mxu3 }
 0x9c7   :  { %1626 = vadd.xlane.f32.xlu1 %v1625_v49  ;;  %1714 = vadd.xlane.f32.xlu0 %v1713_v15  ;;  %v936_v17 = vsel %vm112_vm2, %v930_v25, 0.0  ;;  %v1705_v49 = vadd.f32 %v2146_v19, %v1704_v6 }
 0x9cb   :  { %v1574_v12 = vpop.xlane.xlu2 %1573 }
 0x9cc   :  { %2182 = vrcp.f32 %v1574_v12  ;;  %v1601_v30 = vand.u32 2147483648, %v1574_v12  ;;  %v1599_v31 = vand.u32 2147483647, %v1574_v12  ;;  %vm1595_vm6 = vweird.f32 %v1574_v12 }
 0x9ce   :  { %v1602_v51 = vor.u32 1.1754944e-38, %v1601_v30  ;;  %vm1600_vm9 = vcmp.eq.f32.partialorder %v1599_v31, 8.507059e+37 }
 0x9cf   :  { %1670 = vadd.xlane.f32.xlu2 %v1669_v46  ;;  %1757 = vadd.xlane.f32.xlu0 %v1756_v50  ;;  %v1747_v50 = vpop.f32.mrf.mxu0 }
 0x9d2   :  { %v2183_v34 = vpop.eup %2182 }
 0x9d3   :  { %v1591_v61 = vmul.f32 %v2183_v34, %v1574_v12  ;;  %vm1596_vm12 = vweird.f32 %v2183_v34 }
 0x9d4   :  { %vm1597_vm14 = vmor %vm1595_vm6, %vm1596_vm12 }
 0x9d5   :  { %v1592_v4 = vsub.f32 1.0, %v1591_v61  ;;  %v1748_v61 = vadd.f32 %v2147_v39, %v1747_v50 }
 0x9d7   :  { %v1593_v24 = vmul.f32 %v2183_v34, %v1592_v4 }
 0x9d9   :  { %v1594_v9 = vadd.f32 %v2183_v34, %v1593_v24 }
 0x9db   :  { %v1598_v29 = vsel %vm1597_vm14, %v2183_v34, %v1594_v9  ;;  %v1790_v34 = vpop.f32.mrf.mxu1 }
 0x9dc   :  { %v1603_v62 = vsel %vm1600_vm9, %v1602_v51, %v1598_v29  ;;  %v1791_v30 = vadd.f32 %v2148_v33, %v1790_v34 }
 0x9dd   :  { %v1604_v37 = vmul.f32 %v3106_v23, %v1603_v62  ;;  %v1658_v23 = vpop.f32.mrf.mxu2  ;;  %v2239_v62 = vmov 8.0  }
 0x9de   :  { %v1659_v56 = vadd.f32 %v2145_v0, %v1658_v23  ;;  %2184 = vrcp.f32 %v2239_v62 }
 0x9df   :  { %v1668_v45 = vsel %vm344_vm10, %v1604_v37, 0.0  ;;  %v1624_v53 = vsel %vm298_vm13, %v1604_v37, 0.0  ;;  %v1712_v63 = vsel %vm391_vm8, %v1604_v37, 0.0  ;;  %v1755_v38 = vsel %vm437_vm15, %v1604_v37, 0.0 }
 0x9e0   :  { %v1672_v2 = vsel %vm134_vm5, %v1668_v45, 0.0  ;;  %v1628_v55 = vsel %vm134_vm5, %v1624_v53, 0.0  ;;  %v1716_v7 = vsel %vm134_vm5, %v1712_v63, 0.0  ;;  %v1759_v57 = vsel %vm134_vm5, %v1755_v38, 0.0 }
 0x9e1   :  { %1673 = vadd.xlane.f32.xlu1 %v1672_v2  ;;  %1629 = vadd.xlane.f32.xlu0 %v1628_v55  ;;  %v3186_v45 = vsub.f32 %v3099_v52, %v3067_v58  ;;  %v489_v55 = vsub.f32 %v3080_v48, %v3007_v27  ;;  %vm1883_vm13 = vcmask 261312  }
 0x9e2   :  { %1717 = vadd.xlane.f32.xlu2 %v1716_v7 }
 0x9e3   :  { %v494_v2 = vsel %vm112_vm2, %v3186_v45, 0.0  ;;  %v491_v25 = vsel %vm112_vm2, %v489_v55, 0.0 }
 0x9e4   :  { %v2185_v63 = vpop.eup %2184 }
 0x9e5   :  { %v1660_v18 = vpop.f32.mrf.mxu2  ;;  %v498_v7 = vmul.f32 8.0, %v2185_v63  ;;  %vm502_vm5 = vweird.f32 %v2185_v63 }
 0x9e6   :  { %v1661_v59 = vadd.f32 %v2145_v0, %v1660_v18 }
 0x9e7   :  { %v499_v38 = vsub.f32 1.0, %v498_v7 }
 0x9e9   :  { %937 = vadd.xlane.f32.xlu0 %v936_v17  ;;  %v500_v17 = vmul.f32 %v2185_v63, %v499_v38 }
 0x9ea   :  { %1760 = vadd.xlane.f32.xlu2 %v1759_v57 }
 0x9eb   :  { %v501_v57 = vadd.f32 %v2185_v63, %v500_v17 }
 0x9ed   :  { %v3194_v58 = vsel %vm502_vm5, %v2185_v63, %v501_v57 }
 0x9fa   :  { %1373 = vrot.lane.b32.xlu1 %v3162_v35, %s2231_s4 }
 0xa00   :  { %v3168_v16 = vpop.permute.xlu2 %1371 }
 0xa01   :  { %v1377_v19 = vsel %vm112_vm2, %v3168_v16, 0.0 }
 0xa24   :  { %934 = vadd.xlane.f32.xlu1 %v933_v21 }
 0xa3a   :  { %v1715_v40 = vpop.xlane.xlu0 %1714  ;;  %v1627_v13 = vpop.xlane.xlu1 %1626 }
 0xa3b   :  { %v1663_v22 = vmul.f32 %v1659_v56, %v1627_v13  ;;  %v1750_v8 = vmul.f32 %v1746_v44, %v1715_v40  ;;  %v1798_v13 = vld [vmem:[%s3324_s1 + $0x8] sm:$0xff] }
 0xa3c   :  { %v1800_v33 = vmul.f32 0.7, %v1798_v13 }
 0xa42   :  { %v1671_v43 = vpop.xlane.xlu2 %1670  ;;  %v1758_v11 = vpop.xlane.xlu0 %1757 }
 0xa43   :  { %v1707_v36 = vmul.f32 %v1703_v10, %v1671_v43  ;;  %v1793_v47 = vmul.f32 %v1789_v14, %v1758_v11 }
 0xa45   :  { %v1709_v41 = vadd.f32 %v1707_v36, %v1663_v22 }
 0xa47   :  { %v1752_v3 = vadd.f32 %v1750_v8, %v1709_v41 }
 0xa49   :  { %v1795_v42 = vadd.f32 %v1793_v47, %v1752_v3 }
 0xa4b   :  { %1803 = vrot.lane.b32.xlu0 %v1795_v42, %s2238_s28 }
 0xa54   :  { %v1630_v15 = vpop.xlane.xlu0 %1629  ;;  %v1674_v32 = vpop.xlane.xlu1 %1673 }
 0xa55   :  { %v1718_v46 = vpop.xlane.xlu2 %1717  ;;  %v1664_v12 = vmul.f32 %v1661_v59, %v1630_v15  ;;  %v1708_v26 = vmul.f32 %v1705_v49, %v1674_v32 }
 0xa56   :  { %v1751_v24 = vmul.f32 %v1748_v61, %v1718_v46 }
 0xa57   :  { %v1710_v4 = vadd.f32 %v1708_v26, %v1664_v12 }
 0xa59   :  { %v1753_v9 = vadd.f32 %v1751_v24, %v1710_v4 }
 0xa5c   :  { %v938_v21 = vpop.xlane.xlu0 %937 }
 0xa5d   :  { %v1761_v31 = vpop.xlane.xlu2 %1760  ;;  %v940_v0 = vmul.f32 %v938_v21, %v3194_v58 }
 0xa5e   :  { %v1794_v51 = vmul.f32 %v1791_v30, %v1761_v31  ;;  %v2149_v30 = vld [vmem:[%s3333_s10] ss:$0 sm:$0xff] }
 0xa5f   :  { %v3198_v23 = vsub.f32 %v3102_v1, %v940_v0  ;;  %v1797_v1 = vld [vmem:[%s3324_s1] sm:$0xff] }
 0xa60   :  { %v1796_v29 = vadd.f32 %v1794_v51, %v1753_v9  ;;  %v1799_v16 = vmul.f32 0.7, %v1797_v1  ;;  %v2150_v0 = vld [vmem:[%s3334_s11] ss:$0 sm:$0xff] }
 0xa61   :  { %v944_v27 = vmul.f32 %v3198_v23, %v3198_v23 }
 0xa62   :  { %1805 = vrot.lane.b32.xlu2 %v1796_v29, %s2238_s28 }
 0xa6c   :  { %v1374_v37 = vpop.permute.xlu1 %1373 }
 0xa6d   :  { %v1380_v53 = vsel %vm112_vm2, %v1374_v37, 0.0 }
 0xa6e   :  { %1381 = vadd.xlane.f32.xlu1 %v1380_v53 }
 0xa75   :  { %495 = vadd.xlane.f32.xlu0 %v494_v2 }
 0xa76   :  { %492 = vadd.xlane.f32.xlu1 %v491_v25 }
 0xa8b   :  { %1378 = vadd.xlane.f32.xlu2 %v1377_v19 }
 0xa8f   :  { %949 = vrot.lane.b32.xlu1 %v944_v27, %s2234_s18 }
 0xa97   :  { %v935_v60 = vpop.xlane.xlu1 %934 }
 0xa98   :  { %v939_v40 = vmul.f32 %v935_v60, %v3194_v58 }
 0xa9a   :  { %v3207_v39 = vsub.f32 %v3083_v20, %v939_v40 }
 0xa9c   :  { %v943_v5 = vmul.f32 %v3207_v39, %v3207_v39 }
 0xaa3   :  { %947 = vrot.lane.b32.xlu2 %v943_v5, %s2234_s18 }
 0xabc   :  { %v1806_v28 = vpop.permute.xlu2 %1805 }
 0xabd   :  { %v1804_v56 = vpop.permute.xlu0 %1803  ;;  %v1810_v43 = vadd.f32 %v1806_v28, %v1800_v33 }
 0xabe   :  { %v1809_v10 = vadd.f32 %v1804_v56, %v1799_v16 }
 0xabf   :  { %v1812_v44 = vsub.f32 %v3099_v52, %v1810_v43  ;;  %1887 = vst.msk [vmem:[%s3338_s15 + $0x8] sm:$0xff] %vm1883_vm13, %v1810_v43 }
 0xac0   :  { %v3219_v20 = vsub.f32 %v3080_v48, %v1809_v10  ;;  %1886 = vst.msk [vmem:[%s3338_s15] sm:$0xff] %vm1883_vm13, %v1809_v10 }
 0xac1   :  { %1817 = vrot.lane.b32.xlu2 %v1812_v44, %s2235_s5 }
 0xac2   :  { %1815 = vrot.lane.b32.xlu0 %v3219_v20, %s2235_s5 }
 0xae1   :  { %v1382_v48 = vpop.xlane.xlu1 %1381 }
 0xae2   :  { %v1384_v22 = vmul.f32 %v1382_v48, %v3194_v58 }
 0xae4   :  { %v3235_v36 = vsub.f32 %v3162_v35, %v1384_v22 }
 0xae6   :  { %v1388_v14 = vmul.f32 %v3235_v36, %v3235_v36 }
 0xae8   :  { %1393 = vrot.lane.b32.xlu2 %v1388_v14, %s2231_s4  ;;  %v496_v15 = vpop.xlane.xlu0 %495 }
 0xae9   :  { %v493_v41 = vpop.xlane.xlu1 %492  ;;  %v505_v46 = vmul.f32 %v3194_v58, %v496_v15 }
 0xaea   :  { %v504_v47 = vmul.f32 %v3194_v58, %v493_v41 }
 0xaeb   :  { %v507_v26 = vsub.f32 %v3186_v45, %v505_v46 }
 0xaec   :  { %v506_v18 = vsub.f32 %v489_v55, %v504_v47 }
 0xaed   :  { %v509_v50 = vmul.f32 %v507_v26, %v507_v26 }
 0xaee   :  { %v508_v6 = vmul.f32 %v506_v18, %v506_v18 }
 0xaef   :  { %v513_v34 = vsel %vm112_vm2, %v509_v50, 0.0 }
 0xaf0   :  { %v510_v59 = vsel %vm112_vm2, %v508_v6, 0.0 }
 0xafe   :  { %v1379_v8 = vpop.xlane.xlu2 %1378 }
 0xaff   :  { %v1383_v52 = vmul.f32 %v1379_v8, %v3194_v58 }
 0xb01   :  { %v3242_v11 = vsub.f32 %v3126_v54, %v1383_v52  ;;  %v950_v32 = vpop.permute.xlu1 %949 }
 0xb02   :  { %v956_v12 = vsel %vm112_vm2, %v950_v32, 0.0 }
 0xb03   :  { %v1387_v3 = vmul.f32 %v3242_v11, %v3242_v11 }
 0xb05   :  { %1391 = vrot.lane.b32.xlu0 %v1387_v3, %s2231_s4 }
 0xb06   :  { %v948_v35 = vpop.permute.xlu2 %947 }
 0xb07   :  { %v953_v42 = vsel %vm112_vm2, %v948_v35, 0.0 }
 0xb08   :  { %954 = vadd.xlane.f32.xlu1 %v953_v42 }
 0xb11   :  { %511 = vadd.xlane.f32.xlu2 %v510_v59 }
 0xb1b   :  { %v1818_v49 = vpop.permute.xlu2 %1817 }
 0xb1c   :  { %v1824_v54 = vsel %vm112_vm2, %v1818_v49, 0.0 }
 0xb1d   :  { %1825 = vadd.xlane.f32.xlu2 %v1824_v54 }
 0xb25   :  { %957 = vadd.xlane.f32.xlu2 %v956_v12 }
 0xb2f   :  { %514 = vadd.xlane.f32.xlu0 %v513_v34 }
 0xb34   :  { %v1816_v61 = vpop.permute.xlu0 %1815 }
 0xb35   :  { %v1821_v4 = vsel %vm112_vm2, %v1816_v61, 0.0 }
 0xb37   :  { %1822 = vadd.xlane.f32.xlu0 %v1821_v4 }
 0xb3d   :  { %1429 = vrot.lane.b32.xlu2 %v2149_v30, %s2237_s25 }
 0xb42   :  { %v1394_v9 = vpop.permute.xlu2 %1393 }
 0xb43   :  { %v1400_v52 = vsel %vm112_vm2, %v1394_v9, 0.0 }
 0xb77   :  { %v1392_v24 = vpop.permute.xlu0 %1391 }
 0xb78   :  { %v1397_v31 = vsel %vm112_vm2, %v1392_v24, 0.0 }
 0xb79   :  { %1398 = vadd.xlane.f32.xlu0 %v1397_v31 }
 0xb7b   :  { %v955_v41 = vpop.xlane.xlu1 %954 }
 0xb84   :  { %v512_v51 = vpop.xlane.xlu2 %511 }
 0xb85   :  { %v516_v29 = vmul.f32 %v512_v51, %v3194_v58 }
 0xb87   :  { %v518_v62 = vadd.f32 1e-05, %v516_v29 }
 0xb89   :  { %2186 = vrsqrt.f32 %v518_v62  ;;  %vm526_vm8 = vweird.f32 %v518_v62 }
 0xb8f   :  { %v2187_v37 = vpop.eup %2186 }
 0xb90   :  { %v521_v45 = vmul.f32 %v2187_v37, %v518_v62  ;;  %v1826_v53 = vpop.xlane.xlu2 %1825  ;;  %vm527_vm10 = vweird.f32 %v2187_v37 }
 0xb91   :  { %v1828_v63 = vmul.f32 %v1826_v53, %v3194_v58  ;;  %vm528_vm15 = vmor %vm526_vm8, %vm527_vm10 }
 0xb92   :  { %v522_v2 = vmul.f32 %v2187_v37, %v521_v45 }
 0xb93   :  { %v3263_v55 = vsub.f32 %v1812_v44, %v1828_v63 }
 0xb94   :  { %v523_v7 = vmul.f32 0.5, %v522_v2 }
 0xb95   :  { %v1832_v25 = vmul.f32 %v3263_v55, %v3263_v55 }
 0xb96   :  { %v524_v38 = vsub.f32 1.5, %v523_v7 }
 0xb97   :  { %1837 = vrot.lane.b32.xlu1 %v1832_v25, %s2235_s5 }
 0xb98   :  { %v525_v17 = vmul.f32 %v2187_v37, %v524_v38  ;;  %v958_v42 = vpop.xlane.xlu2 %957 }
 0xb99   :  { %v960_v6 = vmul.f32 %v958_v42, %v3194_v58 }
 0xb9a   :  { %v529_v57 = vsel %vm528_vm15, %v2187_v37, %v525_v17 }
 0xb9b   :  { %v540_v21 = vmul.f32 %v529_v57, %v506_v18  ;;  %v959_v18 = vmul.f32 %v955_v41, %v3194_v58  ;;  %v962_v15 = vadd.f32 1e-05, %v960_v6 }
 0xb9d   :  { %v545_v19 = vmul.f32 %v2149_v30, %v540_v21  ;;  %v961_v54 = vadd.f32 1e-05, %v959_v18  ;;  %vm979_vm9 = vweird.f32 %v962_v15 }
 0xb9f   :  { %v550_v27 = vadd.f32 %v2150_v0, %v545_v19 }
 0xba1   :  { %552 = vst.msk [vmem:[#allocation3] sm:$0xff] %vm112_vm2, %v550_v27 }
 0xba2   :  { %v515_v60 = vpop.xlane.xlu0 %514 }
 0xba3   :  { %v517_v40 = vmul.f32 %v515_v60, %v3194_v58 }
 0xba5   :  { %v519_v5 = vadd.f32 1e-05, %v517_v40 }
 0xba7   :  { %2188 = vrsqrt.f32 %v519_v5  ;;  %vm536_vm1 = vweird.f32 %v519_v5 }
 0xba8   :  { %2190 = vrsqrt.f32 %v961_v54 }
 0xba9   :  { %2192 = vrsqrt.f32 %v962_v15 }
 0xbaa   :  { %v1823_v1 = vpop.xlane.xlu0 %1822 }
 0xbab   :  { %v1827_v16 = vmul.f32 %v1823_v1, %v3194_v58 }
 0xbad   :  { %v2189_v13 = vpop.eup %2188  ;;  %v3275_v56 = vsub.f32 %v3219_v20, %v1827_v16 }
 0xbae   :  { %v531_v10 = vmul.f32 %v2189_v13, %v519_v5  ;;  %vm537_vm3 = vweird.f32 %v2189_v13  ;;  %v2191_v32 = vpop.eup %2190 }
 0xbaf   :  { %v1831_v33 = vmul.f32 %v3275_v56, %v3275_v56  ;;  %vm538_vm11 = vmor %vm536_vm1, %vm537_vm3  ;;  %v2193_v46 = vpop.eup %2192  ;;  %v964_v12 = vmul.f32 %v2191_v32, %v961_v54  ;;  %vm970_vm12 = vweird.f32 %v2191_v32 }
 0xbb0   :  { %v532_v28 = vmul.f32 %v2189_v13, %v531_v10  ;;  %vm980_vm6 = vweird.f32 %v2193_v46 }
 0xbb1   :  { %1835 = vrot.lane.b32.xlu0 %v1831_v33, %s2235_s5  ;;  %v965_v50 = vmul.f32 %v2191_v32, %v964_v12  ;;  %vm981_vm5 = vmor %vm979_vm9, %vm980_vm6 }
 0xbb2   :  { %v533_v43 = vmul.f32 0.5, %v532_v28 }
 0xbb3   :  { %v966_v61 = vmul.f32 0.5, %v965_v50 }
 0xbb4   :  { %v534_v44 = vsub.f32 1.5, %v533_v43 }
 0xbb6   :  { %v535_v48 = vmul.f32 %v2189_v13, %v534_v44 }
 0xbb8   :  { %v539_v22 = vsel %vm538_vm11, %v2189_v13, %v535_v48 }
 0xbb9   :  { %v541_v14 = vmul.f32 %v539_v22, %v507_v26  ;;  %990 = vrot.lane.b32.xlu0 %v2150_v0, %s2236_s8  ;;  %v974_v26 = vmul.f32 %v2193_v46, %v962_v15  ;;  %v1430_v22 = vpop.permute.xlu2 %1429 }
 0xbbb   :  { %v546_v8 = vmul.f32 %v2149_v30, %v541_v14  ;;  %v975_v34 = vmul.f32 %v2193_v46, %v974_v26 }
 0xbbd   :  { %v551_v20 = vadd.f32 %v2150_v0, %v546_v8  ;;  %v976_v4 = vmul.f32 0.5, %v975_v34 }
 0xbbf   :  { %553 = vst.msk [vmem:[#allocation3 + $0x8] sm:$0xff] %vm112_vm2, %v551_v20  ;;  %v977_v24 = vsub.f32 1.5, %v976_v4 }
 0xbc1   :  { %1401 = vadd.xlane.f32.xlu1 %v1400_v52  ;;  %v978_v51 = vmul.f32 %v2193_v46, %v977_v24 }
 0xbc3   :  { %v982_v62 = vsel %vm981_vm5, %v2193_v46, %v978_v51 }
 0xbc4   :  { %v984_v45 = vmul.f32 %v982_v62, %v3198_v23 }
 0xbda   :  { %985 = vrot.lane.b32.xlu1 %v2149_v30, %s2236_s8 }
 0xbe2   :  { %1873 = vrot.lane.b32.xlu1 %v2149_v30, %s2238_s28  ;;  %v967_v30 = vsub.f32 1.5, %v966_v61 }
 0xbe4   :  { %v968_v9 = vmul.f32 %v2191_v32, %v967_v30 }
 0xbec   :  { %v1399_v35 = vpop.xlane.xlu0 %1398 }
 0xbed   :  { %v1403_v17 = vmul.f32 %v1399_v35, %v3194_v58 }
 0xbef   :  { %v1405_v21 = vadd.f32 1e-05, %v1403_v17 }
 0xbf1   :  { %2194 = vrsqrt.f32 %v1405_v21  ;;  %vm1413_vm10 = vweird.f32 %v1405_v21 }
 0xbf7   :  { %v2195_v19 = vpop.eup %2194 }
 0xbf8   :  { %v1408_v40 = vmul.f32 %v2195_v19, %v1405_v21 }
 0xbfa   :  { %v1409_v1 = vmul.f32 %v2195_v19, %v1408_v40 }
 0xbfc   :  { %v1410_v33 = vmul.f32 0.5, %v1409_v1 }
 0xbfe   :  { %v1411_v48 = vsub.f32 1.5, %v1410_v33 }
 0xc00   :  { %v1412_v20 = vmul.f32 %v2195_v19, %v1411_v48 }
 0xc09   :  { %v1838_v3 = vpop.permute.xlu1 %1837 }
 0xc0a   :  { %v1844_v47 = vsel %vm112_vm2, %v1838_v3, 0.0  ;;  %v2118_v3 = vld [vmem:[%s3335_s12 + $0x8] sm:$0xff] }
 0xc0b   :  { %1845 = vadd.xlane.f32.xlu0 %v1844_v47  ;;  %1920 = vmatpush.bf16.msra.mxu2 %v2118_v3  ;;  %v2117_v47 = vld [vmem:[%s3335_s12] sm:$0xff] }
 0xc0f   :  { %1921 = vmatpush.bf16.msra.mxu2 %v2117_v47 }
 0xc1f   :  { %1878 = vrot.lane.b32.xlu0 %v2150_v0, %s2238_s28 }
 0xc23   :  { %v1836_v59 = vpop.permute.xlu0 %1835 }
 0xc24   :  { %v1841_v49 = vsel %vm112_vm2, %v1836_v59, 0.0  ;;  %vm969_vm2 = vweird.f32 %v961_v54 }
 0xc25   :  { %1842 = vadd.xlane.f32.xlu2 %v1841_v49  ;;  %vm971_vm14 = vmor %vm969_vm2, %vm970_vm12 }
 0xc26   :  { %v972_v29 = vsel %vm971_vm14, %v2191_v32, %v968_v9 }
 0xc27   :  { %v983_v37 = vmul.f32 %v972_v29, %v3207_v39 }
 0xc2b   :  { %v991_v63 = vpop.permute.xlu0 %990 }
 0xc34   :  { %v1402_v31 = vpop.xlane.xlu1 %1401 }
 0xc35   :  { %v1404_v57 = vmul.f32 %v1402_v31, %v3194_v58 }
 0xc3d   :  { %1434 = vrot.lane.b32.xlu2 %v2150_v0, %s2237_s25  ;;  %v1406_v0 = vadd.f32 1e-05, %v1404_v57 }
 0xc3f   :  { %2196 = vrsqrt.f32 %v1406_v0  ;;  %vm1423_vm1 = vweird.f32 %v1406_v0 }
 0xc45   :  { %v2197_v27 = vpop.eup %2196 }
 0xc46   :  { %v1418_v5 = vmul.f32 %v2197_v27, %v1406_v0  ;;  %vm1424_vm8 = vweird.f32 %v2197_v27 }
 0xc47   :  { %vm1425_vm11 = vmor %vm1423_vm1, %vm1424_vm8 }
 0xc48   :  { %v1419_v16 = vmul.f32 %v2197_v27, %v1418_v5 }
 0xc4a   :  { %v1420_v28 = vmul.f32 0.5, %v1419_v16 }
 0xc4c   :  { %v986_v53 = vpop.permute.xlu1 %985  ;;  %v1421_v14 = vsub.f32 1.5, %v1420_v28 }
 0xc4d   :  { %v988_v2 = vmul.f32 %v986_v53, %v983_v37  ;;  %v989_v7 = vmul.f32 %v986_v53, %v984_v45 }
 0xc4e   :  { %v1422_v41 = vmul.f32 %v2197_v27, %v1421_v14 }
 0xc4f   :  { %v993_v25 = vadd.f32 %v991_v63, %v988_v2  ;;  %v994_v38 = vadd.f32 %v991_v63, %v989_v7  ;;  %v2151_v2 = vld [vmem:[%s3336_s13] ss:$0 sm:$0xff] }
 0xc50   :  { %v1426_v6 = vsel %vm1425_vm11, %v2197_v27, %v1422_v41 }
 0xc51   :  { %996 = vst.msk [vmem:[#allocation3] sm:$0xff] %vm995_vm4, %v993_v25  ;;  %v1428_v32 = vmul.f32 %v1426_v6, %v3235_v36 }
 0xc52   :  { %997 = vst.msk [vmem:[#allocation3 + $0x8] sm:$0xff] %vm995_vm4, %v994_v38  ;;  %vm1414_vm4 = vweird.f32 %v2195_v19 }
 0xc53   :  { %vm1415_vm3 = vmor %vm1413_vm10, %vm1414_vm4  ;;  %v1433_v50 = vmul.f32 %v1430_v22, %v1428_v32 }
 0xc54   :  { %v1416_v35 = vsel %vm1415_vm3, %v2195_v19, %v1412_v20  ;;  %v1874_v46 = vpop.permute.xlu1 %1873 }
 0xc55   :  { %v1427_v49 = vmul.f32 %v1416_v35, %v3242_v11 }
 0xc57   :  { %v1432_v12 = vmul.f32 %v1430_v22, %v1427_v49 }
 0xc7e   :  { %v1846_v39 = vpop.xlane.xlu0 %1845 }
 0xc7f   :  { %v1848_v23 = vmul.f32 %v1846_v39, %v3194_v58 }
 0xc81   :  { %v1850_v60 = vadd.f32 1e-05, %v1848_v23 }
 0xc83   :  { %2198 = vrsqrt.f32 %v1850_v60  ;;  %vm1867_vm12 = vweird.f32 %v1850_v60 }
 0xc89   :  { %v2199_v13 = vpop.eup %2198 }
 0xc8a   :  { %v1862_v10 = vmul.f32 %v2199_v13, %v1850_v60  ;;  %vm1868_vm15 = vweird.f32 %v2199_v13 }
 0xc8b   :  { %vm1869_vm6 = vmor %vm1867_vm12, %vm1868_vm15 }
 0xc8c   :  { %v1863_v43 = vmul.f32 %v2199_v13, %v1862_v10 }
 0xc8e   :  { %v1864_v44 = vmul.f32 0.5, %v1863_v43 }
 0xc90   :  { %v1865_v8 = vsub.f32 1.5, %v1864_v44 }
 0xc91   :  { %v1879_v34 = vpop.permute.xlu0 %1878 }
 0xc92   :  { %v1866_v52 = vmul.f32 %v2199_v13, %v1865_v8 }
 0xc94   :  { %v1870_v42 = vsel %vm1869_vm6, %v2199_v13, %v1866_v52 }
 0xc95   :  { %v1872_v54 = vmul.f32 %v1870_v42, %v3263_v55 }
 0xc97   :  { %v1877_v26 = vmul.f32 %v1874_v46, %v1872_v54 }
 0xc98   :  { %v1843_v18 = vpop.xlane.xlu2 %1842 }
 0xc99   :  { %v1847_v59 = vmul.f32 %v1843_v18, %v3194_v58  ;;  %v1882_v31 = vadd.f32 %v1879_v34, %v1877_v26 }
 0xc9b   :  { %v1849_v15 = vadd.f32 1e-05, %v1847_v59 }
 0xc9d   :  { %2200 = vrsqrt.f32 %v1849_v15  ;;  %vm1857_vm14 = vweird.f32 %v1849_v15 }
 0xca0   :  { %v1435_v61 = vpop.permute.xlu2 %1434 }
 0xca1   :  { %v1437_v4 = vadd.f32 %v1435_v61, %v1432_v12  ;;  %v1438_v30 = vadd.f32 %v1435_v61, %v1433_v50 }
 0xca3   :  { %v2201_v24 = vpop.eup %2200  ;;  %1440 = vst.msk [vmem:[#allocation3] sm:$0xff] %vm1439_vm7, %v1437_v4 }
 0xca4   :  { %v1852_v58 = vmul.f32 %v2201_v24, %v1849_v15  ;;  %1441 = vst.msk [vmem:[#allocation3 + $0x8] sm:$0xff] %vm1439_vm7, %v1438_v30  ;;  %vm1858_vm2 = vweird.f32 %v2201_v24 }
 0xca5   :  { %1885 = vst.msk [vmem:[#allocation3 + $0x8] sm:$0xff] %vm1883_vm13, %v1882_v31  ;;  %vm1859_vm9 = vmor %vm1857_vm14, %vm1858_vm2 }
 0xca6   :  { %v1853_v36 = vmul.f32 %v2201_v24, %v1852_v58 }
 0xca8   :  { %v1854_v11 = vmul.f32 0.5, %v1853_v36 }
 0xcaa   :  { %v1855_v55 = vsub.f32 1.5, %v1854_v11 }
 0xcac   :  { %v1856_v9 = vmul.f32 %v2201_v24, %v1855_v55  ;;  %v1889_v53 = vld [vmem:[#allocation3 + $0x8] sm:$0xff] }
 0xcae   :  { %v1860_v51 = vsel %vm1859_vm9, %v2201_v24, %v1856_v9 }
 0xcaf   :  { %v1871_v29 = vmul.f32 %v1860_v51, %v3275_v56 }
 0xcb1   :  { %v1876_v62 = vmul.f32 %v1874_v46, %v1871_v29 }
 0xcb3   :  { %v1881_v37 = vadd.f32 %v1879_v34, %v1876_v62 }
 0xcb5   :  { %1884 = vst.msk [vmem:[#allocation3] sm:$0xff] %vm1883_vm13, %v1881_v37 }
 0xcbc   :  { %v1888_v45 = vld [vmem:[#allocation3] sm:$0xff] }
 0xcbd   :  { %v1890_v63 = vpack.c.bf16 %v1889_v53, %v1888_v45 }
 0xcbf   :  { %2097 = vmatmul.msk.bf16.vlgmr.msra.gmra.mxu2 %vm78_vm0, %v1890_v63 }
 0xd42   :  { %v1923_v7 = vpop.f32.mrf.mxu2 }
 0xd43   :  { %v1924_v25 = vadd.f32 %v2151_v2, %v1923_v7 }
 0xd45   :  { %1928 = vst.msk [vmem:[#allocation5] sm:$0xff] %vm78_vm0, %v1924_v25 }
 0xd4a   :  { %v1925_v56 = vpop.f32.mrf.mxu2 }
 0xd4b   :  { %v1926_v38 = vadd.f32 %v2151_v2, %v1925_v56 }
 0xd4d   :  { %1929 = vst.msk [vmem:[#allocation5 + $0x8] sm:$0xff] %vm78_vm0, %v1926_v38 }
 0xd4e   :  { %1942 = dma.vmem_to_hbm [thread:$0]  %s1935_s27, 256, %s1937_s17, [#allocation6], %s2241_s0, %s2241_s0, %s2236_s8  }
 0xd4f   :  { %2229 = dma.done.wait [#allocation6], 256  }
 0xd50   :  { %2230 = vsyncadd [#allocation6], 4294967040 }
 0xd51   :  { %1951 = vsyncpa [#allocation6], 1 }

</bundles_post_ra>
